<compile_context>
chip_gen: v5e
topology: v5e:2x2
jax: 0.10.0
libtpu: 0.0.40
codegen_flags: <defaults>
</compile_context>

<pallas_src>
import functools

import jax
import jax.numpy as jnp
import numpy as np
from jax import lax
from jax.experimental import pallas as pl
from jax.experimental.pallas import tpu as pltpu


# ------------------------------ fused kernel ------------------------------

def _conv_pool_conv_kernel(x_ref, w1b_ref, b1_ref, w2b_ref, b2_ref, o_ref):
    """conv1 + ReLU + 2x2 max-pool + conv2 + ReLU for one batch block.

    x_ref   : (Nb, Cin*H*W)            flattened images (lane-dense)
    w1b_ref : (4, Cin*H*W, PH*PW*C1)   banded conv1 weights, one slab per
                                       2x2 pool-window member (r, s)
    b1_ref  : (1, PH*PW*C1)            conv1 bias tiled over pooled positions
    w2b_ref : (PH*PW*C1, OH2*OW2*C2)   banded conv2 weights
    b2_ref  : (1, OH2*OW2*C2)          conv2 bias tiled over output positions
    o_ref   : (Nb, OH2*OW2*C2)
    """
    f32 = jnp.float32
    x = x_ref[...]                                            # (Nb, CHW)

    # conv1 (pre-bias) evaluated directly at the four 2x2 pool-window members;
    # the max-pool is then just an elementwise max of the four matmul results.
    m = jnp.dot(x, w1b_ref[0], preferred_element_type=f32)
    for t in range(1, 4):
        m = jnp.maximum(m, jnp.dot(x, w1b_ref[t], preferred_element_type=f32))

    # Per-channel bias add and ReLU commute with max, so applying them once
    # after the pool is exact (and 4x cheaper).
    pooled = jnp.maximum(m + b1_ref[...], 0.0)                # (Nb, PH*PW*C1)

    # conv2 + bias + ReLU: one MXU matmul contracting all of (K, K, C1).
    y = jnp.dot(pooled, w2b_ref[...], preferred_element_type=f32)
    o_ref[...] = jnp.maximum(y + b2_ref[...], 0.0).astype(o_ref.dtype)


# ------------------------- banded-weight construction ----------------------

def _shift_onehot(in_len, out_len, k, stride, pad, scale=1, offset=0):
    """A[x, o, t] = 1.0 iff x == (scale*o + offset)*stride - pad + t."""
    xs = jnp.arange(in_len)[:, None, None]
    base = (scale * jnp.arange(out_len) + offset)[None, :, None] * stride - pad
    ts = jnp.arange(k)[None, None, :]
    return (xs == base + ts).astype(jnp.float32)


# ------------------------------ host wrapper -------------------------------

def _fused_forward(x_nchw, w1, b1, w2, b2, *, stride=1, padding=0):
    """NCHW in / NCHW out, matching the PyTorch ConvLayer forward."""
    N, Cin, H, W = x_nchw.shape
    C1, _, K, _ = w1.shape
    C2 = w2.shape[0]
    hp = lax.Precision.HIGHEST

    OH1 = (H + 2 * padding - K) // stride + 1
    OW1 = (W + 2 * padding - K) // stride + 1
    if OH1 < 2 or OW1 < 2:
        raise ValueError("input too small for conv1 followed by a 2x2 max-pool")
    PH, PW = OH1 // 2, OW1 // 2              # MaxPool2d(2,2) floor mode
    OH2 = (PH + 2 * padding - K) // stride + 1
    OW2 = (PW + 2 * padding - K) // stride + 1
    if OH2 < 1 or OW2 < 1:
        raise ValueError("input too small for the second convolution")

    CHW = Cin * H * W
    PPC = PH * PW * C1
    OOC = OH2 * OW2 * C2

    # ---- banded ("weight-side im2col") matrices, built once per call.
    # B1_{r,s}[(c,h,w), (p,q,o)] = w1[o,c,ki,kj] iff the input pixel (c,h,w)
    # is the (ki,kj) tap of the conv1 output feeding pool cell (p,q) via the
    # pool-window member (r,s); zero-padding falls out as all-zero rows.
    w1f = w1.astype(jnp.float32)
    w2f = w2.astype(jnp.float32)
    slabs = []
    for r in (0, 1):
        ah = _shift_onehot(H, PH, K, stride, padding, scale=2, offset=r)
        for s in (0, 1):
            aw = _shift_onehot(W, PW, K, stride, padding, scale=2, offset=s)
            slab = jnp.einsum('ocij,hpi,wqj->chwpqo', w1f, ah, aw, precision=hp)
            slabs.append(slab.reshape(CHW, PPC))
    w1_banded = jnp.stack(slabs, axis=0)                       # (4, CHW, PPC)

    a2h = _shift_onehot(PH, OH2, K, stride, padding)
    a2w = _shift_onehot(PW, OW2, K, stride, padding)
    w2_banded = jnp.einsum('deij,pui,qvj->pqeuvd', w2f, a2h, a2w,
                           precision=hp).reshape(PPC, OOC)     # (PPC, OOC)

    b1_tiled = jnp.tile(b1.astype(jnp.float32), PH * PW).reshape(1, PPC)
    b2_tiled = jnp.tile(b2.astype(jnp.float32), OH2 * OW2).reshape(1, OOC)

    # Keep well inside the default 32 MiB scoped-VMEM limit (double-buffered).
    weight_bytes = 4 * (4 * CHW * PPC + PPC * OOC)
    if 2 * weight_bytes > 24 * 1024 * 1024:
        # TODO(synk): row-banded / row-tiled conv1 with a (K-1) halo for large images.
        raise ValueError("spatial dims too large for the whole-image banded kernel")

    # ---- batch blocking: Nb images per grid step, batch zero-padded up.
    Nb = N if N <= 8 else 8                  # 8 = sublane granularity
    Npad = ((N + Nb - 1) // Nb) * Nb
    x_flat = x_nchw.astype(jnp.float32).reshape(N, CHW)
    if Npad != N:
        x_flat = jnp.pad(x_flat, ((0, Npad - N), (0, 0)))

    out_flat = pl.pallas_call(
        _conv_pool_conv_kernel,
        out_shape=jax.ShapeDtypeStruct((Npad, OOC), jnp.float32),
        grid=(Npad // Nb,),
        in_specs=[
            pl.BlockSpec((Nb, CHW), lambda n: (n, 0)),          # images
            pl.BlockSpec((4, CHW, PPC), lambda n: (0, 0, 0)),   # conv1 bands
            pl.BlockSpec((1, PPC), lambda n: (0, 0)),           # bias1
            pl.BlockSpec((PPC, OOC), lambda n: (0, 0)),         # conv2 band
            pl.BlockSpec((1, OOC), lambda n: (0, 0)),           # bias2
        ],
        out_specs=pl.BlockSpec((Nb, OOC), lambda n: (n, 0)),
        compiler_params=pltpu.CompilerParams(
            dimension_semantics=("parallel",)),                 # megacore / 2xTC
    )(x_flat, w1_banded, b1_tiled, w2_banded, b2_tiled)

    out = out_flat[:N].reshape(N, OH2, OW2, C2)                 # lane-dense unpack
    return jnp.transpose(out, (0, 3, 1, 2))                     # back to NCHW


# ------------------------------- the module --------------------------------

class ConvLayerPallas:
    """Mirrors the PyTorch ConvLayer forward pass (Conv2d->ReLU->MaxPool->Conv2d->ReLU)."""

    def __init__(self, key, in_channels=1, kernel_size=5, out_channels=32,
                 stride=1, padding=0):
        k1, k2, k3, k4 = jax.random.split(key, 4)
        K = kernel_size
        fan1 = in_channels * K * K
        fan2 = 32 * K * K
        self.w1 = jax.random.uniform(k1, (32, in_channels, K, K),
                                     jnp.float32, -1.0, 1.0) / np.sqrt(fan1)
        self.b1 = jax.random.uniform(k2, (32,), jnp.float32, -1.0, 1.0) / np.sqrt(fan1)
        self.w2 = jax.random.uniform(k3, (out_channels, 32, K, K),
                                     jnp.float32, -1.0, 1.0) / np.sqrt(fan2)
        self.b2 = jax.random.uniform(k4, (out_channels,), jnp.float32, -1.0, 1.0) / np.sqrt(fan2)
        self._forward = jax.jit(functools.partial(
            _fused_forward, stride=stride, padding=padding))

    def __call__(self, x):
        return self._forward(x, self.w1, self.b1, self.w2, self.b2)


# ------------------------------ reference check ----------------------------

def _reference(x, w1, b1, w2, b2, stride=1, padding=0):
    dn = ("NCHW", "OIHW", "NCHW")
    pad = [(padding, padding), (padding, padding)]
    hp = lax.Precision.HIGHEST
    y = lax.conv_general_dilated(x, w1, (stride, stride), pad,
                                 dimension_numbers=dn, precision=hp)
    y = jnp.maximum(y + b1[None, :, None, None], 0.0)
    y = lax.reduce_window(y, -jnp.inf, lax.max,
                          (1, 1, 2, 2), (1, 1, 2, 2), "VALID")
    y = lax.conv_general_dilated(y, w2, (stride, stride), pad,
                                 dimension_numbers=dn, precision=hp)
    y = jnp.maximum(y + b2[None, :, None, None], 0.0)
    return y


if __name__ == "__main__":
    key = jax.random.PRNGKey(0)
    kx, kp = jax.random.split(key)

    # batch=16 -> two batch-blocks of 8 (exercises the blocked grid and the
    # "parallel" axis).  Per image: (1,16,16) -> conv1 (32,12,12) -> pool
    # (32,6,6) -> conv2 (32,2,2).
    x = jax.random.normal(kx, (16, 1, 16, 16), jnp.float32)

    layer = ConvLayerPallas(kp, in_channels=1, kernel_size=5, out_channels=32)
    out = jax.block_until_ready(layer(x))

    ref = _reference(x, layer.w1, layer.b1, layer.w2, layer.b2)
    np.testing.assert_allclose(np.asarray(out), np.asarray(ref),
                               rtol=1e-4, atol=1e-5)
    assert out.shape == (16, 32, 2, 2), out.shape
    print("KERNEL_OK")
</pallas_src>

<mosaic_0001>
module attributes {stable_mosaic.version = 11 : i64} {
  func.func @_conv_pool_conv_kernel(%arg0: i32, %arg1: memref<8x256xf32, #tpu.memory_space<vmem>>, %arg2: memref<4x256x1152xf32, #tpu.memory_space<vmem>>, %arg3: memref<1x1152xf32, #tpu.memory_space<vmem>>, %arg4: memref<1152x128xf32, #tpu.memory_space<vmem>>, %arg5: memref<1x128xf32, #tpu.memory_space<vmem>>, %arg6: memref<8x128xf32, #tpu.memory_space<vmem>>) attributes {dimension_semantics = [#tpu.dimension_semantics<parallel>], iteration_bounds = array<i64: 2>, scalar_prefetch = 0 : i64, scratch_operands = 0 : i64, tpu.core_type = #tpu.core_type<tc>, window_params = [{transform_indices = @transform_0, window_bounds = array<i64: 8, 256>}, {pipeline_mode = #tpu.pipeline_mode<synchronous>, transform_indices = @transform_1, window_bounds = array<i64: 4, 256, 1152>}, {pipeline_mode = #tpu.pipeline_mode<synchronous>, transform_indices = @transform_2, window_bounds = array<i64: 1, 1152>}, {pipeline_mode = #tpu.pipeline_mode<synchronous>, transform_indices = @transform_3, window_bounds = array<i64: 1152, 128>}, {pipeline_mode = #tpu.pipeline_mode<synchronous>, transform_indices = @transform_4, window_bounds = array<i64: 1, 128>}, {transform_indices = @transform_5, window_bounds = array<i64: 8, 128>}]} {
    %c0 = arith.constant 0 : index
    %c0_0 = arith.constant 0 : index
    %0 = vector.load %arg1[%c0, %c0_0] : memref<8x256xf32, #tpu.memory_space<vmem>>, vector<8x256xf32>
    %c0_1 = arith.constant 0 : index
    %c0_2 = arith.constant 0 : index
    %c0_3 = arith.constant 0 : index
    %1 = vector.load %arg2[%c0_1, %c0_2, %c0_3] : memref<4x256x1152xf32, #tpu.memory_space<vmem>>, vector<1x256x1152xf32>
    %2 = vector.shape_cast %1 : vector<1x256x1152xf32> to vector<256x1152xf32>
    %cst = arith.constant dense<0.000000e+00> : vector<8x1152xf32>
    %3 = tpu.matmul %0, %2, %cst {dimension_numbers = #tpu.dot_dimension_numbers<[1], [0], [0], [1], [0, 0, 1, 1], [], []>} : vector<8x256xf32>, vector<256x1152xf32>, vector<8x1152xf32> -> vector<8x1152xf32>
    %c1 = arith.constant 1 : index
    %c0_4 = arith.constant 0 : index
    %c0_5 = arith.constant 0 : index
    %4 = vector.load %arg2[%c1, %c0_4, %c0_5] : memref<4x256x1152xf32, #tpu.memory_space<vmem>>, vector<1x256x1152xf32>
    %5 = vector.shape_cast %4 : vector<1x256x1152xf32> to vector<256x1152xf32>
    %cst_6 = arith.constant dense<0.000000e+00> : vector<8x1152xf32>
    %6 = tpu.matmul %0, %5, %cst_6 {dimension_numbers = #tpu.dot_dimension_numbers<[1], [0], [0], [1], [0, 0, 1, 1], [], []>} : vector<8x256xf32>, vector<256x1152xf32>, vector<8x1152xf32> -> vector<8x1152xf32>
    %7 = arith.maximumf %3, %6 : vector<8x1152xf32>
    %c2 = arith.constant 2 : index
    %c0_7 = arith.constant 0 : index
    %c0_8 = arith.constant 0 : index
    %8 = vector.load %arg2[%c2, %c0_7, %c0_8] : memref<4x256x1152xf32, #tpu.memory_space<vmem>>, vector<1x256x1152xf32>
    %9 = vector.shape_cast %8 : vector<1x256x1152xf32> to vector<256x1152xf32>
    %cst_9 = arith.constant dense<0.000000e+00> : vector<8x1152xf32>
    %10 = tpu.matmul %0, %9, %cst_9 {dimension_numbers = #tpu.dot_dimension_numbers<[1], [0], [0], [1], [0, 0, 1, 1], [], []>} : vector<8x256xf32>, vector<256x1152xf32>, vector<8x1152xf32> -> vector<8x1152xf32>
    %11 = arith.maximumf %7, %10 : vector<8x1152xf32>
    %c3 = arith.constant 3 : index
    %c0_10 = arith.constant 0 : index
    %c0_11 = arith.constant 0 : index
    %12 = vector.load %arg2[%c3, %c0_10, %c0_11] : memref<4x256x1152xf32, #tpu.memory_space<vmem>>, vector<1x256x1152xf32>
    %13 = vector.shape_cast %12 : vector<1x256x1152xf32> to vector<256x1152xf32>
    %cst_12 = arith.constant dense<0.000000e+00> : vector<8x1152xf32>
    %14 = tpu.matmul %0, %13, %cst_12 {dimension_numbers = #tpu.dot_dimension_numbers<[1], [0], [0], [1], [0, 0, 1, 1], [], []>} : vector<8x256xf32>, vector<256x1152xf32>, vector<8x1152xf32> -> vector<8x1152xf32>
    %15 = arith.maximumf %11, %14 : vector<8x1152xf32>
    %c0_13 = arith.constant 0 : index
    %c0_14 = arith.constant 0 : index
    %16 = vector.load %arg3[%c0_13, %c0_14] : memref<1x1152xf32, #tpu.memory_space<vmem>>, vector<1x1152xf32>
    %17 = vector.broadcast %16 : vector<1x1152xf32> to vector<8x1152xf32>
    %18 = arith.addf %15, %17 : vector<8x1152xf32>
    %cst_15 = arith.constant 0.000000e+00 : f32
    %19 = vector.broadcast %cst_15 : f32 to vector<8x1152xf32>
    %20 = arith.maximumf %18, %19 : vector<8x1152xf32>
    %c0_16 = arith.constant 0 : index
    %c0_17 = arith.constant 0 : index
    %21 = vector.load %arg4[%c0_16, %c0_17] : memref<1152x128xf32, #tpu.memory_space<vmem>>, vector<1152x128xf32>
    %cst_18 = arith.constant dense<0.000000e+00> : vector<8x128xf32>
    %22 = tpu.matmul %20, %21, %cst_18 {dimension_numbers = #tpu.dot_dimension_numbers<[1], [0], [0], [1], [0, 0, 1, 1], [], []>} : vector<8x1152xf32>, vector<1152x128xf32>, vector<8x128xf32> -> vector<8x128xf32>
    %c0_19 = arith.constant 0 : index
    %c0_20 = arith.constant 0 : index
    %23 = vector.load %arg5[%c0_19, %c0_20] : memref<1x128xf32, #tpu.memory_space<vmem>>, vector<1x128xf32>
    %24 = vector.broadcast %23 : vector<1x128xf32> to vector<8x128xf32>
    %25 = arith.addf %22, %24 : vector<8x128xf32>
    %cst_21 = arith.constant 0.000000e+00 : f32
    %26 = vector.broadcast %cst_21 : f32 to vector<8x128xf32>
    %27 = arith.maximumf %25, %26 : vector<8x128xf32>
    %c0_22 = arith.constant 0 : index
    %c0_23 = arith.constant 0 : index
    %28 = vector.load %arg6[%c0_22, %c0_23] : memref<8x128xf32, #tpu.memory_space<vmem>>, vector<8x128xf32>
    tpu.vector_store %arg6[%c0_22, %c0_23], %27 {strides = array<i32>} : memref<8x128xf32, #tpu.memory_space<vmem>>, vector<8x128xf32>,
    return
  }
  func.func @transform_0(%arg0: i32) -> (i32, i32) {
    %c0_i32 = arith.constant 0 : i32
    %c0_i32_0 = arith.constant 0 : i32
    return %arg0, %c0_i32 : i32, i32
  }
  func.func @transform_1(%arg0: i32) -> (i32, i32, i32) {
    %c0_i32 = arith.constant 0 : i32
    %c0_i32_0 = arith.constant 0 : i32
    %c0_i32_1 = arith.constant 0 : i32
    %c0_i32_2 = arith.constant 0 : i32
    return %c0_i32, %c0_i32_0, %c0_i32_1 : i32, i32, i32
  }
  func.func @transform_2(%arg0: i32) -> (i32, i32) {
    %c0_i32 = arith.constant 0 : i32
    %c0_i32_0 = arith.constant 0 : i32
    %c0_i32_1 = arith.constant 0 : i32
    return %c0_i32, %c0_i32_0 : i32, i32
  }
  func.func @transform_3(%arg0: i32) -> (i32, i32) {
    %c0_i32 = arith.constant 0 : i32
    %c0_i32_0 = arith.constant 0 : i32
    %c0_i32_1 = arith.constant 0 : i32
    return %c0_i32, %c0_i32_0 : i32, i32
  }
  func.func @transform_4(%arg0: i32) -> (i32, i32) {
    %c0_i32 = arith.constant 0 : i32
    %c0_i32_0 = arith.constant 0 : i32
    %c0_i32_1 = arith.constant 0 : i32
    return %c0_i32, %c0_i32_0 : i32, i32
  }
  func.func @transform_5(%arg0: i32) -> (i32, i32) {
    %c0_i32 = arith.constant 0 : i32
    %c0_i32_0 = arith.constant 0 : i32
    return %arg0, %c0_i32 : i32, i32
  }
}

</mosaic_0001>

<bundles_post_ra>
// kernel: tile.13
= control target key start
LH: loop header
LB: loop body
LE: loop exit
PB: predicated region body
PF: predicated region fallthrough
CT: control target
= control target key end

     0   :  { %s46_s0 = inlined_call_operand.vmem [shape: f32[32], index: 0, kind: input, shape index: {}]   ;;  %s47_s1 = inlined_call_operand.vmem [shape: f32[36,32], index: 1, kind: output, shape index: {}]  }
   0x1   :  { %v4_v0 = vld [vmem:[%s46_s0] ss:$0 sm:$0xff] }
   0x2   :  { %5 = vst [vmem:[%s47_s1] sm:$0xff] %v4_v0 }
   0x3   :  { %14 = vst [vmem:[%s47_s1 + $0x8] sm:$0xff] %v4_v0 }
   0x4   :  { %15 = vst [vmem:[%s47_s1 + $0x10] sm:$0xff] %v4_v0 }
   0x5   :  { %16 = vst [vmem:[%s47_s1 + $0x18] sm:$0xff] %v4_v0 }
   0x6   :  { %17 = vst [vmem:[%s47_s1 + $0x20] sm:$0xff] %v4_v0 }

// kernel: tile.14
= control target key start
LH: loop header
LB: loop body
LE: loop exit
PB: predicated region body
PF: predicated region fallthrough
CT: control target
= control target key end

     0   :  { %s125_s10 = smov 96   ;;  %s126_s11 = smov 64   ;;  %vm3_vm0 = vcmask 261120   ;;  %vm15_vm1 = vcmask 1048320   ;;  %vm29_vm2 = vcmask 785920   ;;  %vm43_vm3 = vcmask 523520   ;;  %s189_s0 = inlined_call_operand.vmem [shape: f32[36,32], index: 0, kind: input, shape index: {}]   ;;  %s190_s1 = inlined_call_operand.vmem [shape: f32[1,1152], index: 1, kind: output, shape index: {}]  }
   0x1   :  { %v108_v0 = vld [vmem:[%s189_s0 + $0x3] ss:$4 sm:$0xff]   ;;  %v110_v1 = vld [vmem:[%s189_s0 + $0x2] ss:$4 sm:$0xff]   ;;  %v112_v2 = vld [vmem:[%s189_s0 + $0x1] ss:$4 sm:$0xff]  }
   0x2   :  { %13 = vrot.lane.b32.xlu0 %v108_v0, %s125_s10  ;;  %27 = vrot.lane.b32.xlu1 %v110_v1, %s126_s11  ;;  %s127_s14 = smov 32   ;;  %v109_v3 = vld [vmem:[%s189_s0 + $0x23] sm:$0x1]   ;;  %v111_v4 = vld [vmem:[%s189_s0 + $0x22] sm:$0x1]  }
   0x3   :  { %41 = vrot.lane.b32.xlu2 %v112_v2, %s127_s14  ;;  %v113_v5 = vld [vmem:[%s189_s0 + $0x21] sm:$0x1]   ;;  %v2_v6 = vld [vmem:[%s189_s0] ss:$4 sm:$0xff]  }
   0x4   :  { %4 = vst.msk [vmem:[#allocation0] ss:$8 sm:$0xf] %vm3_vm0, %v2_v6   ;;  %v107_v8 = vld [vmem:[%s189_s0 + $0x20] sm:$0x1]  }
   0x5   :  { %5 = vst.msk [vmem:[#allocation0] ss:$8 sm:$0xf0] %vm3_vm0, %v2_v6  }
   0x6   :  { %10 = vst.msk [vmem:[#allocation0 + $0x40] sm:$0x1] %vm3_vm0, %v107_v8  }
   0xa   :  { %20 = vrot.lane.b32.xlu0 %v109_v3, %s125_s10  ;;  %34 = vrot.lane.b32.xlu1 %v111_v4, %s126_s11 }
   0xb   :  { %48 = vrot.lane.b32.xlu2 %v113_v5, %s127_s14 }
  0x5d   :  { %v42_v7 = vpop.permute.xlu2 %41  }
  0x65   :  { %v49_v9 = vpop.permute.xlu2 %48  }
  0x74   :  { %v14_v10 = vpop.permute.xlu0 %13   ;;  %v28_v11 = vpop.permute.xlu1 %27  }
  0x75   :  { %16 = vst.msk [vmem:[#allocation0] ss:$8 sm:$0xf] %vm15_vm1, %v14_v10  }
  0x76   :  { %17 = vst.msk [vmem:[#allocation0] ss:$8 sm:$0xf0] %vm15_vm1, %v14_v10  }
  0x77   :  { %30 = vst.msk [vmem:[#allocation0] ss:$8 sm:$0xf] %vm29_vm2, %v28_v11  }
  0x78   :  { %31 = vst.msk [vmem:[#allocation0] ss:$8 sm:$0xf0] %vm29_vm2, %v28_v11  }
  0x79   :  { %44 = vst.msk [vmem:[#allocation0] ss:$8 sm:$0xf] %vm43_vm3, %v42_v7  }
  0x7a   :  { %45 = vst.msk [vmem:[#allocation0] ss:$8 sm:$0xf0] %vm43_vm3, %v42_v7  }
  0x7c   :  { %v21_v12 = vpop.permute.xlu0 %20   ;;  %v35_v13 = vpop.permute.xlu1 %34  }
  0x7d   :  { %24 = vst.msk [vmem:[#allocation0 + $0x40] sm:$0x1] %vm15_vm1, %v21_v12  }
  0x7e   :  { %38 = vst.msk [vmem:[#allocation0 + $0x40] sm:$0x1] %vm29_vm2, %v35_v13  }
  0x7f   :  { %52 = vst.msk [vmem:[#allocation0 + $0x40] sm:$0x1] %vm43_vm3, %v49_v9  }
  0x80   :  { %v55_v14 = vld [vmem:[#allocation0] sm:$0x1]  ;;  %v60_v15 = vld [vmem:[#allocation0 + $0x8] sm:$0x1]  ;;  %v66_v16 = vld [vmem:[#allocation0 + $0x10] sm:$0x1] }
  0x81   :  { %58 = vst [vmem:[%s190_s1] sm:$0x1] %v55_v14  ;;  %v72_v17 = vld [vmem:[#allocation0 + $0x18] sm:$0x1]  ;;  %v78_v18 = vld [vmem:[#allocation0 + $0x20] sm:$0x1] }
  0x82   :  { %114 = vst [vmem:[%s190_s1 + $0x1] sm:$0x1] %v60_v15  ;;  %v84_v19 = vld [vmem:[#allocation0 + $0x28] sm:$0x1]  ;;  %v90_v20 = vld [vmem:[#allocation0 + $0x30] sm:$0x1] }
  0x83   :  { %115 = vst [vmem:[%s190_s1 + $0x2] sm:$0x1] %v66_v16  ;;  %v96_v21 = vld [vmem:[#allocation0 + $0x38] sm:$0x1] }
  0x84   :  { %116 = vst [vmem:[%s190_s1 + $0x3] sm:$0x1] %v72_v17 }
  0x85   :  { %117 = vst [vmem:[%s190_s1 + $0x4] sm:$0x1] %v78_v18 }
  0x86   :  { %118 = vst [vmem:[%s190_s1 + $0x5] sm:$0x1] %v84_v19  ;;  %v102_v22 = vld [vmem:[#allocation0 + $0x40] sm:$0x1] }
  0x87   :  { %119 = vst [vmem:[%s190_s1 + $0x6] sm:$0x1] %v90_v20 }
  0x88   :  { %120 = vst [vmem:[%s190_s1 + $0x7] sm:$0x1] %v96_v21 }
  0x89   :  { %121 = vst [vmem:[%s190_s1 + $0x8] sm:$0x1] %v102_v22 }

// kernel: tile.18
= control target key start
LH: loop header
LB: loop body
LE: loop exit
PB: predicated region body
PF: predicated region fallthrough
CT: control target
= control target key end

     0   :  { %s22_s0 = inlined_call_operand.vmem [shape: f32[32], index: 0, kind: input, shape index: {}]   ;;  %s23_s1 = inlined_call_operand.vmem [shape: f32[4,32], index: 1, kind: output, shape index: {}]  }
   0x1   :  { %v4_v0 = vld [vmem:[%s22_s0] ss:$0 sm:$0xff] }
   0x2   :  { %5 = vst [vmem:[%s23_s1] sm:$0xf] %v4_v0 }

// kernel: tile.19
= control target key start
LH: loop header
LB: loop body
LE: loop exit
PB: predicated region body
PF: predicated region fallthrough
CT: control target
= control target key end

     0   :  { %s37_s8 = smov 32   ;;  %s38_s9 = smov 64   ;;  %vm7_vm0 = vcmask 261120   ;;  %vm13_vm1 = vcmask 1048320   ;;  %vm19_vm2 = vcmask 785920   ;;  %vm25_vm3 = vcmask 523520   ;;  %s55_s0 = inlined_call_operand.vmem [shape: f32[4,32], index: 0, kind: input, shape index: {}]   ;;  %s56_s1 = inlined_call_operand.vmem [shape: f32[1,128], index: 1, kind: output, shape index: {}]  }
   0x1   :  { %v4_v0 = vld [vmem:[%s55_s0] sm:$0xf]  ;;  %s36_s0 = smov 96  }
   0x2   :  { %5 = vst [vmem:[#allocation1] sm:$0xf] %v4_v0 }
   0x9   :  { %v10_v1 = vld [vmem:[#allocation1 + $0x3] sm:$0x1]   ;;  %v22_v2 = vld [vmem:[#allocation1 + $0x1] sm:$0x1]   ;;  %v16_v3 = vld [vmem:[#allocation1 + $0x2] sm:$0x1]  }
   0xa   :  { %11 = vrot.lane.b32.xlu0 %v10_v1, %s36_s0  ;;  %23 = vrot.lane.b32.xlu1 %v22_v2, %s37_s8  ;;  %v6_v4 = vld [vmem:[#allocation1] sm:$0x1]  }
   0xb   :  { %8 = vst.msk [vmem:[#allocation0] sm:$0x1] %vm7_vm0, %v6_v4  }
  0x12   :  { %17 = vrot.lane.b32.xlu0 %v16_v3, %s38_s9 }
  0x7c   :  { %v12_v5 = vpop.permute.xlu0 %11   ;;  %v24_v6 = vpop.permute.xlu1 %23  }
  0x7d   :  { %14 = vst.msk [vmem:[#allocation0] sm:$0x1] %vm13_vm1, %v12_v5  }
  0x84   :  { %v18_v7 = vpop.permute.xlu0 %17  }
  0x85   :  { %20 = vst.msk [vmem:[#allocation0] sm:$0x1] %vm19_vm2, %v18_v7  }
  0x86   :  { %26 = vst.msk [vmem:[#allocation0] sm:$0x1] %vm25_vm3, %v24_v6  }
  0x8d   :  { %v29_v8 = vld [vmem:[#allocation0] sm:$0x1] }
  0x8e   :  { %32 = vst [vmem:[%s56_s1] sm:$0x1] %v29_v8 }

// kernel: _fused_forward.1
= control target key start
LH: loop header
LB: loop body
LE: loop exit
PB: predicated region body
PF: predicated region fallthrough
CT: control target
= control target key end

     0   :  { %s4201_s18 = smov 0   ;;  %s8358_s0 = inlined_call_operand.vmem [shape: f32[16,256], index: 0, kind: input, shape index: {}]   ;;  %s8359_s1 = inlined_call_operand.vmem [shape: f32[4,256,1152], index: 1, kind: input, shape index: {}]   ;;  %s8360_s2 = inlined_call_operand.vmem [shape: f32[1,1152], index: 2, kind: input, shape index: {}]   ;;  %s8361_s3 = inlined_call_operand.vmem [shape: f32[1152,128], index: 3, kind: input, shape index: {}]   ;;  %s8362_s4 = inlined_call_operand.vmem [shape: f32[1,128], index: 4, kind: input, shape index: {}]   ;;  %s8363_s5 = inlined_call_operand.vmem [shape: f32[16,128], index: 5, kind: output, shape index: {}]  }
   0x1 LB: > { %s3270_s19 = sadd.s32 4294967295, %s4169_s18   ;;  %p3274_p0 = scmp.ge.s32.totalorder %s4169_s18, 1  ;;  %s4169_s18 = sphi %s4201_s18, %s15_s18  }
   0x2   : > { %p187_p1 = scmp.lt.s32.totalorder %s4169_s18, 3 }
   0x4   : > { %p188_p2 = pnand %p3274_p0, %p187_p1 }
   0x5   : > { %p4511_p3 = scmp.lt.s32.totalorder (!%p188_p2), %s3270_s19, 1 }
   0x6   : > { %191 = sbr.rel (%p188_p2) target bundleno = 895 (0x37f), region = 40 }
   0xb   : > { %v360_v0 = vld [vmem:[%s8359_s1 + $0x438] sm:$0xff]  ;;  %v361_v2 = vld [vmem:[%s8359_s1 + $0x440] sm:$0xff]  ;;  %v351_v4 = vld [vmem:[%s8359_s1 + $0x3f0] sm:$0xff]  ;;  %s8366_s19 = smov (!%p4511_p3, %s3270_s19), 1 }
   0xc   : > { %v504_v1 = vld [vmem:[%s8359_s1 + $0x8b8] sm:$0xff]  ;;  %513 = vmatpush.msra.mxu0 %v360_v0  ;;  %v505_v3 = vld [vmem:[%s8359_s1 + $0x8c0] sm:$0xff]  ;;  %v495_v5 = vld [vmem:[%s8359_s1 + $0x870] sm:$0xff]  ;;  %553 = vmatpush.msra.mxu2 %v361_v2  ;;  %s4144_s23 = sshll.u32 %s8366_s19, 4  ;;  %s3277_s25 = sshll.u32 %s8366_s19, 3 }
   0xd   : > { %533 = vmatpush.msra.mxu1 %v504_v1  ;;  %573 = vmatpush.msra.mxu3 %v505_v3  ;;  %v352_v6 = vld [vmem:[%s8359_s1 + $0x3f8] sm:$0xff]  ;;  %v342_v8 = vld [vmem:[%s8359_s1 + $0x3a8] sm:$0xff]  ;;  %v343_v10 = vld [vmem:[%s8359_s1 + $0x3b0] sm:$0xff]  ;;  %s4591_s13 = scalar_lea.vmem %s8358_s0, %s4144_s23  ;;  %s222_s28 = scalar_lea.vmem %s8363_s5, %s3277_s25 }
   0xe   : > { %v496_v7 = vld [vmem:[%s8359_s1 + $0x878] sm:$0xff]  ;;  %514 = vmatpush.msra.mxu0 %v351_v4  ;;  %v486_v9 = vld [vmem:[%s8359_s1 + $0x828] sm:$0xff]  ;;  %v487_v11 = vld [vmem:[%s8359_s1 + $0x830] sm:$0xff]  ;;  %554 = vmatpush.msra.mxu2 %v352_v6 }
   0xf   : > { %534 = vmatpush.msra.mxu1 %v495_v5  ;;  %574 = vmatpush.msra.mxu3 %v496_v7  ;;  %v333_v12 = vld [vmem:[%s8359_s1 + $0x360] sm:$0xff]  ;;  %v334_v14 = vld [vmem:[%s8359_s1 + $0x368] sm:$0xff]  ;;  %v324_v16 = vld [vmem:[%s8359_s1 + $0x318] sm:$0xff] }
  0x10   : > { %v477_v13 = vld [vmem:[%s8359_s1 + $0x7e0] sm:$0xff]  ;;  %515 = vmatpush.msra.mxu0 %v342_v8  ;;  %v478_v15 = vld [vmem:[%s8359_s1 + $0x7e8] sm:$0xff]  ;;  %555 = vmatpush.msra.mxu2 %v343_v10  ;;  %v468_v17 = vld [vmem:[%s8359_s1 + $0x798] sm:$0xff] }
  0x11   : > { %535 = vmatpush.msra.mxu1 %v486_v9  ;;  %575 = vmatpush.msra.mxu3 %v487_v11  ;;  %v325_v18 = vld [vmem:[%s8359_s1 + $0x320] sm:$0xff]  ;;  %v315_v20 = vld [vmem:[%s8359_s1 + $0x2d0] sm:$0xff]  ;;  %v316_v22 = vld [vmem:[%s8359_s1 + $0x2d8] sm:$0xff] }
  0x12   : > { %516 = vmatpush.msra.mxu0 %v333_v12  ;;  %v469_v19 = vld [vmem:[%s8359_s1 + $0x7a0] sm:$0xff]  ;;  %556 = vmatpush.msra.mxu2 %v334_v14  ;;  %v459_v21 = vld [vmem:[%s8359_s1 + $0x750] sm:$0xff]  ;;  %v460_v23 = vld [vmem:[%s8359_s1 + $0x758] sm:$0xff] }
  0x13   : > { %536 = vmatpush.msra.mxu1 %v477_v13  ;;  %576 = vmatpush.msra.mxu3 %v478_v15  ;;  %v306_v24 = vld [vmem:[%s8359_s1 + $0x288] sm:$0xff]  ;;  %v307_v26 = vld [vmem:[%s8359_s1 + $0x290] sm:$0xff]  ;;  %v297_v28 = vld [vmem:[%s8359_s1 + $0x240] sm:$0xff] }
  0x14   : > { %517 = vmatpush.msra.mxu0 %v324_v16  ;;  %557 = vmatpush.msra.mxu2 %v325_v18  ;;  %v450_v25 = vld [vmem:[%s8359_s1 + $0x708] sm:$0xff]  ;;  %v451_v27 = vld [vmem:[%s8359_s1 + $0x710] sm:$0xff]  ;;  %v441_v29 = vld [vmem:[%s8359_s1 + $0x6c0] sm:$0xff] }
  0x15   : > { %537 = vmatpush.msra.mxu1 %v468_v17  ;;  %577 = vmatpush.msra.mxu3 %v469_v19  ;;  %v298_v30 = vld [vmem:[%s8359_s1 + $0x248] sm:$0xff]  ;;  %v288_v32 = vld [vmem:[%s8359_s1 + $0x1f8] sm:$0xff]  ;;  %v289_v34 = vld [vmem:[%s8359_s1 + $0x200] sm:$0xff] }
  0x16   : > { %518 = vmatpush.msra.mxu0 %v315_v20  ;;  %558 = vmatpush.msra.mxu2 %v316_v22  ;;  %v442_v31 = vld [vmem:[%s8359_s1 + $0x6c8] sm:$0xff]  ;;  %v432_v33 = vld [vmem:[%s8359_s1 + $0x678] sm:$0xff]  ;;  %v433_v35 = vld [vmem:[%s8359_s1 + $0x680] sm:$0xff] }
  0x17   : > { %538 = vmatpush.msra.mxu1 %v459_v21  ;;  %578 = vmatpush.msra.mxu3 %v460_v23  ;;  %v279_v36 = vld [vmem:[%s8359_s1 + $0x1b0] sm:$0xff]  ;;  %v280_v38 = vld [vmem:[%s8359_s1 + $0x1b8] sm:$0xff]  ;;  %v270_v40 = vld [vmem:[%s8359_s1 + $0x168] sm:$0xff] }
  0x18   : > { %519 = vmatpush.msra.mxu0 %v306_v24  ;;  %559 = vmatpush.msra.mxu2 %v307_v26  ;;  %v423_v37 = vld [vmem:[%s8359_s1 + $0x630] sm:$0xff]  ;;  %v424_v39 = vld [vmem:[%s8359_s1 + $0x638] sm:$0xff]  ;;  %v414_v41 = vld [vmem:[%s8359_s1 + $0x5e8] sm:$0xff] }
  0x19   : > { %539 = vmatpush.msra.mxu1 %v450_v25  ;;  %579 = vmatpush.msra.mxu3 %v451_v27  ;;  %v271_v42 = vld [vmem:[%s8359_s1 + $0x170] sm:$0xff]  ;;  %v261_v44 = vld [vmem:[%s8359_s1 + $0x120] sm:$0xff]  ;;  %v262_v46 = vld [vmem:[%s8359_s1 + $0x128] sm:$0xff] }
  0x1a   : > { %520 = vmatpush.msra.mxu0 %v297_v28  ;;  %560 = vmatpush.msra.mxu2 %v298_v30  ;;  %v415_v43 = vld [vmem:[%s8359_s1 + $0x5f0] sm:$0xff]  ;;  %v405_v45 = vld [vmem:[%s8359_s1 + $0x5a0] sm:$0xff]  ;;  %v406_v47 = vld [vmem:[%s8359_s1 + $0x5a8] sm:$0xff] }
  0x1b   : > { %540 = vmatpush.msra.mxu1 %v441_v29  ;;  %580 = vmatpush.msra.mxu3 %v442_v31  ;;  %v252_v48 = vld [vmem:[%s8359_s1 + $0xd8] sm:$0xff]  ;;  %v253_v50 = vld [vmem:[%s8359_s1 + $0xe0] sm:$0xff]  ;;  %v243_v52 = vld [vmem:[%s8359_s1 + $0x90] sm:$0xff] }
  0x1c   : > { %521 = vmatpush.msra.mxu0 %v288_v32  ;;  %561 = vmatpush.msra.mxu2 %v289_v34  ;;  %v396_v49 = vld [vmem:[%s8359_s1 + $0x558] sm:$0xff]  ;;  %v397_v51 = vld [vmem:[%s8359_s1 + $0x560] sm:$0xff]  ;;  %v387_v53 = vld [vmem:[%s8359_s1 + $0x510] sm:$0xff] }
  0x1d   : > { %541 = vmatpush.msra.mxu1 %v432_v33  ;;  %581 = vmatpush.msra.mxu3 %v433_v35  ;;  %v244_v54 = vld [vmem:[%s8359_s1 + $0x98] sm:$0xff]  ;;  %v234_v56 = vld [vmem:[%s8359_s1 + $0x48] sm:$0xff]  ;;  %v235_v58 = vld [vmem:[%s8359_s1 + $0x50] sm:$0xff] }
  0x1e   : > { %522 = vmatpush.msra.mxu0 %v279_v36  ;;  %562 = vmatpush.msra.mxu2 %v280_v38  ;;  %v388_v55 = vld [vmem:[%s8359_s1 + $0x518] sm:$0xff]  ;;  %v378_v57 = vld [vmem:[%s8359_s1 + $0x4c8] sm:$0xff]  ;;  %v379_v59 = vld [vmem:[%s8359_s1 + $0x4d0] sm:$0xff] }
  0x1f   : > { %542 = vmatpush.msra.mxu1 %v423_v37  ;;  %582 = vmatpush.msra.mxu3 %v424_v39  ;;  %v225_v60 = vld [vmem:[%s8359_s1] sm:$0xff]  ;;  %v226_v62 = vld [vmem:[%s8359_s1 + $0x8] sm:$0xff]  ;;  %v363_v2 = vld [vmem:[%s8359_s1 + $0x450] sm:$0xff] }
  0x20   : > { %523 = vmatpush.msra.mxu0 %v270_v40  ;;  %563 = vmatpush.msra.mxu2 %v271_v42  ;;  %v369_v61 = vld [vmem:[%s8359_s1 + $0x480] sm:$0xff]  ;;  %v370_v63 = vld [vmem:[%s8359_s1 + $0x488] sm:$0xff]  ;;  %v507_v3 = vld [vmem:[%s8359_s1 + $0x8d0] sm:$0xff] }
  0x21   : > { %543 = vmatpush.msra.mxu1 %v414_v41  ;;  %583 = vmatpush.msra.mxu3 %v415_v43  ;;  %v362_v0 = vld [vmem:[%s8359_s1 + $0x448] sm:$0xff]  ;;  %v353_v4 = vld [vmem:[%s8359_s1 + $0x400] sm:$0xff]  ;;  %v344_v8 = vld [vmem:[%s8359_s1 + $0x3b8] sm:$0xff] }
  0x22   : > { %524 = vmatpush.msra.mxu0 %v261_v44  ;;  %564 = vmatpush.msra.mxu2 %v262_v46  ;;  %v506_v1 = vld [vmem:[%s8359_s1 + $0x8c8] sm:$0xff]  ;;  %v497_v5 = vld [vmem:[%s8359_s1 + $0x880] sm:$0xff]  ;;  %v488_v9 = vld [vmem:[%s8359_s1 + $0x838] sm:$0xff] }
  0x23   : > { %544 = vmatpush.msra.mxu1 %v405_v45  ;;  %584 = vmatpush.msra.mxu3 %v406_v47  ;;  %v354_v6 = vld [vmem:[%s8359_s1 + $0x408] sm:$0xff]  ;;  %v345_v10 = vld [vmem:[%s8359_s1 + $0x3c0] sm:$0xff]  ;;  %v335_v12 = vld [vmem:[%s8359_s1 + $0x370] sm:$0xff] }
  0x24   : > { %525 = vmatpush.msra.mxu0 %v252_v48  ;;  %565 = vmatpush.msra.mxu2 %v253_v50  ;;  %v498_v7 = vld [vmem:[%s8359_s1 + $0x888] sm:$0xff]  ;;  %v489_v11 = vld [vmem:[%s8359_s1 + $0x840] sm:$0xff]  ;;  %v479_v13 = vld [vmem:[%s8359_s1 + $0x7f0] sm:$0xff] }
  0x25   : > { %545 = vmatpush.msra.mxu1 %v396_v49  ;;  %585 = vmatpush.msra.mxu3 %v397_v51  ;;  %v336_v14 = vld [vmem:[%s8359_s1 + $0x378] sm:$0xff]  ;;  %v326_v16 = vld [vmem:[%s8359_s1 + $0x328] sm:$0xff]  ;;  %v327_v18 = vld [vmem:[%s8359_s1 + $0x330] sm:$0xff] }
  0x26   : > { %526 = vmatpush.msra.mxu0 %v243_v52  ;;  %566 = vmatpush.msra.mxu2 %v244_v54  ;;  %v480_v15 = vld [vmem:[%s8359_s1 + $0x7f8] sm:$0xff]  ;;  %v470_v17 = vld [vmem:[%s8359_s1 + $0x7a8] sm:$0xff]  ;;  %v471_v19 = vld [vmem:[%s8359_s1 + $0x7b0] sm:$0xff] }
  0x27   : > { %546 = vmatpush.msra.mxu1 %v387_v53  ;;  %586 = vmatpush.msra.mxu3 %v388_v55  ;;  %v317_v20 = vld [vmem:[%s8359_s1 + $0x2e0] sm:$0xff]  ;;  %v318_v22 = vld [vmem:[%s8359_s1 + $0x2e8] sm:$0xff]  ;;  %v308_v24 = vld [vmem:[%s8359_s1 + $0x298] sm:$0xff] }
  0x28   : > { %527 = vmatpush.msra.mxu0 %v234_v56  ;;  %567 = vmatpush.msra.mxu2 %v235_v58  ;;  %v461_v21 = vld [vmem:[%s8359_s1 + $0x760] sm:$0xff]  ;;  %v462_v23 = vld [vmem:[%s8359_s1 + $0x768] sm:$0xff]  ;;  %v452_v25 = vld [vmem:[%s8359_s1 + $0x718] sm:$0xff] }
  0x29   : > { %547 = vmatpush.msra.mxu1 %v378_v57  ;;  %587 = vmatpush.msra.mxu3 %v379_v59  ;;  %v309_v26 = vld [vmem:[%s8359_s1 + $0x2a0] sm:$0xff]  ;;  %v299_v28 = vld [vmem:[%s8359_s1 + $0x250] sm:$0xff]  ;;  %v300_v30 = vld [vmem:[%s8359_s1 + $0x258] sm:$0xff] }
  0x2a   : > { %528 = vmatpush.msra.mxu0 %v225_v60  ;;  %568 = vmatpush.msra.mxu2 %v226_v62  ;;  %v453_v27 = vld [vmem:[%s8359_s1 + $0x720] sm:$0xff]  ;;  %v443_v29 = vld [vmem:[%s8359_s1 + $0x6d0] sm:$0xff]  ;;  %v444_v31 = vld [vmem:[%s8359_s1 + $0x6d8] sm:$0xff] }
  0x2b   : > { %548 = vmatpush.msra.mxu1 %v369_v61  ;;  %588 = vmatpush.msra.mxu3 %v370_v63  ;;  %v290_v32 = vld [vmem:[%s8359_s1 + $0x208] sm:$0xff]  ;;  %v291_v34 = vld [vmem:[%s8359_s1 + $0x210] sm:$0xff]  ;;  %v281_v36 = vld [vmem:[%s8359_s1 + $0x1c0] sm:$0xff] }
  0x2c   : > { %593 = vmatpush.msrb.mxu0 %v362_v0  ;;  %633 = vmatpush.msrb.mxu2 %v363_v2  ;;  %v434_v33 = vld [vmem:[%s8359_s1 + $0x688] sm:$0xff]  ;;  %v435_v35 = vld [vmem:[%s8359_s1 + $0x690] sm:$0xff]  ;;  %v425_v37 = vld [vmem:[%s8359_s1 + $0x640] sm:$0xff] }
  0x2d   : > { %613 = vmatpush.msrb.mxu1 %v506_v1  ;;  %653 = vmatpush.msrb.mxu3 %v507_v3  ;;  %v282_v38 = vld [vmem:[%s8359_s1 + $0x1c8] sm:$0xff]  ;;  %v272_v40 = vld [vmem:[%s8359_s1 + $0x178] sm:$0xff]  ;;  %v273_v42 = vld [vmem:[%s8359_s1 + $0x180] sm:$0xff] }
  0x2e   : > { %594 = vmatpush.msrb.mxu0 %v353_v4  ;;  %634 = vmatpush.msrb.mxu2 %v354_v6  ;;  %v426_v39 = vld [vmem:[%s8359_s1 + $0x648] sm:$0xff]  ;;  %v416_v41 = vld [vmem:[%s8359_s1 + $0x5f8] sm:$0xff]  ;;  %v417_v43 = vld [vmem:[%s8359_s1 + $0x600] sm:$0xff] }
  0x2f   : > { %614 = vmatpush.msrb.mxu1 %v497_v5  ;;  %654 = vmatpush.msrb.mxu3 %v498_v7  ;;  %v263_v44 = vld [vmem:[%s8359_s1 + $0x130] sm:$0xff]  ;;  %v264_v46 = vld [vmem:[%s8359_s1 + $0x138] sm:$0xff]  ;;  %v254_v48 = vld [vmem:[%s8359_s1 + $0xe8] sm:$0xff] }
  0x30   : > { %595 = vmatpush.msrb.mxu0 %v344_v8  ;;  %635 = vmatpush.msrb.mxu2 %v345_v10  ;;  %v407_v45 = vld [vmem:[%s8359_s1 + $0x5b0] sm:$0xff]  ;;  %v408_v47 = vld [vmem:[%s8359_s1 + $0x5b8] sm:$0xff]  ;;  %v398_v49 = vld [vmem:[%s8359_s1 + $0x568] sm:$0xff] }
  0x31   : > { %615 = vmatpush.msrb.mxu1 %v488_v9  ;;  %655 = vmatpush.msrb.mxu3 %v489_v11  ;;  %v255_v50 = vld [vmem:[%s8359_s1 + $0xf0] sm:$0xff]  ;;  %v245_v52 = vld [vmem:[%s8359_s1 + $0xa0] sm:$0xff]  ;;  %v246_v54 = vld [vmem:[%s8359_s1 + $0xa8] sm:$0xff] }
  0x32   : > { %596 = vmatpush.msrb.mxu0 %v335_v12  ;;  %636 = vmatpush.msrb.mxu2 %v336_v14  ;;  %v399_v51 = vld [vmem:[%s8359_s1 + $0x570] sm:$0xff]  ;;  %v389_v53 = vld [vmem:[%s8359_s1 + $0x520] sm:$0xff]  ;;  %v390_v55 = vld [vmem:[%s8359_s1 + $0x528] sm:$0xff] }
  0x33   : > { %616 = vmatpush.msrb.mxu1 %v479_v13  ;;  %656 = vmatpush.msrb.mxu3 %v480_v15  ;;  %v236_v56 = vld [vmem:[%s8359_s1 + $0x58] sm:$0xff]  ;;  %v237_v58 = vld [vmem:[%s8359_s1 + $0x60] sm:$0xff]  ;;  %v227_v60 = vld [vmem:[%s8359_s1 + $0x10] sm:$0xff] }
  0x34   : > { %597 = vmatpush.msrb.mxu0 %v326_v16  ;;  %637 = vmatpush.msrb.mxu2 %v327_v18  ;;  %v380_v57 = vld [vmem:[%s8359_s1 + $0x4d8] sm:$0xff]  ;;  %v381_v59 = vld [vmem:[%s8359_s1 + $0x4e0] sm:$0xff]  ;;  %v371_v61 = vld [vmem:[%s8359_s1 + $0x490] sm:$0xff] }
  0x35   : > { %617 = vmatpush.msrb.mxu1 %v470_v17  ;;  %657 = vmatpush.msrb.mxu3 %v471_v19  ;;  %v228_v62 = vld [vmem:[%s8359_s1 + $0x18] sm:$0xff]  ;;  %v4612_v0 = vld [vmem:[%s4591_s13] sm:$0xff]  ;;  %v4615_v1 = vld [vmem:[%s4591_s13 + $0x8] sm:$0xff] }
  0x36   : > { %598 = vmatpush.msrb.mxu0 %v317_v20  ;;  %638 = vmatpush.msrb.mxu2 %v318_v22  ;;  %v372_v63 = vld [vmem:[%s8359_s1 + $0x498] sm:$0xff]  ;;  %v365_v4 = vld [vmem:[%s8359_s1 + $0x460] sm:$0xff]  ;;  %v355_v6 = vld [vmem:[%s8359_s1 + $0x410] sm:$0xff] }
  0x37   : > { %618 = vmatpush.msrb.mxu1 %v461_v21  ;;  %658 = vmatpush.msrb.mxu3 %v462_v23  ;;  %v364_v2 = vld [vmem:[%s8359_s1 + $0x458] sm:$0xff]  ;;  %v509_v5 = vld [vmem:[%s8359_s1 + $0x8e0] sm:$0xff]  ;;  %v499_v7 = vld [vmem:[%s8359_s1 + $0x890] sm:$0xff] }
  0x38   : > { %599 = vmatpush.msrb.mxu0 %v308_v24  ;;  %639 = vmatpush.msrb.mxu2 %v309_v26  ;;  %v508_v3 = vld [vmem:[%s8359_s1 + $0x8d8] sm:$0xff]  ;;  %v346_v10 = vld [vmem:[%s8359_s1 + $0x3c8] sm:$0xff]  ;;  %v347_v12 = vld [vmem:[%s8359_s1 + $0x3d0] sm:$0xff] }
  0x39   : > { %619 = vmatpush.msrb.mxu1 %v452_v25  ;;  %659 = vmatpush.msrb.mxu3 %v453_v27  ;;  %v356_v8 = vld [vmem:[%s8359_s1 + $0x418] sm:$0xff]  ;;  %v490_v11 = vld [vmem:[%s8359_s1 + $0x848] sm:$0xff]  ;;  %v491_v13 = vld [vmem:[%s8359_s1 + $0x850] sm:$0xff] }
  0x3a   : > { %600 = vmatpush.msrb.mxu0 %v299_v28  ;;  %640 = vmatpush.msrb.mxu2 %v300_v30  ;;  %v500_v9 = vld [vmem:[%s8359_s1 + $0x898] sm:$0xff]  ;;  %v337_v14 = vld [vmem:[%s8359_s1 + $0x380] sm:$0xff]  ;;  %v338_v16 = vld [vmem:[%s8359_s1 + $0x388] sm:$0xff] }
  0x3b   : > { %620 = vmatpush.msrb.mxu1 %v443_v29  ;;  %660 = vmatpush.msrb.mxu3 %v444_v31  ;;  %v481_v15 = vld [vmem:[%s8359_s1 + $0x800] sm:$0xff]  ;;  %v482_v17 = vld [vmem:[%s8359_s1 + $0x808] sm:$0xff]  ;;  %v328_v18 = vld [vmem:[%s8359_s1 + $0x338] sm:$0xff] }
  0x3c   : > { %601 = vmatpush.msrb.mxu0 %v290_v32  ;;  %641 = vmatpush.msrb.mxu2 %v291_v34  ;;  %v472_v19 = vld [vmem:[%s8359_s1 + $0x7b8] sm:$0xff]  ;;  %v329_v20 = vld [vmem:[%s8359_s1 + $0x340] sm:$0xff]  ;;  %v319_v22 = vld [vmem:[%s8359_s1 + $0x2f0] sm:$0xff] }
  0x3d   : > { %621 = vmatpush.msrb.mxu1 %v434_v33  ;;  %661 = vmatpush.msrb.mxu3 %v435_v35  ;;  %v473_v21 = vld [vmem:[%s8359_s1 + $0x7c0] sm:$0xff]  ;;  %v463_v23 = vld [vmem:[%s8359_s1 + $0x770] sm:$0xff]  ;;  %v320_v24 = vld [vmem:[%s8359_s1 + $0x2f8] sm:$0xff] }
  0x3e   : > { %602 = vmatpush.msrb.mxu0 %v281_v36  ;;  %642 = vmatpush.msrb.mxu2 %v282_v38  ;;  %v464_v25 = vld [vmem:[%s8359_s1 + $0x778] sm:$0xff]  ;;  %v310_v26 = vld [vmem:[%s8359_s1 + $0x2a8] sm:$0xff]  ;;  %v311_v28 = vld [vmem:[%s8359_s1 + $0x2b0] sm:$0xff] }
  0x3f   : > { %622 = vmatpush.msrb.mxu1 %v425_v37  ;;  %662 = vmatpush.msrb.mxu3 %v426_v39  ;;  %v454_v27 = vld [vmem:[%s8359_s1 + $0x728] sm:$0xff]  ;;  %v455_v29 = vld [vmem:[%s8359_s1 + $0x730] sm:$0xff]  ;;  %v301_v30 = vld [vmem:[%s8359_s1 + $0x260] sm:$0xff] }
  0x40   : > { %603 = vmatpush.msrb.mxu0 %v272_v40  ;;  %643 = vmatpush.msrb.mxu2 %v273_v42  ;;  %v445_v31 = vld [vmem:[%s8359_s1 + $0x6e0] sm:$0xff]  ;;  %v302_v32 = vld [vmem:[%s8359_s1 + $0x268] sm:$0xff]  ;;  %v292_v34 = vld [vmem:[%s8359_s1 + $0x218] sm:$0xff] }
  0x41   : > { %623 = vmatpush.msrb.mxu1 %v416_v41  ;;  %663 = vmatpush.msrb.mxu3 %v417_v43  ;;  %v446_v33 = vld [vmem:[%s8359_s1 + $0x6e8] sm:$0xff]  ;;  %v436_v35 = vld [vmem:[%s8359_s1 + $0x698] sm:$0xff]  ;;  %v293_v36 = vld [vmem:[%s8359_s1 + $0x220] sm:$0xff] }
  0x42   : > { %604 = vmatpush.msrb.mxu0 %v263_v44  ;;  %644 = vmatpush.msrb.mxu2 %v264_v46  ;;  %v437_v37 = vld [vmem:[%s8359_s1 + $0x6a0] sm:$0xff]  ;;  %v283_v38 = vld [vmem:[%s8359_s1 + $0x1d0] sm:$0xff]  ;;  %v284_v40 = vld [vmem:[%s8359_s1 + $0x1d8] sm:$0xff] }
  0x43   : > { %624 = vmatpush.msrb.mxu1 %v407_v45  ;;  %664 = vmatpush.msrb.mxu3 %v408_v47  ;;  %v427_v39 = vld [vmem:[%s8359_s1 + $0x650] sm:$0xff]  ;;  %v428_v41 = vld [vmem:[%s8359_s1 + $0x658] sm:$0xff]  ;;  %v274_v42 = vld [vmem:[%s8359_s1 + $0x188] sm:$0xff] }
  0x44   : > { %605 = vmatpush.msrb.mxu0 %v254_v48  ;;  %645 = vmatpush.msrb.mxu2 %v255_v50  ;;  %v418_v43 = vld [vmem:[%s8359_s1 + $0x608] sm:$0xff]  ;;  %v275_v44 = vld [vmem:[%s8359_s1 + $0x190] sm:$0xff]  ;;  %v265_v46 = vld [vmem:[%s8359_s1 + $0x140] sm:$0xff] }
  0x45   : > { %625 = vmatpush.msrb.mxu1 %v398_v49  ;;  %665 = vmatpush.msrb.mxu3 %v399_v51  ;;  %v419_v45 = vld [vmem:[%s8359_s1 + $0x610] sm:$0xff]  ;;  %v409_v47 = vld [vmem:[%s8359_s1 + $0x5c0] sm:$0xff]  ;;  %v266_v48 = vld [vmem:[%s8359_s1 + $0x148] sm:$0xff] }
  0x46   : > { %606 = vmatpush.msrb.mxu0 %v245_v52  ;;  %646 = vmatpush.msrb.mxu2 %v246_v54  ;;  %v410_v49 = vld [vmem:[%s8359_s1 + $0x5c8] sm:$0xff]  ;;  %v256_v50 = vld [vmem:[%s8359_s1 + $0xf8] sm:$0xff]  ;;  %v257_v52 = vld [vmem:[%s8359_s1 + $0x100] sm:$0xff] }
  0x47   : > { %626 = vmatpush.msrb.mxu1 %v389_v53  ;;  %666 = vmatpush.msrb.mxu3 %v390_v55  ;;  %v400_v51 = vld [vmem:[%s8359_s1 + $0x578] sm:$0xff]  ;;  %v401_v53 = vld [vmem:[%s8359_s1 + $0x580] sm:$0xff]  ;;  %v247_v54 = vld [vmem:[%s8359_s1 + $0xb0] sm:$0xff] }
  0x48   : > { %607 = vmatpush.msrb.mxu0 %v236_v56  ;;  %647 = vmatpush.msrb.mxu2 %v237_v58  ;;  %v391_v55 = vld [vmem:[%s8359_s1 + $0x530] sm:$0xff]  ;;  %v248_v56 = vld [vmem:[%s8359_s1 + $0xb8] sm:$0xff]  ;;  %v238_v58 = vld [vmem:[%s8359_s1 + $0x68] sm:$0xff] }
  0x49   : > { %627 = vmatpush.msrb.mxu1 %v380_v57  ;;  %667 = vmatpush.msrb.mxu3 %v381_v59  ;;  %v392_v57 = vld [vmem:[%s8359_s1 + $0x538] sm:$0xff]  ;;  %v382_v59 = vld [vmem:[%s8359_s1 + $0x4e8] sm:$0xff] }
  0x4a   : > { %608 = vmatpush.msrb.mxu0 %v227_v60  ;;  %648 = vmatpush.msrb.mxu2 %v228_v62  ;;  %v239_v60 = vld [vmem:[%s8359_s1 + $0x70] sm:$0xff]  ;;  %v229_v62 = vld [vmem:[%s8359_s1 + $0x20] sm:$0xff] }
  0x4b   : > { %628 = vmatpush.msrb.mxu1 %v371_v61  ;;  %668 = vmatpush.msrb.mxu3 %v372_v63  ;;  %v383_v61 = vld [vmem:[%s8359_s1 + $0x4f0] sm:$0xff]  ;;  %v373_v63 = vld [vmem:[%s8359_s1 + $0x4a0] sm:$0xff] }
  0x4c   : > { %529 = vmatmul.f32.vlgmr.msra.gmra.mxu0 %v4612_v0  ;;  %549 = vmatmul.f32.vlgmr.msra.gmra.mxu1 %v4615_v1 }
  0x4d   : > { %569 = vmatmul.f32.vlgmr.msra.gmra.mxu2 %v4612_v0  ;;  %589 = vmatmul.f32.vlgmr.msra.gmra.mxu3 %v4615_v1 }
  0x4e   : > { %673 = vmatpush.msra.mxu0 %v364_v2  ;;  %693 = vmatpush.msra.mxu1 %v508_v3  ;;  %v230_v2 = vld [vmem:[%s8359_s1 + $0x28] sm:$0xff] }
  0x4f   : > { %713 = vmatpush.msra.mxu2 %v365_v4  ;;  %733 = vmatpush.msra.mxu3 %v509_v5  ;;  %v374_v3 = vld [vmem:[%s8359_s1 + $0x4a8] sm:$0xff] }
  0x50   : > { %674 = vmatpush.msra.mxu0 %v355_v6  ;;  %694 = vmatpush.msra.mxu1 %v499_v7  ;;  %v366_v4 = vld [vmem:[%s8359_s1 + $0x468] sm:$0xff]  ;;  %v367_v6 = vld [vmem:[%s8359_s1 + $0x470] sm:$0xff] }
  0x51   : > { %714 = vmatpush.msra.mxu2 %v356_v8  ;;  %734 = vmatpush.msra.mxu3 %v500_v9  ;;  %v510_v5 = vld [vmem:[%s8359_s1 + $0x8e8] sm:$0xff]  ;;  %v511_v7 = vld [vmem:[%s8359_s1 + $0x8f0] sm:$0xff]  ;;  %v357_v8 = vld [vmem:[%s8359_s1 + $0x420] sm:$0xff] }
  0x52   : > { %675 = vmatpush.msra.mxu0 %v346_v10  ;;  %695 = vmatpush.msra.mxu1 %v490_v11  ;;  %v501_v9 = vld [vmem:[%s8359_s1 + $0x8a0] sm:$0xff]  ;;  %v358_v10 = vld [vmem:[%s8359_s1 + $0x428] sm:$0xff] }
  0x53   : > { %715 = vmatpush.msra.mxu2 %v347_v12  ;;  %735 = vmatpush.msra.mxu3 %v491_v13  ;;  %v502_v11 = vld [vmem:[%s8359_s1 + $0x8a8] sm:$0xff]  ;;  %v348_v12 = vld [vmem:[%s8359_s1 + $0x3d8] sm:$0xff] }
  0x54   : > { %676 = vmatpush.msra.mxu0 %v337_v14  ;;  %696 = vmatpush.msra.mxu1 %v481_v15  ;;  %v492_v13 = vld [vmem:[%s8359_s1 + $0x858] sm:$0xff]  ;;  %v349_v14 = vld [vmem:[%s8359_s1 + $0x3e0] sm:$0xff] }
  0x55   : > { %716 = vmatpush.msra.mxu2 %v338_v16  ;;  %736 = vmatpush.msra.mxu3 %v482_v17  ;;  %v493_v15 = vld [vmem:[%s8359_s1 + $0x860] sm:$0xff]  ;;  %v339_v16 = vld [vmem:[%s8359_s1 + $0x390] sm:$0xff] }
  0x56   : > { %677 = vmatpush.msra.mxu0 %v328_v18  ;;  %697 = vmatpush.msra.mxu1 %v472_v19  ;;  %v483_v17 = vld [vmem:[%s8359_s1 + $0x810] sm:$0xff]  ;;  %v340_v18 = vld [vmem:[%s8359_s1 + $0x398] sm:$0xff] }
  0x57   : > { %717 = vmatpush.msra.mxu2 %v329_v20  ;;  %737 = vmatpush.msra.mxu3 %v473_v21  ;;  %v484_v19 = vld [vmem:[%s8359_s1 + $0x818] sm:$0xff]  ;;  %v330_v20 = vld [vmem:[%s8359_s1 + $0x348] sm:$0xff] }
  0x58   : > { %678 = vmatpush.msra.mxu0 %v319_v22  ;;  %698 = vmatpush.msra.mxu1 %v463_v23  ;;  %v474_v21 = vld [vmem:[%s8359_s1 + $0x7c8] sm:$0xff]  ;;  %v331_v22 = vld [vmem:[%s8359_s1 + $0x350] sm:$0xff] }
  0x59   : > { %718 = vmatpush.msra.mxu2 %v320_v24  ;;  %738 = vmatpush.msra.mxu3 %v464_v25  ;;  %v475_v23 = vld [vmem:[%s8359_s1 + $0x7d0] sm:$0xff]  ;;  %v321_v24 = vld [vmem:[%s8359_s1 + $0x300] sm:$0xff] }
  0x5a   : > { %679 = vmatpush.msra.mxu0 %v310_v26  ;;  %699 = vmatpush.msra.mxu1 %v454_v27  ;;  %v465_v25 = vld [vmem:[%s8359_s1 + $0x780] sm:$0xff]  ;;  %v322_v26 = vld [vmem:[%s8359_s1 + $0x308] sm:$0xff] }
  0x5b   : > { %719 = vmatpush.msra.mxu2 %v311_v28  ;;  %739 = vmatpush.msra.mxu3 %v455_v29  ;;  %v466_v27 = vld [vmem:[%s8359_s1 + $0x788] sm:$0xff]  ;;  %v312_v28 = vld [vmem:[%s8359_s1 + $0x2b8] sm:$0xff] }
  0x5c   : > { %680 = vmatpush.msra.mxu0 %v301_v30  ;;  %700 = vmatpush.msra.mxu1 %v445_v31  ;;  %v456_v29 = vld [vmem:[%s8359_s1 + $0x738] sm:$0xff]  ;;  %v313_v30 = vld [vmem:[%s8359_s1 + $0x2c0] sm:$0xff] }
  0x5d   : > { %720 = vmatpush.msra.mxu2 %v302_v32  ;;  %740 = vmatpush.msra.mxu3 %v446_v33  ;;  %v457_v31 = vld [vmem:[%s8359_s1 + $0x740] sm:$0xff]  ;;  %v303_v32 = vld [vmem:[%s8359_s1 + $0x270] sm:$0xff] }
  0x5e   : > { %681 = vmatpush.msra.mxu0 %v292_v34  ;;  %701 = vmatpush.msra.mxu1 %v436_v35  ;;  %v447_v33 = vld [vmem:[%s8359_s1 + $0x6f0] sm:$0xff]  ;;  %v304_v34 = vld [vmem:[%s8359_s1 + $0x278] sm:$0xff] }
  0x5f   : > { %721 = vmatpush.msra.mxu2 %v293_v36  ;;  %741 = vmatpush.msra.mxu3 %v437_v37  ;;  %v448_v35 = vld [vmem:[%s8359_s1 + $0x6f8] sm:$0xff]  ;;  %v294_v36 = vld [vmem:[%s8359_s1 + $0x228] sm:$0xff] }
  0x60   : > { %682 = vmatpush.msra.mxu0 %v283_v38  ;;  %702 = vmatpush.msra.mxu1 %v427_v39  ;;  %v438_v37 = vld [vmem:[%s8359_s1 + $0x6a8] sm:$0xff]  ;;  %v295_v38 = vld [vmem:[%s8359_s1 + $0x230] sm:$0xff] }
  0x61   : > { %722 = vmatpush.msra.mxu2 %v284_v40  ;;  %742 = vmatpush.msra.mxu3 %v428_v41  ;;  %v439_v39 = vld [vmem:[%s8359_s1 + $0x6b0] sm:$0xff]  ;;  %v285_v40 = vld [vmem:[%s8359_s1 + $0x1e0] sm:$0xff] }
  0x62   : > { %683 = vmatpush.msra.mxu0 %v274_v42  ;;  %703 = vmatpush.msra.mxu1 %v418_v43  ;;  %v429_v41 = vld [vmem:[%s8359_s1 + $0x660] sm:$0xff]  ;;  %v286_v42 = vld [vmem:[%s8359_s1 + $0x1e8] sm:$0xff] }
  0x63   : > { %723 = vmatpush.msra.mxu2 %v275_v44  ;;  %743 = vmatpush.msra.mxu3 %v419_v45  ;;  %v430_v43 = vld [vmem:[%s8359_s1 + $0x668] sm:$0xff]  ;;  %v276_v44 = vld [vmem:[%s8359_s1 + $0x198] sm:$0xff] }
  0x64   : > { %684 = vmatpush.msra.mxu0 %v265_v46  ;;  %704 = vmatpush.msra.mxu1 %v409_v47  ;;  %v420_v45 = vld [vmem:[%s8359_s1 + $0x618] sm:$0xff]  ;;  %v277_v46 = vld [vmem:[%s8359_s1 + $0x1a0] sm:$0xff] }
  0x65   : > { %724 = vmatpush.msra.mxu2 %v266_v48  ;;  %744 = vmatpush.msra.mxu3 %v410_v49  ;;  %v421_v47 = vld [vmem:[%s8359_s1 + $0x620] sm:$0xff]  ;;  %v267_v48 = vld [vmem:[%s8359_s1 + $0x150] sm:$0xff] }
  0x66   : > { %685 = vmatpush.msra.mxu0 %v256_v50  ;;  %705 = vmatpush.msra.mxu1 %v400_v51  ;;  %v411_v49 = vld [vmem:[%s8359_s1 + $0x5d0] sm:$0xff]  ;;  %v268_v50 = vld [vmem:[%s8359_s1 + $0x158] sm:$0xff] }
  0x67   : > { %725 = vmatpush.msra.mxu2 %v257_v52  ;;  %745 = vmatpush.msra.mxu3 %v401_v53  ;;  %v412_v51 = vld [vmem:[%s8359_s1 + $0x5d8] sm:$0xff]  ;;  %v258_v52 = vld [vmem:[%s8359_s1 + $0x108] sm:$0xff] }
  0x68   : > { %686 = vmatpush.msra.mxu0 %v247_v54  ;;  %706 = vmatpush.msra.mxu1 %v391_v55  ;;  %v402_v53 = vld [vmem:[%s8359_s1 + $0x588] sm:$0xff]  ;;  %v259_v54 = vld [vmem:[%s8359_s1 + $0x110] sm:$0xff] }
  0x69   : > { %726 = vmatpush.msra.mxu2 %v248_v56  ;;  %746 = vmatpush.msra.mxu3 %v392_v57  ;;  %v403_v55 = vld [vmem:[%s8359_s1 + $0x590] sm:$0xff]  ;;  %v249_v56 = vld [vmem:[%s8359_s1 + $0xc0] sm:$0xff] }
  0x6a   : > { %687 = vmatpush.msra.mxu0 %v238_v58  ;;  %707 = vmatpush.msra.mxu1 %v382_v59  ;;  %v393_v57 = vld [vmem:[%s8359_s1 + $0x540] sm:$0xff]  ;;  %v250_v58 = vld [vmem:[%s8359_s1 + $0xc8] sm:$0xff] }
  0x6b   : > { %727 = vmatpush.msra.mxu2 %v239_v60  ;;  %747 = vmatpush.msra.mxu3 %v383_v61  ;;  %v394_v59 = vld [vmem:[%s8359_s1 + $0x548] sm:$0xff]  ;;  %v240_v60 = vld [vmem:[%s8359_s1 + $0x78] sm:$0xff] }
  0x6c   : > { %688 = vmatpush.msra.mxu0 %v229_v62  ;;  %708 = vmatpush.msra.mxu1 %v373_v63  ;;  %v384_v61 = vld [vmem:[%s8359_s1 + $0x4f8] sm:$0xff]  ;;  %v241_v62 = vld [vmem:[%s8359_s1 + $0x80] sm:$0xff] }
  0x6d   : > { %728 = vmatpush.msra.mxu2 %v230_v2  ;;  %748 = vmatpush.msra.mxu3 %v374_v3  ;;  %v385_v63 = vld [vmem:[%s8359_s1 + $0x500] sm:$0xff]  ;;  %v231_v2 = vld [vmem:[%s8359_s1 + $0x30] sm:$0xff] }
  0x6e   : > { %609 = vmatmul.f32.vlgmr.msrb.gmra.mxu0 %v4612_v0  ;;  %629 = vmatmul.f32.vlgmr.msrb.gmra.mxu1 %v4615_v1  ;;  %v375_v3 = vld [vmem:[%s8359_s1 + $0x4b0] sm:$0xff] }
  0x6f   : > { %649 = vmatmul.f32.vlgmr.msrb.gmra.mxu2 %v4612_v0  ;;  %669 = vmatmul.f32.vlgmr.msrb.gmra.mxu3 %v4615_v1 }
  0x70   : > { %753 = vmatpush.msrb.mxu0 %v366_v4  ;;  %773 = vmatpush.msrb.mxu1 %v510_v5  ;;  %v232_v4 = vld [vmem:[%s8359_s1 + $0x38] sm:$0xff] }
  0x71   : > { %793 = vmatpush.msrb.mxu2 %v367_v6  ;;  %813 = vmatpush.msrb.mxu3 %v511_v7  ;;  %v376_v5 = vld [vmem:[%s8359_s1 + $0x4b8] sm:$0xff] }
  0x72   : > { %754 = vmatpush.msrb.mxu0 %v357_v8  ;;  %774 = vmatpush.msrb.mxu1 %v501_v9  ;;  %v368_v6 = vld [vmem:[%s8359_s1 + $0x478] sm:$0xff] }
  0x73   : > { %794 = vmatpush.msrb.mxu2 %v358_v10  ;;  %814 = vmatpush.msrb.mxu3 %v502_v11  ;;  %v512_v7 = vld [vmem:[%s8359_s1 + $0x8f8] sm:$0xff]  ;;  %v359_v10 = vld [vmem:[%s8359_s1 + $0x430] sm:$0xff] }
  0x74   : > { %755 = vmatpush.msrb.mxu0 %v348_v12  ;;  %775 = vmatpush.msrb.mxu1 %v492_v13  ;;  %v3413_v8 = vld [vmem:[%s8359_s1 + $0xd38] sm:$0xff]  ;;  %v503_v11 = vld [vmem:[%s8359_s1 + $0x8b0] sm:$0xff] }
  0x75   : > { %795 = vmatpush.msrb.mxu2 %v349_v14  ;;  %815 = vmatpush.msrb.mxu3 %v493_v15  ;;  %v3557_v9 = vld [vmem:[%s8359_s1 + $0x11b8] sm:$0xff]  ;;  %v3404_v12 = vld [vmem:[%s8359_s1 + $0xcf0] sm:$0xff]  ;;  %v350_v14 = vld [vmem:[%s8359_s1 + $0x3e8] sm:$0xff] }
  0x76   : > { %756 = vmatpush.msrb.mxu0 %v339_v16  ;;  %776 = vmatpush.msrb.mxu1 %v483_v17  ;;  %v3548_v13 = vld [vmem:[%s8359_s1 + $0x1170] sm:$0xff]  ;;  %v494_v15 = vld [vmem:[%s8359_s1 + $0x868] sm:$0xff] }
  0x77   : > { %796 = vmatpush.msrb.mxu2 %v340_v18  ;;  %816 = vmatpush.msrb.mxu3 %v484_v19  ;;  %v3395_v16 = vld [vmem:[%s8359_s1 + $0xca8] sm:$0xff]  ;;  %v341_v18 = vld [vmem:[%s8359_s1 + $0x3a0] sm:$0xff] }
  0x78   : > { %757 = vmatpush.msrb.mxu0 %v330_v20  ;;  %777 = vmatpush.msrb.mxu1 %v474_v21  ;;  %v3539_v17 = vld [vmem:[%s8359_s1 + $0x1128] sm:$0xff]  ;;  %v485_v19 = vld [vmem:[%s8359_s1 + $0x820] sm:$0xff] }
  0x79   : > { %797 = vmatpush.msrb.mxu2 %v331_v22  ;;  %817 = vmatpush.msrb.mxu3 %v475_v23  ;;  %v3386_v20 = vld [vmem:[%s8359_s1 + $0xc60] sm:$0xff]  ;;  %v332_v22 = vld [vmem:[%s8359_s1 + $0x358] sm:$0xff] }
  0x7a   : > { %758 = vmatpush.msrb.mxu0 %v321_v24  ;;  %778 = vmatpush.msrb.mxu1 %v465_v25  ;;  %v3530_v21 = vld [vmem:[%s8359_s1 + $0x10e0] sm:$0xff]  ;;  %v476_v23 = vld [vmem:[%s8359_s1 + $0x7d8] sm:$0xff] }
  0x7b   : > { %798 = vmatpush.msrb.mxu2 %v322_v26  ;;  %818 = vmatpush.msrb.mxu3 %v466_v27  ;;  %v3377_v24 = vld [vmem:[%s8359_s1 + $0xc18] sm:$0xff]  ;;  %v323_v26 = vld [vmem:[%s8359_s1 + $0x310] sm:$0xff] }
  0x7c   : > { %759 = vmatpush.msrb.mxu0 %v312_v28  ;;  %779 = vmatpush.msrb.mxu1 %v456_v29  ;;  %v3521_v25 = vld [vmem:[%s8359_s1 + $0x1098] sm:$0xff]  ;;  %v467_v27 = vld [vmem:[%s8359_s1 + $0x790] sm:$0xff] }
  0x7d   : > { %799 = vmatpush.msrb.mxu2 %v313_v30  ;;  %819 = vmatpush.msrb.mxu3 %v457_v31  ;;  %v3368_v28 = vld [vmem:[%s8359_s1 + $0xbd0] sm:$0xff]  ;;  %v314_v30 = vld [vmem:[%s8359_s1 + $0x2c8] sm:$0xff] }
  0x7e   : > { %760 = vmatpush.msrb.mxu0 %v303_v32  ;;  %780 = vmatpush.msrb.mxu1 %v447_v33  ;;  %v3512_v29 = vld [vmem:[%s8359_s1 + $0x1050] sm:$0xff]  ;;  %v458_v31 = vld [vmem:[%s8359_s1 + $0x748] sm:$0xff] }
  0x7f   : > { %800 = vmatpush.msrb.mxu2 %v304_v34  ;;  %820 = vmatpush.msrb.mxu3 %v448_v35  ;;  %v3359_v32 = vld [vmem:[%s8359_s1 + $0xb88] sm:$0xff]  ;;  %v305_v34 = vld [vmem:[%s8359_s1 + $0x280] sm:$0xff] }
  0x80   : > { %761 = vmatpush.msrb.mxu0 %v294_v36  ;;  %781 = vmatpush.msrb.mxu1 %v438_v37  ;;  %v3503_v33 = vld [vmem:[%s8359_s1 + $0x1008] sm:$0xff]  ;;  %v449_v35 = vld [vmem:[%s8359_s1 + $0x700] sm:$0xff] }
  0x81   : > { %801 = vmatpush.msrb.mxu2 %v295_v38  ;;  %821 = vmatpush.msrb.mxu3 %v439_v39  ;;  %v3350_v36 = vld [vmem:[%s8359_s1 + $0xb40] sm:$0xff]  ;;  %v296_v38 = vld [vmem:[%s8359_s1 + $0x238] sm:$0xff] }
  0x82   : > { %762 = vmatpush.msrb.mxu0 %v285_v40  ;;  %782 = vmatpush.msrb.mxu1 %v429_v41  ;;  %v3494_v37 = vld [vmem:[%s8359_s1 + $0xfc0] sm:$0xff]  ;;  %v440_v39 = vld [vmem:[%s8359_s1 + $0x6b8] sm:$0xff] }
  0x83   : > { %802 = vmatpush.msrb.mxu2 %v286_v42  ;;  %822 = vmatpush.msrb.mxu3 %v430_v43  ;;  %v3341_v40 = vld [vmem:[%s8359_s1 + $0xaf8] sm:$0xff]  ;;  %v287_v42 = vld [vmem:[%s8359_s1 + $0x1f0] sm:$0xff] }
  0x84   : > { %763 = vmatpush.msrb.mxu0 %v276_v44  ;;  %783 = vmatpush.msrb.mxu1 %v420_v45  ;;  %v3485_v41 = vld [vmem:[%s8359_s1 + $0xf78] sm:$0xff]  ;;  %v431_v43 = vld [vmem:[%s8359_s1 + $0x670] sm:$0xff] }
  0x85   : > { %803 = vmatpush.msrb.mxu2 %v277_v46  ;;  %823 = vmatpush.msrb.mxu3 %v421_v47  ;;  %v3332_v44 = vld [vmem:[%s8359_s1 + $0xab0] sm:$0xff]  ;;  %v278_v46 = vld [vmem:[%s8359_s1 + $0x1a8] sm:$0xff] }
  0x86   : > { %764 = vmatpush.msrb.mxu0 %v267_v48  ;;  %784 = vmatpush.msrb.mxu1 %v411_v49  ;;  %v3476_v45 = vld [vmem:[%s8359_s1 + $0xf30] sm:$0xff]  ;;  %v422_v47 = vld [vmem:[%s8359_s1 + $0x628] sm:$0xff] }
  0x87   : > { %804 = vmatpush.msrb.mxu2 %v268_v50  ;;  %824 = vmatpush.msrb.mxu3 %v412_v51  ;;  %v3323_v48 = vld [vmem:[%s8359_s1 + $0xa68] sm:$0xff]  ;;  %v269_v50 = vld [vmem:[%s8359_s1 + $0x160] sm:$0xff] }
  0x88   : > { %765 = vmatpush.msrb.mxu0 %v258_v52  ;;  %785 = vmatpush.msrb.mxu1 %v402_v53  ;;  %v3467_v49 = vld [vmem:[%s8359_s1 + $0xee8] sm:$0xff]  ;;  %v413_v51 = vld [vmem:[%s8359_s1 + $0x5e0] sm:$0xff] }
  0x89   : > { %805 = vmatpush.msrb.mxu2 %v259_v54  ;;  %825 = vmatpush.msrb.mxu3 %v403_v55  ;;  %v3314_v52 = vld [vmem:[%s8359_s1 + $0xa20] sm:$0xff]  ;;  %v260_v54 = vld [vmem:[%s8359_s1 + $0x118] sm:$0xff] }
  0x8a   : > { %766 = vmatpush.msrb.mxu0 %v249_v56  ;;  %786 = vmatpush.msrb.mxu1 %v393_v57  ;;  %v3458_v53 = vld [vmem:[%s8359_s1 + $0xea0] sm:$0xff]  ;;  %v404_v55 = vld [vmem:[%s8359_s1 + $0x598] sm:$0xff] }
  0x8b   : > { %806 = vmatpush.msrb.mxu2 %v250_v58  ;;  %826 = vmatpush.msrb.mxu3 %v394_v59  ;;  %v3305_v56 = vld [vmem:[%s8359_s1 + $0x9d8] sm:$0xff]  ;;  %v251_v58 = vld [vmem:[%s8359_s1 + $0xd0] sm:$0xff] }
  0x8c   : > { %767 = vmatpush.msrb.mxu0 %v240_v60  ;;  %787 = vmatpush.msrb.mxu1 %v384_v61  ;;  %v3449_v57 = vld [vmem:[%s8359_s1 + $0xe58] sm:$0xff]  ;;  %v395_v59 = vld [vmem:[%s8359_s1 + $0x550] sm:$0xff] }
  0x8d   : > { %807 = vmatpush.msrb.mxu2 %v241_v62  ;;  %827 = vmatpush.msrb.mxu3 %v385_v63  ;;  %v3296_v60 = vld [vmem:[%s8359_s1 + $0x990] sm:$0xff]  ;;  %v242_v62 = vld [vmem:[%s8359_s1 + $0x88] sm:$0xff] }
  0x8e   : > { %768 = vmatpush.msrb.mxu0 %v231_v2  ;;  %788 = vmatpush.msrb.mxu1 %v375_v3  ;;  %v3440_v61 = vld [vmem:[%s8359_s1 + $0xe10] sm:$0xff]  ;;  %v386_v63 = vld [vmem:[%s8359_s1 + $0x508] sm:$0xff] }
  0x8f   : > { %808 = vmatpush.msrb.mxu2 %v232_v4  ;;  %828 = vmatpush.msrb.mxu3 %v376_v5  ;;  %v3287_v2 = vld [vmem:[%s8359_s1 + $0x948] sm:$0xff]  ;;  %v233_v4 = vld [vmem:[%s8359_s1 + $0x40] sm:$0xff] }
  0x90   : > { %689 = vmatmul.f32.vlgmr.msra.gmra.mxu0 %v4612_v0  ;;  %709 = vmatmul.f32.vlgmr.msra.gmra.mxu1 %v4615_v1  ;;  %v3431_v3 = vld [vmem:[%s8359_s1 + $0xdc8] sm:$0xff]  ;;  %v377_v5 = vld [vmem:[%s8359_s1 + $0x4c0] sm:$0xff] }
  0x91   : > { %729 = vmatmul.f32.vlgmr.msra.gmra.mxu2 %v4612_v0  ;;  %749 = vmatmul.f32.vlgmr.msra.gmra.mxu3 %v4615_v1 }
  0x92   : > { %833 = vmatpush.msra.mxu0 %v368_v6  ;;  %853 = vmatpush.msra.mxu1 %v512_v7  ;;  %v3278_v6 = vld [vmem:[%s8359_s1 + $0x900] sm:$0xff] }
  0x93   : > { %1162 = vmatpush.msra.mxu2 %v3413_v8  ;;  %1182 = vmatpush.msra.mxu3 %v3557_v9  ;;  %v3422_v7 = vld [vmem:[%s8359_s1 + $0xd80] sm:$0xff] }
  0x94   : > { %834 = vmatpush.msra.mxu0 %v359_v10  ;;  %854 = vmatpush.msra.mxu1 %v503_v11  ;;  %v3414_v8 = vld [vmem:[%s8359_s1 + $0xd40] sm:$0xff]  ;;  %v3415_v10 = vld [vmem:[%s8359_s1 + $0xd48] sm:$0xff] }
  0x95   : > { %1163 = vmatpush.msra.mxu2 %v3404_v12  ;;  %1183 = vmatpush.msra.mxu3 %v3548_v13  ;;  %v3558_v9 = vld [vmem:[%s8359_s1 + $0x11c0] sm:$0xff]  ;;  %v3559_v11 = vld [vmem:[%s8359_s1 + $0x11c8] sm:$0xff]  ;;  %v3405_v12 = vld [vmem:[%s8359_s1 + $0xcf8] sm:$0xff] }
  0x96   : > { %835 = vmatpush.msra.mxu0 %v350_v14  ;;  %855 = vmatpush.msra.mxu1 %v494_v15  ;;  %v3549_v13 = vld [vmem:[%s8359_s1 + $0x1178] sm:$0xff]  ;;  %v3406_v14 = vld [vmem:[%s8359_s1 + $0xd00] sm:$0xff]  ;;  %v3540_v15 = vld [vmem:[%s8359_s1 + $0x1130] sm:$0xff] }
  0x97   : > { %1164 = vmatpush.msra.mxu2 %v3395_v16  ;;  %1184 = vmatpush.msra.mxu3 %v3539_v17  ;;  %v3397_v16 = vld [vmem:[%s8359_s1 + $0xcb8] sm:$0xff] }
  0x98   : > { %836 = vmatpush.msra.mxu0 %v341_v18  ;;  %856 = vmatpush.msra.mxu1 %v485_v19  ;;  %v3541_v17 = vld [vmem:[%s8359_s1 + $0x1138] sm:$0xff]  ;;  %v3387_v18 = vld [vmem:[%s8359_s1 + $0xc68] sm:$0xff] }
  0x99   : > { %1165 = vmatpush.msra.mxu2 %v3386_v20  ;;  %1185 = vmatpush.msra.mxu3 %v3530_v21  ;;  %v3531_v19 = vld [vmem:[%s8359_s1 + $0x10e8] sm:$0xff]  ;;  %v3388_v20 = vld [vmem:[%s8359_s1 + $0xc70] sm:$0xff] }
  0x9a   : > { %837 = vmatpush.msra.mxu0 %v332_v22  ;;  %857 = vmatpush.msra.mxu1 %v476_v23  ;;  %v3532_v21 = vld [vmem:[%s8359_s1 + $0x10f0] sm:$0xff]  ;;  %v3378_v22 = vld [vmem:[%s8359_s1 + $0xc20] sm:$0xff] }
  0x9b   : > { %1166 = vmatpush.msra.mxu2 %v3377_v24  ;;  %1186 = vmatpush.msra.mxu3 %v3521_v25  ;;  %v3522_v23 = vld [vmem:[%s8359_s1 + $0x10a0] sm:$0xff]  ;;  %v3379_v24 = vld [vmem:[%s8359_s1 + $0xc28] sm:$0xff] }
  0x9c   : > { %838 = vmatpush.msra.mxu0 %v323_v26  ;;  %858 = vmatpush.msra.mxu1 %v467_v27  ;;  %v3523_v25 = vld [vmem:[%s8359_s1 + $0x10a8] sm:$0xff]  ;;  %v3369_v26 = vld [vmem:[%s8359_s1 + $0xbd8] sm:$0xff] }
  0x9d   : > { %1167 = vmatpush.msra.mxu2 %v3368_v28  ;;  %1187 = vmatpush.msra.mxu3 %v3512_v29  ;;  %v3513_v27 = vld [vmem:[%s8359_s1 + $0x1058] sm:$0xff]  ;;  %v3370_v28 = vld [vmem:[%s8359_s1 + $0xbe0] sm:$0xff] }
  0x9e   : > { %839 = vmatpush.msra.mxu0 %v314_v30  ;;  %859 = vmatpush.msra.mxu1 %v458_v31  ;;  %v3514_v29 = vld [vmem:[%s8359_s1 + $0x1060] sm:$0xff]  ;;  %v3360_v30 = vld [vmem:[%s8359_s1 + $0xb90] sm:$0xff] }
  0x9f   : > { %1168 = vmatpush.msra.mxu2 %v3359_v32  ;;  %1188 = vmatpush.msra.mxu3 %v3503_v33  ;;  %v3504_v31 = vld [vmem:[%s8359_s1 + $0x1010] sm:$0xff]  ;;  %v3361_v32 = vld [vmem:[%s8359_s1 + $0xb98] sm:$0xff] }
  0xa0   : > { %840 = vmatpush.msra.mxu0 %v305_v34  ;;  %860 = vmatpush.msra.mxu1 %v449_v35  ;;  %v3505_v33 = vld [vmem:[%s8359_s1 + $0x1018] sm:$0xff]  ;;  %v3351_v34 = vld [vmem:[%s8359_s1 + $0xb48] sm:$0xff] }
  0xa1   : > { %1169 = vmatpush.msra.mxu2 %v3350_v36  ;;  %1189 = vmatpush.msra.mxu3 %v3494_v37  ;;  %v3495_v35 = vld [vmem:[%s8359_s1 + $0xfc8] sm:$0xff]  ;;  %v3352_v36 = vld [vmem:[%s8359_s1 + $0xb50] sm:$0xff] }
  0xa2   : > { %841 = vmatpush.msra.mxu0 %v296_v38  ;;  %861 = vmatpush.msra.mxu1 %v440_v39  ;;  %v3496_v37 = vld [vmem:[%s8359_s1 + $0xfd0] sm:$0xff]  ;;  %v3342_v38 = vld [vmem:[%s8359_s1 + $0xb00] sm:$0xff] }
  0xa3   : > { %1170 = vmatpush.msra.mxu2 %v3341_v40  ;;  %1190 = vmatpush.msra.mxu3 %v3485_v41  ;;  %v3486_v39 = vld [vmem:[%s8359_s1 + $0xf80] sm:$0xff]  ;;  %v3343_v40 = vld [vmem:[%s8359_s1 + $0xb08] sm:$0xff] }
  0xa4   : > { %842 = vmatpush.msra.mxu0 %v287_v42  ;;  %862 = vmatpush.msra.mxu1 %v431_v43  ;;  %v3487_v41 = vld [vmem:[%s8359_s1 + $0xf88] sm:$0xff]  ;;  %v3333_v42 = vld [vmem:[%s8359_s1 + $0xab8] sm:$0xff] }
  0xa5   : > { %1171 = vmatpush.msra.mxu2 %v3332_v44  ;;  %1191 = vmatpush.msra.mxu3 %v3476_v45  ;;  %v3477_v43 = vld [vmem:[%s8359_s1 + $0xf38] sm:$0xff]  ;;  %v3334_v44 = vld [vmem:[%s8359_s1 + $0xac0] sm:$0xff] }
  0xa6   : > { %843 = vmatpush.msra.mxu0 %v278_v46  ;;  %863 = vmatpush.msra.mxu1 %v422_v47  ;;  %v3478_v45 = vld [vmem:[%s8359_s1 + $0xf40] sm:$0xff]  ;;  %v3324_v46 = vld [vmem:[%s8359_s1 + $0xa70] sm:$0xff] }
  0xa7   : > { %1172 = vmatpush.msra.mxu2 %v3323_v48  ;;  %1192 = vmatpush.msra.mxu3 %v3467_v49  ;;  %v3468_v47 = vld [vmem:[%s8359_s1 + $0xef0] sm:$0xff]  ;;  %v3325_v48 = vld [vmem:[%s8359_s1 + $0xa78] sm:$0xff] }
  0xa8   : > { %844 = vmatpush.msra.mxu0 %v269_v50  ;;  %864 = vmatpush.msra.mxu1 %v413_v51  ;;  %v3469_v49 = vld [vmem:[%s8359_s1 + $0xef8] sm:$0xff]  ;;  %v3315_v50 = vld [vmem:[%s8359_s1 + $0xa28] sm:$0xff] }
  0xa9   : > { %1173 = vmatpush.msra.mxu2 %v3314_v52  ;;  %1193 = vmatpush.msra.mxu3 %v3458_v53  ;;  %v3459_v51 = vld [vmem:[%s8359_s1 + $0xea8] sm:$0xff]  ;;  %v3316_v52 = vld [vmem:[%s8359_s1 + $0xa30] sm:$0xff] }
  0xaa   : > { %809 = vmatmul.f32.vlgmr.msrb.gmra.mxu2 %v4612_v0  ;;  %829 = vmatmul.f32.vlgmr.msrb.gmra.mxu3 %v4615_v1  ;;  %v3460_v53 = vld [vmem:[%s8359_s1 + $0xeb0] sm:$0xff] }
  0xab   : > { %845 = vmatpush.msra.mxu0 %v260_v54  ;;  %865 = vmatpush.msra.mxu1 %v404_v55 }
  0xac   : > { %1174 = vmatpush.msra.mxu2 %v3305_v56  ;;  %1194 = vmatpush.msra.mxu3 %v3449_v57  ;;  %v3306_v57 = vld [vmem:[%s8359_s1 + $0x9e0] sm:$0xff] }
  0xad   : > { %846 = vmatpush.msra.mxu0 %v251_v58  ;;  %866 = vmatpush.msra.mxu1 %v395_v59  ;;  %v3450_v58 = vld [vmem:[%s8359_s1 + $0xe60] sm:$0xff]  ;;  %v3307_v59 = vld [vmem:[%s8359_s1 + $0x9e8] sm:$0xff] }
  0xae   : > { %1175 = vmatpush.msra.mxu2 %v3296_v60  ;;  %1195 = vmatpush.msra.mxu3 %v3440_v61  ;;  %v3451_v60 = vld [vmem:[%s8359_s1 + $0xe68] sm:$0xff]  ;;  %v5370_v61 = vld [vmem:[%s4591_s13] sm:$0xff] }
  0xaf   : > { %847 = vmatpush.msra.mxu0 %v242_v62  ;;  %867 = vmatpush.msra.mxu1 %v386_v63  ;;  %v5374_v62 = vld [vmem:[%s4591_s13 + $0x8] sm:$0xff]  ;;  %v3297_v63 = vld [vmem:[%s8359_s1 + $0x998] sm:$0xff] }
  0xb0   : > { %1176 = vmatpush.msra.mxu2 %v3287_v2  ;;  %1196 = vmatpush.msra.mxu3 %v3431_v3  ;;  %v3441_v2 = vld [vmem:[%s8359_s1 + $0xe18] sm:$0xff]  ;;  %v3298_v3 = vld [vmem:[%s8359_s1 + $0x9a0] sm:$0xff] }
  0xb1   : > { %848 = vmatpush.msra.mxu0 %v233_v4  ;;  %868 = vmatpush.msra.mxu1 %v377_v5  ;;  %v3442_v4 = vld [vmem:[%s8359_s1 + $0xe20] sm:$0xff]  ;;  %v3288_v5 = vld [vmem:[%s8359_s1 + $0x950] sm:$0xff] }
  0xb2   : > { %1177 = vmatpush.msra.mxu2 %v3278_v6  ;;  %1197 = vmatpush.msra.mxu3 %v3422_v7  ;;  %v3432_v6 = vld [vmem:[%s8359_s1 + $0xdd0] sm:$0xff]  ;;  %v3289_v7 = vld [vmem:[%s8359_s1 + $0x958] sm:$0xff] }
  0xb3   : > { %769 = vmatmul.f32.vlgmr.msrb.gmra.mxu0 %v4612_v0  ;;  %789 = vmatmul.f32.vlgmr.msrb.gmra.mxu1 %v4615_v1 }
  0xb4   : > { %1178 = vmatmul.f32.vlgmr.msra.gmra.mxu2 %v4612_v0  ;;  %1198 = vmatmul.f32.vlgmr.msra.gmra.mxu3 %v4615_v1  ;;  %v3550_v0 = vld [vmem:[%s8359_s1 + $0x1180] sm:$0xff]  ;;  %v3396_v1 = vld [vmem:[%s8359_s1 + $0xcb0] sm:$0xff] }
  0xb5   : > { %1202 = vmatpush.msrb.mxu0 %v3414_v8  ;;  %1222 = vmatpush.msrb.mxu1 %v3558_v9  ;;  %v3433_v8 = vld [vmem:[%s8359_s1 + $0xdd8] sm:$0xff] }
  0xb6   : > { %1242 = vmatpush.msrb.mxu2 %v3415_v10  ;;  %1262 = vmatpush.msrb.mxu3 %v3559_v11  ;;  %v3279_v11 = vld [vmem:[%s8359_s1 + $0x908] sm:$0xff] }
  0xb7   : > { %1203 = vmatpush.msrb.mxu0 %v3405_v12  ;;  %1223 = vmatpush.msrb.mxu1 %v3549_v13  ;;  %v3423_v12 = vld [vmem:[%s8359_s1 + $0xd88] sm:$0xff] }
  0xb8   : > { %1243 = vmatpush.msrb.mxu2 %v3406_v14  ;;  %1263 = vmatpush.msrb.mxu3 %v3550_v0  ;;  %v3280_v14 = vld [vmem:[%s8359_s1 + $0x910] sm:$0xff] }
  0xb9   : > { %1204 = vmatpush.msrb.mxu0 %v3396_v1  ;;  %1224 = vmatpush.msrb.mxu1 %v3540_v15  ;;  %v3424_v0 = vld [vmem:[%s8359_s1 + $0xd90] sm:$0xff] }
  0xba   : > { %1244 = vmatpush.msrb.mxu2 %v3397_v16  ;;  %1264 = vmatpush.msrb.mxu3 %v3541_v17  ;;  %v3416_v1 = vld [vmem:[%s8359_s1 + $0xd50] sm:$0xff]  ;;  %v3417_v16 = vld [vmem:[%s8359_s1 + $0xd58] sm:$0xff] }
  0xbb   : > { %1205 = vmatpush.msrb.mxu0 %v3387_v18  ;;  %1225 = vmatpush.msrb.mxu1 %v3531_v19  ;;  %v3560_v15 = vld [vmem:[%s8359_s1 + $0x11d0] sm:$0xff]  ;;  %v3561_v17 = vld [vmem:[%s8359_s1 + $0x11d8] sm:$0xff]  ;;  %v3407_v18 = vld [vmem:[%s8359_s1 + $0xd08] sm:$0xff] }
  0xbc   : > { %1245 = vmatpush.msrb.mxu2 %v3388_v20  ;;  %1265 = vmatpush.msrb.mxu3 %v3532_v21  ;;  %v3551_v19 = vld [vmem:[%s8359_s1 + $0x1188] sm:$0xff]  ;;  %v3408_v20 = vld [vmem:[%s8359_s1 + $0xd10] sm:$0xff] }
  0xbd   : > { %1206 = vmatpush.msrb.mxu0 %v3378_v22  ;;  %1226 = vmatpush.msrb.mxu1 %v3522_v23  ;;  %v3552_v21 = vld [vmem:[%s8359_s1 + $0x1190] sm:$0xff]  ;;  %v3398_v22 = vld [vmem:[%s8359_s1 + $0xcc0] sm:$0xff] }
  0xbe   : > { %1246 = vmatpush.msrb.mxu2 %v3379_v24  ;;  %1266 = vmatpush.msrb.mxu3 %v3523_v25  ;;  %v3542_v23 = vld [vmem:[%s8359_s1 + $0x1140] sm:$0xff]  ;;  %v3399_v24 = vld [vmem:[%s8359_s1 + $0xcc8] sm:$0xff] }
  0xbf   : > { %1207 = vmatpush.msrb.mxu0 %v3369_v26  ;;  %1227 = vmatpush.msrb.mxu1 %v3513_v27  ;;  %v3543_v25 = vld [vmem:[%s8359_s1 + $0x1148] sm:$0xff]  ;;  %v3389_v26 = vld [vmem:[%s8359_s1 + $0xc78] sm:$0xff] }
  0xc0   : > { %1247 = vmatpush.msrb.mxu2 %v3370_v28  ;;  %1267 = vmatpush.msrb.mxu3 %v3514_v29  ;;  %v3533_v27 = vld [vmem:[%s8359_s1 + $0x10f8] sm:$0xff]  ;;  %v3390_v28 = vld [vmem:[%s8359_s1 + $0xc80] sm:$0xff] }
  0xc1   : > { %1208 = vmatpush.msrb.mxu0 %v3360_v30  ;;  %1228 = vmatpush.msrb.mxu1 %v3504_v31  ;;  %v3534_v29 = vld [vmem:[%s8359_s1 + $0x1100] sm:$0xff]  ;;  %v3380_v30 = vld [vmem:[%s8359_s1 + $0xc30] sm:$0xff] }
  0xc2   : > { %1248 = vmatpush.msrb.mxu2 %v3361_v32  ;;  %1268 = vmatpush.msrb.mxu3 %v3505_v33  ;;  %v3524_v31 = vld [vmem:[%s8359_s1 + $0x10b0] sm:$0xff]  ;;  %v3381_v32 = vld [vmem:[%s8359_s1 + $0xc38] sm:$0xff] }
  0xc3   : > { %1209 = vmatpush.msrb.mxu0 %v3351_v34  ;;  %1229 = vmatpush.msrb.mxu1 %v3495_v35  ;;  %v3525_v33 = vld [vmem:[%s8359_s1 + $0x10b8] sm:$0xff]  ;;  %v3371_v34 = vld [vmem:[%s8359_s1 + $0xbe8] sm:$0xff] }
  0xc4   : > { %1249 = vmatpush.msrb.mxu2 %v3352_v36  ;;  %1269 = vmatpush.msrb.mxu3 %v3496_v37  ;;  %v3515_v35 = vld [vmem:[%s8359_s1 + $0x1068] sm:$0xff]  ;;  %v3372_v36 = vld [vmem:[%s8359_s1 + $0xbf0] sm:$0xff] }
  0xc5   : > { %1210 = vmatpush.msrb.mxu0 %v3342_v38  ;;  %1230 = vmatpush.msrb.mxu1 %v3486_v39  ;;  %v3516_v37 = vld [vmem:[%s8359_s1 + $0x1070] sm:$0xff]  ;;  %v3362_v38 = vld [vmem:[%s8359_s1 + $0xba0] sm:$0xff] }
  0xc6   : > { %1250 = vmatpush.msrb.mxu2 %v3343_v40  ;;  %1270 = vmatpush.msrb.mxu3 %v3487_v41  ;;  %v3506_v39 = vld [vmem:[%s8359_s1 + $0x1020] sm:$0xff]  ;;  %v3363_v40 = vld [vmem:[%s8359_s1 + $0xba8] sm:$0xff] }
  0xc7   : > { %1211 = vmatpush.msrb.mxu0 %v3333_v42  ;;  %1231 = vmatpush.msrb.mxu1 %v3477_v43  ;;  %v3507_v41 = vld [vmem:[%s8359_s1 + $0x1028] sm:$0xff]  ;;  %v3353_v42 = vld [vmem:[%s8359_s1 + $0xb58] sm:$0xff] }
  0xc8   : > { %1251 = vmatpush.msrb.mxu2 %v3334_v44  ;;  %1271 = vmatpush.msrb.mxu3 %v3478_v45  ;;  %v3497_v43 = vld [vmem:[%s8359_s1 + $0xfd8] sm:$0xff]  ;;  %v3354_v44 = vld [vmem:[%s8359_s1 + $0xb60] sm:$0xff] }
  0xc9   : > { %1212 = vmatpush.msrb.mxu0 %v3324_v46  ;;  %1232 = vmatpush.msrb.mxu1 %v3468_v47  ;;  %v530_v54 = vpop.f32.mrf.mxu0  ;;  %v550_v55 = vpop.f32.mrf.mxu1  ;;  %v3498_v45 = vld [vmem:[%s8359_s1 + $0xfe0] sm:$0xff]  ;;  %v3344_v46 = vld [vmem:[%s8359_s1 + $0xb10] sm:$0xff] }
  0xca   : > { %1252 = vmatpush.msrb.mxu2 %v3325_v48  ;;  %1272 = vmatpush.msrb.mxu3 %v3469_v49  ;;  %v5355_v56 = vadd.f32 %v550_v55, %v530_v54  ;;  %v3488_v47 = vld [vmem:[%s8359_s1 + $0xf90] sm:$0xff]  ;;  %v3345_v48 = vld [vmem:[%s8359_s1 + $0xb18] sm:$0xff]  ;;  %v3326_v54 = vld [vmem:[%s8359_s1 + $0xa80] sm:$0xff] }
  0xcb   : > { %1213 = vmatpush.msrb.mxu0 %v3315_v50  ;;  %1233 = vmatpush.msrb.mxu1 %v3459_v51  ;;  %v3489_v49 = vld [vmem:[%s8359_s1 + $0xf98] sm:$0xff]  ;;  %v3335_v50 = vld [vmem:[%s8359_s1 + $0xac8] sm:$0xff]  ;;  %v3470_v55 = vld [vmem:[%s8359_s1 + $0xf00] sm:$0xff] }
  0xcc   : > { %1253 = vmatpush.msrb.mxu2 %v3316_v52  ;;  %1273 = vmatpush.msrb.mxu3 %v3460_v53  ;;  %v3479_v51 = vld [vmem:[%s8359_s1 + $0xf48] sm:$0xff]  ;;  %v3336_v52 = vld [vmem:[%s8359_s1 + $0xad0] sm:$0xff] }
  0xcd   : > { %849 = vmatmul.f32.vlgmr.msra.gmra.mxu0 %v5370_v61  ;;  %869 = vmatmul.f32.vlgmr.msra.gmra.mxu1 %v5374_v62  ;;  %v3480_v53 = vld [vmem:[%s8359_s1 + $0xf50] sm:$0xff] }
  0xce   : > { %1214 = vmatpush.msrb.mxu0 %v3306_v57  ;;  %1234 = vmatpush.msrb.mxu1 %v3450_v58  ;;  %v3327_v57 = vld [vmem:[%s8359_s1 + $0xa88] sm:$0xff] }
  0xcf   : > { %1254 = vmatpush.msrb.mxu2 %v3307_v59  ;;  %1274 = vmatpush.msrb.mxu3 %v3451_v60  ;;  %v3471_v58 = vld [vmem:[%s8359_s1 + $0xf08] sm:$0xff]  ;;  %v3317_v59 = vld [vmem:[%s8359_s1 + $0xa38] sm:$0xff] }
  0xd0   : > { %1215 = vmatpush.msrb.mxu0 %v3297_v63  ;;  %1235 = vmatpush.msrb.mxu1 %v3441_v2  ;;  %v570_v9 = vpop.f32.mrf.mxu2  ;;  %v590_v10 = vpop.f32.mrf.mxu3  ;;  %v3461_v60 = vld [vmem:[%s8359_s1 + $0xeb8] sm:$0xff] }
  0xd1   : > { %1255 = vmatpush.msrb.mxu2 %v3298_v3  ;;  %1275 = vmatpush.msrb.mxu3 %v3442_v4  ;;  %v5407_v13 = vadd.f32 %v590_v10, %v570_v9  ;;  %v3318_v3 = vld [vmem:[%s8359_s1 + $0xa40] sm:$0xff]  ;;  %v3453_v9 = vld [vmem:[%s8359_s1 + $0xe78] sm:$0xff]  ;;  %v3299_v10 = vld [vmem:[%s8359_s1 + $0x9a8] sm:$0xff] }
  0xd2   : > { %1216 = vmatpush.msrb.mxu0 %v3288_v5  ;;  %1236 = vmatpush.msrb.mxu1 %v3432_v6  ;;  %v3462_v4 = vld [vmem:[%s8359_s1 + $0xec0] sm:$0xff]  ;;  %v3308_v6 = vld [vmem:[%s8359_s1 + $0x9f0] sm:$0xff] }
  0xd3   : > { %1256 = vmatpush.msrb.mxu2 %v3289_v7  ;;  %1276 = vmatpush.msrb.mxu3 %v3433_v8  ;;  %v3452_v7 = vld [vmem:[%s8359_s1 + $0xe70] sm:$0xff]  ;;  %v3309_v8 = vld [vmem:[%s8359_s1 + $0x9f8] sm:$0xff] }
  0xd4   : > { %1217 = vmatpush.msrb.mxu0 %v3279_v11  ;;  %1237 = vmatpush.msrb.mxu1 %v3423_v12  ;;  %v3443_v11 = vld [vmem:[%s8359_s1 + $0xe28] sm:$0xff]  ;;  %v3300_v12 = vld [vmem:[%s8359_s1 + $0x9b0] sm:$0xff] }
  0xd5   : > { %1257 = vmatpush.msrb.mxu2 %v3280_v14  ;;  %1277 = vmatpush.msrb.mxu3 %v3424_v0  ;;  %v3444_v14 = vld [vmem:[%s8359_s1 + $0xe30] sm:$0xff]  ;;  %v3290_v0 = vld [vmem:[%s8359_s1 + $0x960] sm:$0xff] }
  0xd6   : > { %1218 = vmatmul.f32.vlgmr.msrb.gmra.mxu0 %v5370_v61  ;;  %1238 = vmatmul.f32.vlgmr.msrb.gmra.mxu1 %v5374_v62 }
  0xd7   : > { %1258 = vmatmul.f32.vlgmr.msrb.gmra.mxu2 %v5370_v61  ;;  %1278 = vmatmul.f32.vlgmr.msrb.gmra.mxu3 %v5374_v62 }
  0xd8   : > { %1282 = vmatpush.msra.mxu0 %v3416_v1  ;;  %1302 = vmatpush.msra.mxu1 %v3560_v15  ;;  %v3434_v1 = vld [vmem:[%s8359_s1 + $0xde0] sm:$0xff]  ;;  %v3291_v15 = vld [vmem:[%s8359_s1 + $0x968] sm:$0xff] }
  0xd9   : > { %1322 = vmatpush.msra.mxu2 %v3417_v16  ;;  %1342 = vmatpush.msra.mxu3 %v3561_v17  ;;  %v3435_v16 = vld [vmem:[%s8359_s1 + $0xde8] sm:$0xff] }
  0xda   : > { %1283 = vmatpush.msra.mxu0 %v3407_v18  ;;  %1303 = vmatpush.msra.mxu1 %v3551_v19  ;;  %v3281_v19 = vld [vmem:[%s8359_s1 + $0x918] sm:$0xff] }
  0xdb   : > { %1323 = vmatpush.msra.mxu2 %v3408_v20  ;;  %1343 = vmatpush.msra.mxu3 %v3552_v21  ;;  %v3425_v20 = vld [vmem:[%s8359_s1 + $0xd98] sm:$0xff] }
  0xdc   : > { %1284 = vmatpush.msra.mxu0 %v3398_v22  ;;  %1304 = vmatpush.msra.mxu1 %v3542_v23  ;;  %v3282_v22 = vld [vmem:[%s8359_s1 + $0x920] sm:$0xff] }
  0xdd   : > { %1324 = vmatpush.msra.mxu2 %v3399_v24  ;;  %1344 = vmatpush.msra.mxu3 %v3543_v25  ;;  %v3426_v23 = vld [vmem:[%s8359_s1 + $0xda0] sm:$0xff] }
  0xde   : > { %1285 = vmatpush.msra.mxu0 %v3389_v26  ;;  %1305 = vmatpush.msra.mxu1 %v3533_v27  ;;  %v3418_v24 = vld [vmem:[%s8359_s1 + $0xd60] sm:$0xff]  ;;  %v3419_v26 = vld [vmem:[%s8359_s1 + $0xd68] sm:$0xff] }
  0xdf   : > { %1325 = vmatpush.msra.mxu2 %v3390_v28  ;;  %1345 = vmatpush.msra.mxu3 %v3534_v29  ;;  %v3562_v25 = vld [vmem:[%s8359_s1 + $0x11e0] sm:$0xff]  ;;  %v3563_v27 = vld [vmem:[%s8359_s1 + $0x11e8] sm:$0xff]  ;;  %v3409_v28 = vld [vmem:[%s8359_s1 + $0xd18] sm:$0xff] }
  0xe0   : > { %1286 = vmatpush.msra.mxu0 %v3380_v30  ;;  %1306 = vmatpush.msra.mxu1 %v3524_v31  ;;  %v3553_v29 = vld [vmem:[%s8359_s1 + $0x1198] sm:$0xff]  ;;  %v3410_v30 = vld [vmem:[%s8359_s1 + $0xd20] sm:$0xff] }
  0xe1   : > { %1326 = vmatpush.msra.mxu2 %v3381_v32  ;;  %1346 = vmatpush.msra.mxu3 %v3525_v33  ;;  %v3554_v31 = vld [vmem:[%s8359_s1 + $0x11a0] sm:$0xff]  ;;  %v3400_v32 = vld [vmem:[%s8359_s1 + $0xcd0] sm:$0xff] }
  0xe2   : > { %1287 = vmatpush.msra.mxu0 %v3371_v34  ;;  %1307 = vmatpush.msra.mxu1 %v3515_v35  ;;  %v3544_v33 = vld [vmem:[%s8359_s1 + $0x1150] sm:$0xff]  ;;  %v3401_v34 = vld [vmem:[%s8359_s1 + $0xcd8] sm:$0xff] }
  0xe3   : > { %1327 = vmatpush.msra.mxu2 %v3372_v36  ;;  %1347 = vmatpush.msra.mxu3 %v3516_v37  ;;  %v3545_v35 = vld [vmem:[%s8359_s1 + $0x1158] sm:$0xff]  ;;  %v3391_v36 = vld [vmem:[%s8359_s1 + $0xc88] sm:$0xff] }
  0xe4   : > { %1288 = vmatpush.msra.mxu0 %v3362_v38  ;;  %1308 = vmatpush.msra.mxu1 %v3506_v39  ;;  %v3535_v37 = vld [vmem:[%s8359_s1 + $0x1108] sm:$0xff]  ;;  %v3392_v38 = vld [vmem:[%s8359_s1 + $0xc90] sm:$0xff] }
  0xe5   : > { %1328 = vmatpush.msra.mxu2 %v3363_v40  ;;  %1348 = vmatpush.msra.mxu3 %v3507_v41  ;;  %v3536_v39 = vld [vmem:[%s8359_s1 + $0x1110] sm:$0xff]  ;;  %v3382_v40 = vld [vmem:[%s8359_s1 + $0xc40] sm:$0xff] }
  0xe6   : > { %1289 = vmatpush.msra.mxu0 %v3353_v42  ;;  %1309 = vmatpush.msra.mxu1 %v3497_v43  ;;  %v3526_v41 = vld [vmem:[%s8359_s1 + $0x10c0] sm:$0xff]  ;;  %v3383_v42 = vld [vmem:[%s8359_s1 + $0xc48] sm:$0xff] }
  0xe7   : > { %1329 = vmatpush.msra.mxu2 %v3354_v44  ;;  %1349 = vmatpush.msra.mxu3 %v3498_v45  ;;  %v3527_v43 = vld [vmem:[%s8359_s1 + $0x10c8] sm:$0xff]  ;;  %v3373_v44 = vld [vmem:[%s8359_s1 + $0xbf8] sm:$0xff] }
  0xe8   : > { %1290 = vmatpush.msra.mxu0 %v3344_v46  ;;  %1310 = vmatpush.msra.mxu1 %v3488_v47  ;;  %v3517_v45 = vld [vmem:[%s8359_s1 + $0x1078] sm:$0xff]  ;;  %v3374_v46 = vld [vmem:[%s8359_s1 + $0xc00] sm:$0xff] }
  0xe9   : > { %1330 = vmatpush.msra.mxu2 %v3345_v48  ;;  %1350 = vmatpush.msra.mxu3 %v3489_v49  ;;  %v3518_v47 = vld [vmem:[%s8359_s1 + $0x1080] sm:$0xff]  ;;  %v3364_v48 = vld [vmem:[%s8359_s1 + $0xbb0] sm:$0xff] }
  0xea   : > { %1291 = vmatpush.msra.mxu0 %v3335_v50  ;;  %1311 = vmatpush.msra.mxu1 %v3479_v51  ;;  %v3508_v49 = vld [vmem:[%s8359_s1 + $0x1030] sm:$0xff]  ;;  %v3365_v50 = vld [vmem:[%s8359_s1 + $0xbb8] sm:$0xff] }
  0xeb   : > { %1331 = vmatpush.msra.mxu2 %v3336_v52  ;;  %1351 = vmatpush.msra.mxu3 %v3480_v53  ;;  %v610_v63 = vpop.f32.mrf.mxu0  ;;  %v630_v2 = vpop.f32.mrf.mxu1  ;;  %v3509_v51 = vld [vmem:[%s8359_s1 + $0x1038] sm:$0xff]  ;;  %v3355_v52 = vld [vmem:[%s8359_s1 + $0xb68] sm:$0xff] }
  0xec   : > { %1292 = vmatpush.msra.mxu0 %v3326_v54  ;;  %1312 = vmatpush.msra.mxu1 %v3470_v55  ;;  %v5563_v5 = vadd.f32 %v630_v2, %v610_v63  ;;  %v3499_v53 = vld [vmem:[%s8359_s1 + $0xfe8] sm:$0xff]  ;;  %v3356_v54 = vld [vmem:[%s8359_s1 + $0xb70] sm:$0xff]  ;;  %v3337_v63 = vld [vmem:[%s8359_s1 + $0xad8] sm:$0xff] }
  0xed   : > { %1332 = vmatpush.msra.mxu2 %v3327_v57  ;;  %1352 = vmatpush.msra.mxu3 %v3471_v58  ;;  %v3500_v55 = vld [vmem:[%s8359_s1 + $0xff0] sm:$0xff]  ;;  %v3346_v57 = vld [vmem:[%s8359_s1 + $0xb20] sm:$0xff]  ;;  %v3481_v2 = vld [vmem:[%s8359_s1 + $0xf58] sm:$0xff] }
  0xee   : > { %1293 = vmatpush.msra.mxu0 %v3317_v59  ;;  %1313 = vmatpush.msra.mxu1 %v3461_v60  ;;  %v3490_v58 = vld [vmem:[%s8359_s1 + $0xfa0] sm:$0xff]  ;;  %v3347_v59 = vld [vmem:[%s8359_s1 + $0xb28] sm:$0xff] }
  0xef   : > { %1333 = vmatpush.msra.mxu2 %v3318_v3  ;;  %1353 = vmatpush.msra.mxu3 %v3462_v4  ;;  %v3491_v60 = vld [vmem:[%s8359_s1 + $0xfa8] sm:$0xff]  ;;  %v3338_v3 = vld [vmem:[%s8359_s1 + $0xae0] sm:$0xff] }
  0xf0   : > { %1294 = vmatpush.msra.mxu0 %v3308_v6  ;;  %1314 = vmatpush.msra.mxu1 %v3452_v7  ;;  %v3482_v4 = vld [vmem:[%s8359_s1 + $0xf60] sm:$0xff]  ;;  %v3328_v6 = vld [vmem:[%s8359_s1 + $0xa90] sm:$0xff] }
  0xf1   : > { %1334 = vmatpush.msra.mxu2 %v3309_v8  ;;  %1354 = vmatpush.msra.mxu3 %v3453_v9  ;;  %v3472_v7 = vld [vmem:[%s8359_s1 + $0xf10] sm:$0xff]  ;;  %v3329_v8 = vld [vmem:[%s8359_s1 + $0xa98] sm:$0xff] }
  0xf2   : > { %1295 = vmatpush.msra.mxu0 %v3299_v10  ;;  %1315 = vmatpush.msra.mxu1 %v3443_v11  ;;  %v650_v17 = vpop.f32.mrf.mxu2  ;;  %v670_v18 = vpop.f32.mrf.mxu3  ;;  %v3473_v9 = vld [vmem:[%s8359_s1 + $0xf18] sm:$0xff]  ;;  %v3319_v10 = vld [vmem:[%s8359_s1 + $0xa48] sm:$0xff] }
  0xf3   : > { %1335 = vmatpush.msra.mxu2 %v3300_v12  ;;  %1355 = vmatpush.msra.mxu3 %v3444_v14  ;;  %v5607_v21 = vadd.f32 %v670_v18, %v650_v17  ;;  %v3463_v11 = vld [vmem:[%s8359_s1 + $0xec8] sm:$0xff]  ;;  %v3454_v17 = vld [vmem:[%s8359_s1 + $0xe80] sm:$0xff] }
  0xf4   : > { %1296 = vmatpush.msra.mxu0 %v3290_v0  ;;  %1316 = vmatpush.msra.mxu1 %v3434_v1  ;;  %v3320_v0 = vld [vmem:[%s8359_s1 + $0xa50] sm:$0xff]  ;;  %v3311_v18 = vld [vmem:[%s8359_s1 + $0xa08] sm:$0xff] }
  0xf5   : > { %1336 = vmatpush.msra.mxu2 %v3291_v15  ;;  %1356 = vmatpush.msra.mxu3 %v3435_v16  ;;  %v3464_v1 = vld [vmem:[%s8359_s1 + $0xed0] sm:$0xff]  ;;  %v3310_v16 = vld [vmem:[%s8359_s1 + $0xa00] sm:$0xff] }
  0xf6   : > { %1297 = vmatpush.msra.mxu0 %v3281_v19  ;;  %1317 = vmatpush.msra.mxu1 %v3425_v20  ;;  %v3455_v19 = vld [vmem:[%s8359_s1 + $0xe88] sm:$0xff]  ;;  %v3301_v20 = vld [vmem:[%s8359_s1 + $0x9b8] sm:$0xff] }
  0xf7   : > { %1337 = vmatpush.msra.mxu2 %v3282_v22  ;;  %1357 = vmatpush.msra.mxu3 %v3426_v23  ;;  %v3445_v22 = vld [vmem:[%s8359_s1 + $0xe38] sm:$0xff]  ;;  %v3302_v23 = vld [vmem:[%s8359_s1 + $0x9c0] sm:$0xff] }
  0xf8   : > { %1298 = vmatmul.f32.vlgmr.msra.gmra.mxu0 %v5370_v61  ;;  %1318 = vmatmul.f32.vlgmr.msra.gmra.mxu1 %v5374_v62 }
  0xf9   : > { %1338 = vmatmul.f32.vlgmr.msra.gmra.mxu2 %v5370_v61  ;;  %1358 = vmatmul.f32.vlgmr.msra.gmra.mxu3 %v5374_v62 }
  0xfa   : > { %1362 = vmatpush.msrb.mxu0 %v3418_v24  ;;  %1382 = vmatpush.msrb.mxu1 %v3562_v25  ;;  %v3446_v24 = vld [vmem:[%s8359_s1 + $0xe40] sm:$0xff]  ;;  %v3292_v25 = vld [vmem:[%s8359_s1 + $0x970] sm:$0xff] }
  0xfb   : > { %1402 = vmatpush.msrb.mxu2 %v3419_v26  ;;  %1422 = vmatpush.msrb.mxu3 %v3563_v27  ;;  %v3436_v26 = vld [vmem:[%s8359_s1 + $0xdf0] sm:$0xff]  ;;  %v3293_v27 = vld [vmem:[%s8359_s1 + $0x978] sm:$0xff] }
  0xfc   : > { %1363 = vmatpush.msrb.mxu0 %v3409_v28  ;;  %1383 = vmatpush.msrb.mxu1 %v3553_v29  ;;  %v3437_v28 = vld [vmem:[%s8359_s1 + $0xdf8] sm:$0xff] }
  0xfd   : > { %1403 = vmatpush.msrb.mxu2 %v3410_v30  ;;  %1423 = vmatpush.msrb.mxu3 %v3554_v31  ;;  %v3283_v31 = vld [vmem:[%s8359_s1 + $0x928] sm:$0xff] }
  0xfe   : > { %1364 = vmatpush.msrb.mxu0 %v3400_v32  ;;  %1384 = vmatpush.msrb.mxu1 %v3544_v33  ;;  %v3427_v32 = vld [vmem:[%s8359_s1 + $0xda8] sm:$0xff] }
  0xff   : > { %1404 = vmatpush.msrb.mxu2 %v3401_v34  ;;  %1424 = vmatpush.msrb.mxu3 %v3545_v35  ;;  %v3284_v34 = vld [vmem:[%s8359_s1 + $0x930] sm:$0xff] }
 0x100   : > { %1365 = vmatpush.msrb.mxu0 %v3391_v36  ;;  %1385 = vmatpush.msrb.mxu1 %v3535_v37  ;;  %v3428_v35 = vld [vmem:[%s8359_s1 + $0xdb0] sm:$0xff] }
 0x101   : > { %1405 = vmatpush.msrb.mxu2 %v3392_v38  ;;  %1425 = vmatpush.msrb.mxu3 %v3536_v39  ;;  %v3420_v36 = vld [vmem:[%s8359_s1 + $0xd70] sm:$0xff]  ;;  %v3421_v38 = vld [vmem:[%s8359_s1 + $0xd78] sm:$0xff] }
 0x102   : > { %1366 = vmatpush.msrb.mxu0 %v3382_v40  ;;  %1386 = vmatpush.msrb.mxu1 %v3526_v41  ;;  %v3564_v37 = vld [vmem:[%s8359_s1 + $0x11f0] sm:$0xff]  ;;  %v3565_v39 = vld [vmem:[%s8359_s1 + $0x11f8] sm:$0xff]  ;;  %v3411_v40 = vld [vmem:[%s8359_s1 + $0xd28] sm:$0xff] }
 0x103   : > { %1406 = vmatpush.msrb.mxu2 %v3383_v42  ;;  %1426 = vmatpush.msrb.mxu3 %v3527_v43  ;;  %v3555_v41 = vld [vmem:[%s8359_s1 + $0x11a8] sm:$0xff]  ;;  %v3412_v42 = vld [vmem:[%s8359_s1 + $0xd30] sm:$0xff] }
 0x104   : > { %1367 = vmatpush.msrb.mxu0 %v3373_v44  ;;  %1387 = vmatpush.msrb.mxu1 %v3517_v45  ;;  %v3556_v43 = vld [vmem:[%s8359_s1 + $0x11b0] sm:$0xff]  ;;  %v3402_v44 = vld [vmem:[%s8359_s1 + $0xce0] sm:$0xff] }
 0x105   : > { %1407 = vmatpush.msrb.mxu2 %v3374_v46  ;;  %1427 = vmatpush.msrb.mxu3 %v3518_v47  ;;  %v3546_v45 = vld [vmem:[%s8359_s1 + $0x1160] sm:$0xff]  ;;  %v3403_v46 = vld [vmem:[%s8359_s1 + $0xce8] sm:$0xff] }
 0x106   : > { %1368 = vmatpush.msrb.mxu0 %v3364_v48  ;;  %1388 = vmatpush.msrb.mxu1 %v3508_v49  ;;  %v3547_v47 = vld [vmem:[%s8359_s1 + $0x1168] sm:$0xff]  ;;  %v3393_v48 = vld [vmem:[%s8359_s1 + $0xc98] sm:$0xff] }
 0x107   : > { %1408 = vmatpush.msrb.mxu2 %v3365_v50  ;;  %1428 = vmatpush.msrb.mxu3 %v3509_v51  ;;  %v3537_v49 = vld [vmem:[%s8359_s1 + $0x1118] sm:$0xff]  ;;  %v3394_v50 = vld [vmem:[%s8359_s1 + $0xca0] sm:$0xff] }
 0x108   : > { %1369 = vmatpush.msrb.mxu0 %v3355_v52  ;;  %1389 = vmatpush.msrb.mxu1 %v3499_v53  ;;  %v3538_v51 = vld [vmem:[%s8359_s1 + $0x1120] sm:$0xff]  ;;  %v3384_v52 = vld [vmem:[%s8359_s1 + $0xc50] sm:$0xff] }
 0x109   : > { %1409 = vmatpush.msrb.mxu2 %v3356_v54  ;;  %1429 = vmatpush.msrb.mxu3 %v3500_v55  ;;  %v3528_v53 = vld [vmem:[%s8359_s1 + $0x10d0] sm:$0xff]  ;;  %v3385_v54 = vld [vmem:[%s8359_s1 + $0xc58] sm:$0xff] }
 0x10a   : > { %1370 = vmatpush.msrb.mxu0 %v3346_v57  ;;  %1390 = vmatpush.msrb.mxu1 %v3490_v58  ;;  %v3529_v55 = vld [vmem:[%s8359_s1 + $0x10d8] sm:$0xff]  ;;  %v3375_v57 = vld [vmem:[%s8359_s1 + $0xc08] sm:$0xff] }
 0x10b   : > { %1410 = vmatpush.msrb.mxu2 %v3347_v59  ;;  %1430 = vmatpush.msrb.mxu3 %v3491_v60  ;;  %v3519_v58 = vld [vmem:[%s8359_s1 + $0x1088] sm:$0xff]  ;;  %v3376_v59 = vld [vmem:[%s8359_s1 + $0xc10] sm:$0xff] }
 0x10c   : > { %1371 = vmatpush.msrb.mxu0 %v3337_v63  ;;  %1391 = vmatpush.msrb.mxu1 %v3481_v2  ;;  %v3520_v60 = vld [vmem:[%s8359_s1 + $0x1090] sm:$0xff]  ;;  %v3366_v63 = vld [vmem:[%s8359_s1 + $0xbc0] sm:$0xff] }
 0x10d   : > { %1411 = vmatpush.msrb.mxu2 %v3338_v3  ;;  %1431 = vmatpush.msrb.mxu3 %v3482_v4  ;;  %v690_v12 = vpop.f32.mrf.mxu0  ;;  %v710_v14 = vpop.f32.mrf.mxu1  ;;  %v3510_v2 = vld [vmem:[%s8359_s1 + $0x1040] sm:$0xff]  ;;  %v3367_v3 = vld [vmem:[%s8359_s1 + $0xbc8] sm:$0xff] }
 0x10e   : > { %1372 = vmatpush.msrb.mxu0 %v3328_v6  ;;  %1392 = vmatpush.msrb.mxu1 %v3472_v7  ;;  %v5763_v15 = vadd.f32 %v710_v14, %v690_v12  ;;  %v3511_v4 = vld [vmem:[%s8359_s1 + $0x1048] sm:$0xff]  ;;  %v3357_v6 = vld [vmem:[%s8359_s1 + $0xb78] sm:$0xff] }
 0x10f   : > { %1412 = vmatpush.msrb.mxu2 %v3329_v8  ;;  %1432 = vmatpush.msrb.mxu3 %v3473_v9  ;;  %v3501_v7 = vld [vmem:[%s8359_s1 + $0xff8] sm:$0xff]  ;;  %v3358_v8 = vld [vmem:[%s8359_s1 + $0xb80] sm:$0xff] }
 0x110   : > { %1373 = vmatpush.msrb.mxu0 %v3319_v10  ;;  %1393 = vmatpush.msrb.mxu1 %v3463_v11  ;;  %v3502_v9 = vld [vmem:[%s8359_s1 + $0x1000] sm:$0xff]  ;;  %v3348_v10 = vld [vmem:[%s8359_s1 + $0xb30] sm:$0xff]  ;;  %v3349_v12 = vld [vmem:[%s8359_s1 + $0xb38] sm:$0xff] }
 0x111   : > { %1413 = vmatpush.msrb.mxu2 %v3320_v0  ;;  %1433 = vmatpush.msrb.mxu3 %v3464_v1  ;;  %v3492_v11 = vld [vmem:[%s8359_s1 + $0xfb0] sm:$0xff]  ;;  %v3493_v14 = vld [vmem:[%s8359_s1 + $0xfb8] sm:$0xff]  ;;  %v3339_v0 = vld [vmem:[%s8359_s1 + $0xae8] sm:$0xff] }
 0x112   : > { %1374 = vmatpush.msrb.mxu0 %v3310_v16  ;;  %1394 = vmatpush.msrb.mxu1 %v3454_v17  ;;  %v3483_v1 = vld [vmem:[%s8359_s1 + $0xf68] sm:$0xff]  ;;  %v3340_v16 = vld [vmem:[%s8359_s1 + $0xaf0] sm:$0xff] }
 0x113   : > { %1414 = vmatpush.msrb.mxu2 %v3311_v18  ;;  %1434 = vmatpush.msrb.mxu3 %v3455_v19  ;;  %v3484_v17 = vld [vmem:[%s8359_s1 + $0xf70] sm:$0xff]  ;;  %v3330_v18 = vld [vmem:[%s8359_s1 + $0xaa0] sm:$0xff] }
 0x114   : > { %1375 = vmatpush.msrb.mxu0 %v3301_v20  ;;  %1395 = vmatpush.msrb.mxu1 %v3445_v22  ;;  %v730_v29 = vpop.f32.mrf.mxu2  ;;  %v750_v30 = vpop.f32.mrf.mxu3  ;;  %v3474_v19 = vld [vmem:[%s8359_s1 + $0xf20] sm:$0xff] }
 0x115   : > { %1415 = vmatpush.msrb.mxu2 %v3302_v23  ;;  %1435 = vmatpush.msrb.mxu3 %v3446_v24  ;;  %v5807_v33 = vadd.f32 %v750_v30, %v730_v29  ;;  %v3331_v23 = vld [vmem:[%s8359_s1 + $0xaa8] sm:$0xff]  ;;  %v3466_v29 = vld [vmem:[%s8359_s1 + $0xee0] sm:$0xff] }
 0x116   : > { %1376 = vmatpush.msrb.mxu0 %v3292_v25  ;;  %1396 = vmatpush.msrb.mxu1 %v3436_v26  ;;  %v3475_v24 = vld [vmem:[%s8359_s1 + $0xf28] sm:$0xff]  ;;  %v3321_v26 = vld [vmem:[%s8359_s1 + $0xa58] sm:$0xff] }
 0x117   : > { %1416 = vmatpush.msrb.mxu2 %v3293_v27  ;;  %1436 = vmatpush.msrb.mxu3 %v3437_v28  ;;  %v3465_v27 = vld [vmem:[%s8359_s1 + $0xed8] sm:$0xff]  ;;  %v3322_v28 = vld [vmem:[%s8359_s1 + $0xa60] sm:$0xff] }
 0x118   : > { %1377 = vmatpush.msrb.mxu0 %v3283_v31  ;;  %1397 = vmatpush.msrb.mxu1 %v3427_v32  ;;  %v3312_v32 = vld [vmem:[%s8359_s1 + $0xa10] sm:$0xff] }
 0x119   : > { %1417 = vmatpush.msrb.mxu2 %v3284_v34  ;;  %1437 = vmatpush.msrb.mxu3 %v3428_v35  ;;  %v3456_v34 = vld [vmem:[%s8359_s1 + $0xe90] sm:$0xff] }
 0x11a   : > { %1378 = vmatmul.f32.vlgmr.msrb.gmra.mxu0 %v5370_v61  ;;  %1398 = vmatmul.f32.vlgmr.msrb.gmra.mxu1 %v5374_v62 }
 0x11b   : > { %1418 = vmatmul.f32.vlgmr.msrb.gmra.mxu2 %v5370_v61  ;;  %1438 = vmatmul.f32.vlgmr.msrb.gmra.mxu3 %v5374_v62 }
 0x11c   : > { %1442 = vmatpush.msra.mxu0 %v3420_v36  ;;  %1462 = vmatpush.msra.mxu1 %v3564_v37  ;;  %v3313_v36 = vld [vmem:[%s8359_s1 + $0xa18] sm:$0xff] }
 0x11d   : > { %1482 = vmatpush.msra.mxu2 %v3421_v38  ;;  %1502 = vmatpush.msra.mxu3 %v3565_v39  ;;  %v3457_v37 = vld [vmem:[%s8359_s1 + $0xe98] sm:$0xff]  ;;  %v3303_v38 = vld [vmem:[%s8359_s1 + $0x9c8] sm:$0xff] }
 0x11e   : > { %1443 = vmatpush.msra.mxu0 %v3411_v40  ;;  %1463 = vmatpush.msra.mxu1 %v3555_v41  ;;  %v3447_v39 = vld [vmem:[%s8359_s1 + $0xe48] sm:$0xff]  ;;  %v3304_v40 = vld [vmem:[%s8359_s1 + $0x9d0] sm:$0xff] }
 0x11f   : > { %1483 = vmatpush.msra.mxu2 %v3412_v42  ;;  %1503 = vmatpush.msra.mxu3 %v3556_v43  ;;  %v3448_v41 = vld [vmem:[%s8359_s1 + $0xe50] sm:$0xff]  ;;  %v3294_v42 = vld [vmem:[%s8359_s1 + $0x980] sm:$0xff] }
 0x120   : > { %1444 = vmatpush.msra.mxu0 %v3402_v44  ;;  %1464 = vmatpush.msra.mxu1 %v3546_v45  ;;  %v3438_v43 = vld [vmem:[%s8359_s1 + $0xe00] sm:$0xff]  ;;  %v3295_v44 = vld [vmem:[%s8359_s1 + $0x988] sm:$0xff] }
 0x121   : > { %1484 = vmatpush.msra.mxu2 %v3403_v46  ;;  %1504 = vmatpush.msra.mxu3 %v3547_v47  ;;  %v3439_v45 = vld [vmem:[%s8359_s1 + $0xe08] sm:$0xff]  ;;  %v3285_v46 = vld [vmem:[%s8359_s1 + $0x938] sm:$0xff] }
 0x122   : > { %1445 = vmatpush.msra.mxu0 %v3393_v48  ;;  %1465 = vmatpush.msra.mxu1 %v3537_v49  ;;  %v3429_v47 = vld [vmem:[%s8359_s1 + $0xdb8] sm:$0xff] }
 0x123   : > { %1485 = vmatpush.msra.mxu2 %v3394_v50  ;;  %1505 = vmatpush.msra.mxu3 %v3538_v51  ;;  %v3286_v50 = vld [vmem:[%s8359_s1 + $0x940] sm:$0xff] }
 0x124   : > { %1446 = vmatpush.msra.mxu0 %v3384_v52  ;;  %1466 = vmatpush.msra.mxu1 %v3528_v53  ;;  %v3430_v51 = vld [vmem:[%s8359_s1 + $0xdc0] sm:$0xff] }
 0x125   : > { %1486 = vmatpush.msra.mxu2 %v3385_v54  ;;  %1506 = vmatpush.msra.mxu3 %v3529_v55  ;;  %v3701_v54 = vld [vmem:[%s8359_s1 + $0x1638] sm:$0xff] }
 0x126   : > { %1447 = vmatpush.msra.mxu0 %v3375_v57  ;;  %1467 = vmatpush.msra.mxu1 %v3519_v58  ;;  %v3845_v55 = vld [vmem:[%s8359_s1 + $0x1ab8] sm:$0xff]  ;;  %v3702_v57 = vld [vmem:[%s8359_s1 + $0x1640] sm:$0xff] }
 0x127   : > { %1487 = vmatpush.msra.mxu2 %v3376_v59  ;;  %1507 = vmatpush.msra.mxu3 %v3520_v60  ;;  %v3846_v58 = vld [vmem:[%s8359_s1 + $0x1ac0] sm:$0xff]  ;;  %v3692_v59 = vld [vmem:[%s8359_s1 + $0x15f0] sm:$0xff] }
 0x128   : > { %1448 = vmatpush.msra.mxu0 %v3366_v63  ;;  %1468 = vmatpush.msra.mxu1 %v3510_v2  ;;  %v3836_v60 = vld [vmem:[%s8359_s1 + $0x1a70] sm:$0xff]  ;;  %v3693_v63 = vld [vmem:[%s8359_s1 + $0x15f8] sm:$0xff]  ;;  %v3827_v2 = vld [vmem:[%s8359_s1 + $0x1a28] sm:$0xff] }
 0x129   : > { %1488 = vmatpush.msra.mxu2 %v3367_v3  ;;  %1508 = vmatpush.msra.mxu3 %v3511_v4  ;;  %v3684_v3 = vld [vmem:[%s8359_s1 + $0x15b0] sm:$0xff] }
 0x12a   : > { %1449 = vmatpush.msra.mxu0 %v3357_v6  ;;  %1469 = vmatpush.msra.mxu1 %v3501_v7  ;;  %v3828_v4 = vld [vmem:[%s8359_s1 + $0x1a30] sm:$0xff]  ;;  %v3674_v6 = vld [vmem:[%s8359_s1 + $0x1560] sm:$0xff] }
 0x12b   : > { %1489 = vmatpush.msra.mxu2 %v3358_v8  ;;  %1509 = vmatpush.msra.mxu3 %v3502_v9  ;;  %v3818_v7 = vld [vmem:[%s8359_s1 + $0x19e0] sm:$0xff]  ;;  %v3675_v8 = vld [vmem:[%s8359_s1 + $0x1568] sm:$0xff] }
 0x12c   : > { %1450 = vmatpush.msra.mxu0 %v3348_v10  ;;  %1470 = vmatpush.msra.mxu1 %v3492_v11  ;;  %v3819_v9 = vld [vmem:[%s8359_s1 + $0x19e8] sm:$0xff]  ;;  %v3665_v10 = vld [vmem:[%s8359_s1 + $0x1518] sm:$0xff] }
 0x12d   : > { %1490 = vmatpush.msra.mxu2 %v3349_v12  ;;  %1510 = vmatpush.msra.mxu3 %v3493_v14  ;;  %v810_v20 = vpop.f32.mrf.mxu2  ;;  %v830_v22 = vpop.f32.mrf.mxu3  ;;  %v3809_v11 = vld [vmem:[%s8359_s1 + $0x1998] sm:$0xff]  ;;  %v3666_v12 = vld [vmem:[%s8359_s1 + $0x1520] sm:$0xff] }
 0x12e   : > { %1451 = vmatpush.msra.mxu0 %v3339_v0  ;;  %1471 = vmatpush.msra.mxu1 %v3483_v1  ;;  %v5951_v25 = vadd.f32 %v830_v22, %v810_v20  ;;  %v3810_v14 = vld [vmem:[%s8359_s1 + $0x19a0] sm:$0xff]  ;;  %v3656_v0 = vld [vmem:[%s8359_s1 + $0x14d0] sm:$0xff] }
 0x12f   : > { %1491 = vmatpush.msra.mxu2 %v3340_v16  ;;  %1511 = vmatpush.msra.mxu3 %v3484_v17  ;;  %v3800_v1 = vld [vmem:[%s8359_s1 + $0x1950] sm:$0xff]  ;;  %v3657_v16 = vld [vmem:[%s8359_s1 + $0x14d8] sm:$0xff] }
 0x130   : > { %1452 = vmatpush.msra.mxu0 %v3330_v18  ;;  %1472 = vmatpush.msra.mxu1 %v3474_v19  ;;  %v770_v30 = vpop.f32.mrf.mxu0  ;;  %v790_v31 = vpop.f32.mrf.mxu1  ;;  %v3801_v17 = vld [vmem:[%s8359_s1 + $0x1958] sm:$0xff]  ;;  %v3647_v18 = vld [vmem:[%s8359_s1 + $0x1488] sm:$0xff]  ;;  %v3648_v20 = vld [vmem:[%s8359_s1 + $0x1490] sm:$0xff] }
 0x131   : > { %1492 = vmatpush.msra.mxu2 %v3331_v23  ;;  %1512 = vmatpush.msra.mxu3 %v3475_v24  ;;  %v5971_v35 = vadd.f32 %v790_v31, %v770_v30  ;;  %v3791_v19 = vld [vmem:[%s8359_s1 + $0x1908] sm:$0xff]  ;;  %v3792_v22 = vld [vmem:[%s8359_s1 + $0x1910] sm:$0xff]  ;;  %v3638_v23 = vld [vmem:[%s8359_s1 + $0x1440] sm:$0xff] }
 0x132   : > { %1453 = vmatpush.msra.mxu0 %v3321_v26  ;;  %1473 = vmatpush.msra.mxu1 %v3465_v27  ;;  %v3782_v24 = vld [vmem:[%s8359_s1 + $0x18c0] sm:$0xff]  ;;  %v3639_v26 = vld [vmem:[%s8359_s1 + $0x1448] sm:$0xff]  ;;  %v3629_v30 = vld [vmem:[%s8359_s1 + $0x13f8] sm:$0xff] }
 0x133   : > { %1493 = vmatpush.msra.mxu2 %v3322_v28  ;;  %1513 = vmatpush.msra.mxu3 %v3466_v29  ;;  %v3783_v27 = vld [vmem:[%s8359_s1 + $0x18c8] sm:$0xff]  ;;  %v3773_v31 = vld [vmem:[%s8359_s1 + $0x1878] sm:$0xff] }
 0x134   : > { %1454 = vmatpush.msra.mxu0 %v3312_v32  ;;  %1474 = vmatpush.msra.mxu1 %v3456_v34  ;;  %v3630_v34 = vld [vmem:[%s8359_s1 + $0x1400] sm:$0xff] }
 0x135   : > { %1494 = vmatpush.msra.mxu2 %v3313_v36  ;;  %1514 = vmatpush.msra.mxu3 %v3457_v37  ;;  %v3774_v36 = vld [vmem:[%s8359_s1 + $0x1880] sm:$0xff]  ;;  %v3620_v37 = vld [vmem:[%s8359_s1 + $0x13b0] sm:$0xff] }
 0x136   : > { %1455 = vmatpush.msra.mxu0 %v3303_v38  ;;  %1475 = vmatpush.msra.mxu1 %v3447_v39  ;;  %v3764_v38 = vld [vmem:[%s8359_s1 + $0x1830] sm:$0xff]  ;;  %v3621_v39 = vld [vmem:[%s8359_s1 + $0x13b8] sm:$0xff] }
 0x137   : > { %1495 = vmatpush.msra.mxu2 %v3304_v40  ;;  %1515 = vmatpush.msra.mxu3 %v3448_v41  ;;  %v1179_v48 = vpop.f32.mrf.mxu2  ;;  %v1199_v49 = vpop.f32.mrf.mxu3  ;;  %v3765_v40 = vld [vmem:[%s8359_s1 + $0x1838] sm:$0xff]  ;;  %v3611_v41 = vld [vmem:[%s8359_s1 + $0x1368] sm:$0xff] }
 0x138   : > { %1456 = vmatpush.msra.mxu0 %v3294_v42  ;;  %1476 = vmatpush.msra.mxu1 %v3438_v43  ;;  %v6015_v52 = vadd.f32 %v1199_v49, %v1179_v48  ;;  %v3755_v42 = vld [vmem:[%s8359_s1 + $0x17e8] sm:$0xff]  ;;  %v3612_v43 = vld [vmem:[%s8359_s1 + $0x1370] sm:$0xff]  ;;  %v3593_v49 = vld [vmem:[%s8359_s1 + $0x12d8] sm:$0xff] }
 0x139   : > { %1496 = vmatpush.msra.mxu2 %v3295_v44  ;;  %1516 = vmatpush.msra.mxu3 %v3439_v45  ;;  %v3756_v44 = vld [vmem:[%s8359_s1 + $0x17f0] sm:$0xff]  ;;  %v3602_v45 = vld [vmem:[%s8359_s1 + $0x1320] sm:$0xff]  ;;  %v3747_v48 = vld [vmem:[%s8359_s1 + $0x17a8] sm:$0xff] }
 0x13a   : > { %1457 = vmatpush.msra.mxu0 %v3285_v46  ;;  %1477 = vmatpush.msra.mxu1 %v3429_v47  ;;  %v1522_v53 = vmax.f32 %v5355_v56, %v6015_v52  ;;  %v3746_v46 = vld [vmem:[%s8359_s1 + $0x17a0] sm:$0xff]  ;;  %v3603_v47 = vld [vmem:[%s8359_s1 + $0x1328] sm:$0xff]  ;;  %v2941_v56 = vld [vmem:[%s8361_s3 + $0x1b0] sm:$0xff] }
 0x13b   : > { %1497 = vmatpush.msra.mxu2 %v3286_v50  ;;  %1517 = vmatpush.msra.mxu3 %v3430_v51  ;;  %v3737_v50 = vld [vmem:[%s8359_s1 + $0x1758] sm:$0xff] }
 0x13c   : > { %1458 = vmatmul.f32.vlgmr.msra.gmra.mxu0 %v5370_v61  ;;  %1478 = vmatmul.f32.vlgmr.msra.gmra.mxu1 %v5374_v62 }
 0x13d   : > { %1498 = vmatmul.f32.vlgmr.msra.gmra.mxu2 %v5370_v61  ;;  %1518 = vmatmul.f32.vlgmr.msra.gmra.mxu3 %v5374_v62  ;;  %v3837_v61 = vld [vmem:[%s8359_s1 + $0x1a78] sm:$0xff]  ;;  %v3683_v62 = vld [vmem:[%s8359_s1 + $0x15a8] sm:$0xff] }
 0x13e   : > { %1820 = vmatpush.msrb.mxu0 %v3701_v54  ;;  %1840 = vmatpush.msrb.mxu1 %v3845_v55  ;;  %v3594_v55 = vld [vmem:[%s8359_s1 + $0x12e0] sm:$0xff] }
 0x13f   : > { %1860 = vmatpush.msrb.mxu2 %v3702_v57  ;;  %1880 = vmatpush.msrb.mxu3 %v3846_v58  ;;  %v3738_v57 = vld [vmem:[%s8359_s1 + $0x1760] sm:$0xff] }
 0x140   : > { %1821 = vmatpush.msrb.mxu0 %v3692_v59  ;;  %1841 = vmatpush.msrb.mxu1 %v3836_v60  ;;  %v3584_v59 = vld [vmem:[%s8359_s1 + $0x1290] sm:$0xff] }
 0x141   : > { %1861 = vmatpush.msrb.mxu2 %v3693_v63  ;;  %1881 = vmatpush.msrb.mxu3 %v3837_v61  ;;  %v3728_v60 = vld [vmem:[%s8359_s1 + $0x1710] sm:$0xff]  ;;  %v3585_v63 = vld [vmem:[%s8359_s1 + $0x1298] sm:$0xff] }
 0x142   : > { %1822 = vmatpush.msrb.mxu0 %v3683_v62  ;;  %1842 = vmatpush.msrb.mxu1 %v3827_v2  ;;  %v3729_v61 = vld [vmem:[%s8359_s1 + $0x1718] sm:$0xff]  ;;  %v3575_v2 = vld [vmem:[%s8359_s1 + $0x1248] sm:$0xff] }
 0x143   : > { %1862 = vmatpush.msrb.mxu2 %v3684_v3  ;;  %1882 = vmatpush.msrb.mxu3 %v3828_v4  ;;  %v3719_v3 = vld [vmem:[%s8359_s1 + $0x16c8] sm:$0xff]  ;;  %v3576_v4 = vld [vmem:[%s8359_s1 + $0x1250] sm:$0xff] }
 0x144   : > { %1823 = vmatpush.msrb.mxu0 %v3674_v6  ;;  %1843 = vmatpush.msrb.mxu1 %v3818_v7  ;;  %v3720_v6 = vld [vmem:[%s8359_s1 + $0x16d0] sm:$0xff]  ;;  %v3566_v7 = vld [vmem:[%s8359_s1 + $0x1200] sm:$0xff] }
 0x145   : > { %1863 = vmatpush.msrb.mxu2 %v3675_v8  ;;  %1883 = vmatpush.msrb.mxu3 %v3819_v9  ;;  %v3710_v8 = vld [vmem:[%s8359_s1 + $0x1680] sm:$0xff]  ;;  %v3567_v9 = vld [vmem:[%s8359_s1 + $0x1208] sm:$0xff] }
 0x146   : > { %1824 = vmatpush.msrb.mxu0 %v3665_v10  ;;  %1844 = vmatpush.msrb.mxu1 %v3809_v11  ;;  %v3711_v10 = vld [vmem:[%s8359_s1 + $0x1688] sm:$0xff] }
 0x147   : > { %1864 = vmatpush.msrb.mxu2 %v3666_v12  ;;  %1884 = vmatpush.msrb.mxu3 %v3810_v14 }
 0x148   : > { %1825 = vmatpush.msrb.mxu0 %v3656_v0  ;;  %1845 = vmatpush.msrb.mxu1 %v3800_v1  ;;  %v3703_v0 = vld [vmem:[%s8359_s1 + $0x1648] sm:$0xff] }
 0x149   : > { %1865 = vmatpush.msrb.mxu2 %v3657_v16  ;;  %1885 = vmatpush.msrb.mxu3 %v3801_v17  ;;  %v3847_v1 = vld [vmem:[%s8359_s1 + $0x1ac8] sm:$0xff]  ;;  %v6232_v17 = vld [vmem:[%s4591_s13] sm:$0xff] }
 0x14a   : > { %1826 = vmatpush.msrb.mxu0 %v3647_v18  ;;  %1846 = vmatpush.msrb.mxu1 %v3791_v19  ;;  %v850_v28 = vpop.f32.mrf.mxu0  ;;  %v870_v29 = vpop.f32.mrf.mxu1  ;;  %v6236_v18 = vld [vmem:[%s4591_s13 + $0x8] sm:$0xff]  ;;  %v3704_v19 = vld [vmem:[%s8359_s1 + $0x1650] sm:$0xff] }
 0x14b   : > { %1866 = vmatpush.msrb.mxu2 %v3648_v20  ;;  %1886 = vmatpush.msrb.mxu3 %v3792_v22  ;;  %v6125_v32 = vadd.f32 %v870_v29, %v850_v28  ;;  %v3848_v20 = vld [vmem:[%s8359_s1 + $0x1ad0] sm:$0xff]  ;;  %v3694_v22 = vld [vmem:[%s8359_s1 + $0x1600] sm:$0xff]  ;;  %v3829_v28 = vld [vmem:[%s8359_s1 + $0x1a38] sm:$0xff] }
 0x14c   : > { %1827 = vmatpush.msrb.mxu0 %v3638_v23  ;;  %1847 = vmatpush.msrb.mxu1 %v3782_v24  ;;  %v3838_v23 = vld [vmem:[%s8359_s1 + $0x1a80] sm:$0xff]  ;;  %v3695_v24 = vld [vmem:[%s8359_s1 + $0x1608] sm:$0xff] }
 0x14d   : > { %1867 = vmatpush.msrb.mxu2 %v3639_v26  ;;  %1887 = vmatpush.msrb.mxu3 %v3783_v27  ;;  %v3839_v26 = vld [vmem:[%s8359_s1 + $0x1a88] sm:$0xff]  ;;  %v3685_v27 = vld [vmem:[%s8359_s1 + $0x15b8] sm:$0xff]  ;;  %v3686_v29 = vld [vmem:[%s8359_s1 + $0x15c0] sm:$0xff] }
 0x14e   : > { %1828 = vmatpush.msrb.mxu0 %v3629_v30  ;;  %1848 = vmatpush.msrb.mxu1 %v3773_v31  ;;  %v3830_v30 = vld [vmem:[%s8359_s1 + $0x1a40] sm:$0xff]  ;;  %v3676_v31 = vld [vmem:[%s8359_s1 + $0x1570] sm:$0xff] }
 0x14f   : > { %1868 = vmatpush.msrb.mxu2 %v3630_v34  ;;  %1888 = vmatpush.msrb.mxu3 %v3774_v36  ;;  %v3820_v34 = vld [vmem:[%s8359_s1 + $0x19f0] sm:$0xff]  ;;  %v3677_v36 = vld [vmem:[%s8359_s1 + $0x1578] sm:$0xff] }
 0x150   : > { %1829 = vmatpush.msrb.mxu0 %v3620_v37  ;;  %1849 = vmatpush.msrb.mxu1 %v3764_v38  ;;  %v3821_v37 = vld [vmem:[%s8359_s1 + $0x19f8] sm:$0xff]  ;;  %v3667_v38 = vld [vmem:[%s8359_s1 + $0x1528] sm:$0xff] }
 0x151   : > { %1869 = vmatpush.msrb.mxu2 %v3621_v39  ;;  %1889 = vmatpush.msrb.mxu3 %v3765_v40  ;;  %v3811_v39 = vld [vmem:[%s8359_s1 + $0x19a8] sm:$0xff]  ;;  %v3668_v40 = vld [vmem:[%s8359_s1 + $0x1530] sm:$0xff] }
 0x152   : > { %1830 = vmatpush.msrb.mxu0 %v3611_v41  ;;  %1850 = vmatpush.msrb.mxu1 %v3755_v42  ;;  %v3812_v41 = vld [vmem:[%s8359_s1 + $0x19b0] sm:$0xff]  ;;  %v3658_v42 = vld [vmem:[%s8359_s1 + $0x14e0] sm:$0xff] }
 0x153   : > { %1870 = vmatpush.msrb.mxu2 %v3612_v43  ;;  %1890 = vmatpush.msrb.mxu3 %v3756_v44  ;;  %v1219_v51 = vpop.f32.mrf.mxu0  ;;  %v1239_v54 = vpop.f32.mrf.mxu1  ;;  %v3802_v43 = vld [vmem:[%s8359_s1 + $0x1960] sm:$0xff]  ;;  %v3659_v44 = vld [vmem:[%s8359_s1 + $0x14e8] sm:$0xff] }
 0x154   : > { %1831 = vmatpush.msrb.mxu0 %v3602_v45  ;;  %1851 = vmatpush.msrb.mxu1 %v3746_v46  ;;  %v6181_v58 = vadd.f32 %v1239_v54, %v1219_v51  ;;  %v3803_v45 = vld [vmem:[%s8359_s1 + $0x1968] sm:$0xff]  ;;  %v3649_v46 = vld [vmem:[%s8359_s1 + $0x1498] sm:$0xff]  ;;  %v3784_v51 = vld [vmem:[%s8359_s1 + $0x18d0] sm:$0xff] }
 0x155   : > { %1871 = vmatpush.msrb.mxu2 %v3603_v47  ;;  %1891 = vmatpush.msrb.mxu3 %v3747_v48  ;;  %v3793_v47 = vld [vmem:[%s8359_s1 + $0x1918] sm:$0xff]  ;;  %v3650_v48 = vld [vmem:[%s8359_s1 + $0x14a0] sm:$0xff] }
 0x156   : > { %1832 = vmatpush.msrb.mxu0 %v3593_v49  ;;  %1852 = vmatpush.msrb.mxu1 %v3737_v50  ;;  %v1523_v62 = vmax.f32 %v5407_v13, %v6181_v58  ;;  %v3794_v49 = vld [vmem:[%s8359_s1 + $0x1920] sm:$0xff]  ;;  %v3640_v50 = vld [vmem:[%s8359_s1 + $0x1450] sm:$0xff]  ;;  %v3641_v54 = vld [vmem:[%s8359_s1 + $0x1458] sm:$0xff] }
 0x157   : > { %1872 = vmatpush.msrb.mxu2 %v3594_v55  ;;  %1892 = vmatpush.msrb.mxu3 %v3738_v57  ;;  %v3785_v55 = vld [vmem:[%s8359_s1 + $0x18d8] sm:$0xff]  ;;  %v3631_v57 = vld [vmem:[%s8359_s1 + $0x1408] sm:$0xff]  ;;  %v2905_v13 = vld [vmem:[%s8361_s3 + $0x90] sm:$0xff] }
 0x158   : > { %1833 = vmatpush.msrb.mxu0 %v3584_v59  ;;  %1853 = vmatpush.msrb.mxu1 %v3728_v60  ;;  %v3775_v59 = vld [vmem:[%s8359_s1 + $0x1888] sm:$0xff]  ;;  %v3632_v60 = vld [vmem:[%s8359_s1 + $0x1410] sm:$0xff] }
 0x159   : > { %1873 = vmatpush.msrb.mxu2 %v3585_v63  ;;  %1893 = vmatpush.msrb.mxu3 %v3729_v61  ;;  %v3776_v63 = vld [vmem:[%s8359_s1 + $0x1890] sm:$0xff]  ;;  %v3622_v61 = vld [vmem:[%s8359_s1 + $0x13c0] sm:$0xff] }
 0x15a   : > { %1834 = vmatpush.msrb.mxu0 %v3575_v2  ;;  %1854 = vmatpush.msrb.mxu1 %v3719_v3  ;;  %v1259_v11 = vpop.f32.mrf.mxu2  ;;  %v1279_v12 = vpop.f32.mrf.mxu3  ;;  %v3766_v2 = vld [vmem:[%s8359_s1 + $0x1840] sm:$0xff]  ;;  %v3623_v3 = vld [vmem:[%s8359_s1 + $0x13c8] sm:$0xff] }
 0x15b   : > { %1874 = vmatpush.msrb.mxu2 %v3576_v4  ;;  %1894 = vmatpush.msrb.mxu3 %v3720_v6  ;;  %v6221_v14 = vadd.f32 %v1279_v12, %v1259_v11  ;;  %v3767_v4 = vld [vmem:[%s8359_s1 + $0x1848] sm:$0xff]  ;;  %v3613_v6 = vld [vmem:[%s8359_s1 + $0x1378] sm:$0xff]  ;;  %v3748_v11 = vld [vmem:[%s8359_s1 + $0x17b0] sm:$0xff] }
 0x15c   : > { %1835 = vmatpush.msrb.mxu0 %v3566_v7  ;;  %1855 = vmatpush.msrb.mxu1 %v3710_v8  ;;  %v3757_v7 = vld [vmem:[%s8359_s1 + $0x17f8] sm:$0xff]  ;;  %v3614_v8 = vld [vmem:[%s8359_s1 + $0x1380] sm:$0xff] }
 0x15d   : > { %1875 = vmatpush.msrb.mxu2 %v3567_v9  ;;  %1895 = vmatpush.msrb.mxu3 %v3711_v10  ;;  %v1524_v16 = vmax.f32 %v5563_v5, %v6221_v14  ;;  %v3758_v9 = vld [vmem:[%s8359_s1 + $0x1800] sm:$0xff]  ;;  %v3604_v10 = vld [vmem:[%s8359_s1 + $0x1330] sm:$0xff]  ;;  %v3605_v12 = vld [vmem:[%s8359_s1 + $0x1338] sm:$0xff] }
 0x15e   : > { %1836 = vmatmul.f32.vlgmr.msrb.gmra.mxu0 %v6232_v17  ;;  %1856 = vmatmul.f32.vlgmr.msrb.gmra.mxu1 %v6236_v18  ;;  %v2939_v5 = vld [vmem:[%s8361_s3 + $0x1a0] sm:$0xff] }
 0x15f   : > { %1876 = vmatmul.f32.vlgmr.msrb.gmra.mxu2 %v6232_v17  ;;  %1896 = vmatmul.f32.vlgmr.msrb.gmra.mxu3 %v6236_v18 }
 0x160   : > { %1900 = vmatpush.msra.mxu0 %v3703_v0  ;;  %1920 = vmatpush.msra.mxu1 %v3847_v1  ;;  %v3749_v0 = vld [vmem:[%s8359_s1 + $0x17b8] sm:$0xff]  ;;  %v3595_v1 = vld [vmem:[%s8359_s1 + $0x12e8] sm:$0xff] }
 0x161   : > { %1940 = vmatpush.msra.mxu2 %v3704_v19  ;;  %1960 = vmatpush.msra.mxu3 %v3848_v20  ;;  %v3739_v19 = vld [vmem:[%s8359_s1 + $0x1768] sm:$0xff] }
 0x162   : > { %1901 = vmatpush.msra.mxu0 %v3694_v22  ;;  %1921 = vmatpush.msra.mxu1 %v3838_v23  ;;  %v3596_v23 = vld [vmem:[%s8359_s1 + $0x12f0] sm:$0xff] }
 0x163   : > { %1941 = vmatpush.msra.mxu2 %v3695_v24  ;;  %1961 = vmatpush.msra.mxu3 %v3839_v26  ;;  %v3740_v24 = vld [vmem:[%s8359_s1 + $0x1770] sm:$0xff] }
 0x164   : > { %1902 = vmatpush.msra.mxu0 %v3685_v27  ;;  %1922 = vmatpush.msra.mxu1 %v3829_v28  ;;  %v3586_v27 = vld [vmem:[%s8359_s1 + $0x12a0] sm:$0xff] }
 0x165   : > { %1942 = vmatpush.msra.mxu2 %v3686_v29  ;;  %1962 = vmatpush.msra.mxu3 %v3830_v30  ;;  %v3730_v28 = vld [vmem:[%s8359_s1 + $0x1720] sm:$0xff]  ;;  %v3587_v29 = vld [vmem:[%s8359_s1 + $0x12a8] sm:$0xff] }
 0x166   : > { %1903 = vmatpush.msra.mxu0 %v3676_v31  ;;  %1923 = vmatpush.msra.mxu1 %v3820_v34  ;;  %v3731_v30 = vld [vmem:[%s8359_s1 + $0x1728] sm:$0xff]  ;;  %v3577_v34 = vld [vmem:[%s8359_s1 + $0x1258] sm:$0xff] }
 0x167   : > { %1943 = vmatpush.msra.mxu2 %v3677_v36  ;;  %1963 = vmatpush.msra.mxu3 %v3821_v37  ;;  %v3721_v36 = vld [vmem:[%s8359_s1 + $0x16d8] sm:$0xff]  ;;  %v3578_v37 = vld [vmem:[%s8359_s1 + $0x1260] sm:$0xff] }
 0x168   : > { %1904 = vmatpush.msra.mxu0 %v3667_v38  ;;  %1924 = vmatpush.msra.mxu1 %v3811_v39  ;;  %v3722_v38 = vld [vmem:[%s8359_s1 + $0x16e0] sm:$0xff]  ;;  %v3568_v39 = vld [vmem:[%s8359_s1 + $0x1210] sm:$0xff] }
 0x169   : > { %1944 = vmatpush.msra.mxu2 %v3668_v40  ;;  %1964 = vmatpush.msra.mxu3 %v3812_v41  ;;  %v3712_v40 = vld [vmem:[%s8359_s1 + $0x1690] sm:$0xff]  ;;  %v3569_v41 = vld [vmem:[%s8359_s1 + $0x1218] sm:$0xff] }
 0x16a   : > { %1905 = vmatpush.msra.mxu0 %v3658_v42  ;;  %1925 = vmatpush.msra.mxu1 %v3802_v43  ;;  %v3713_v42 = vld [vmem:[%s8359_s1 + $0x1698] sm:$0xff] }
 0x16b   : > { %1945 = vmatpush.msra.mxu2 %v3659_v44  ;;  %1965 = vmatpush.msra.mxu3 %v3803_v45 }
 0x16c   : > { %1906 = vmatpush.msra.mxu0 %v3649_v46  ;;  %1926 = vmatpush.msra.mxu1 %v3793_v47  ;;  %v3705_v46 = vld [vmem:[%s8359_s1 + $0x1658] sm:$0xff] }
 0x16d   : > { %1946 = vmatpush.msra.mxu2 %v3650_v48  ;;  %1966 = vmatpush.msra.mxu3 %v3794_v49  ;;  %v3849_v47 = vld [vmem:[%s8359_s1 + $0x1ad8] sm:$0xff]  ;;  %v3706_v49 = vld [vmem:[%s8359_s1 + $0x1660] sm:$0xff] }
 0x16e   : > { %1907 = vmatpush.msra.mxu0 %v3640_v50  ;;  %1927 = vmatpush.msra.mxu1 %v3784_v51  ;;  %v3850_v50 = vld [vmem:[%s8359_s1 + $0x1ae0] sm:$0xff]  ;;  %v3696_v51 = vld [vmem:[%s8359_s1 + $0x1610] sm:$0xff] }
 0x16f   : > { %1947 = vmatpush.msra.mxu2 %v3641_v54  ;;  %1967 = vmatpush.msra.mxu3 %v3785_v55  ;;  %v3840_v54 = vld [vmem:[%s8359_s1 + $0x1a90] sm:$0xff]  ;;  %v3697_v55 = vld [vmem:[%s8359_s1 + $0x1618] sm:$0xff] }
 0x170   : > { %1908 = vmatpush.msra.mxu0 %v3631_v57  ;;  %1928 = vmatpush.msra.mxu1 %v3775_v59  ;;  %v3841_v57 = vld [vmem:[%s8359_s1 + $0x1a98] sm:$0xff]  ;;  %v3687_v59 = vld [vmem:[%s8359_s1 + $0x15c8] sm:$0xff] }
 0x171   : > { %1948 = vmatpush.msra.mxu2 %v3632_v60  ;;  %1968 = vmatpush.msra.mxu3 %v3776_v63  ;;  %v3831_v60 = vld [vmem:[%s8359_s1 + $0x1a48] sm:$0xff]  ;;  %v3688_v63 = vld [vmem:[%s8359_s1 + $0x15d0] sm:$0xff] }
 0x172   : > { %1909 = vmatpush.msra.mxu0 %v3622_v61  ;;  %1929 = vmatpush.msra.mxu1 %v3766_v2  ;;  %v3832_v61 = vld [vmem:[%s8359_s1 + $0x1a50] sm:$0xff]  ;;  %v3678_v2 = vld [vmem:[%s8359_s1 + $0x1580] sm:$0xff] }
 0x173   : > { %1949 = vmatpush.msra.mxu2 %v3623_v3  ;;  %1969 = vmatpush.msra.mxu3 %v3767_v4  ;;  %v3822_v3 = vld [vmem:[%s8359_s1 + $0x1a00] sm:$0xff]  ;;  %v3679_v4 = vld [vmem:[%s8359_s1 + $0x1588] sm:$0xff] }
 0x174   : > { %1910 = vmatpush.msra.mxu0 %v3613_v6  ;;  %1930 = vmatpush.msra.mxu1 %v3757_v7  ;;  %v3823_v6 = vld [vmem:[%s8359_s1 + $0x1a08] sm:$0xff]  ;;  %v3669_v7 = vld [vmem:[%s8359_s1 + $0x1538] sm:$0xff] }
 0x175   : > { %1950 = vmatpush.msra.mxu2 %v3614_v8  ;;  %1970 = vmatpush.msra.mxu3 %v3758_v9  ;;  %v1299_v20 = vpop.f32.mrf.mxu0  ;;  %v1319_v22 = vpop.f32.mrf.mxu1  ;;  %v3813_v8 = vld [vmem:[%s8359_s1 + $0x19b8] sm:$0xff]  ;;  %v3670_v9 = vld [vmem:[%s8359_s1 + $0x1540] sm:$0xff] }
 0x176   : > { %1911 = vmatpush.msra.mxu0 %v3604_v10  ;;  %1931 = vmatpush.msra.mxu1 %v3748_v11  ;;  %v6391_v26 = vadd.f32 %v1319_v22, %v1299_v20  ;;  %v3814_v10 = vld [vmem:[%s8359_s1 + $0x19c0] sm:$0xff]  ;;  %v3660_v11 = vld [vmem:[%s8359_s1 + $0x14f0] sm:$0xff]  ;;  %v3795_v20 = vld [vmem:[%s8359_s1 + $0x1928] sm:$0xff] }
 0x177   : > { %1951 = vmatpush.msra.mxu2 %v3605_v12  ;;  %1971 = vmatpush.msra.mxu3 %v3749_v0  ;;  %v3804_v12 = vld [vmem:[%s8359_s1 + $0x1970] sm:$0xff]  ;;  %v3661_v0 = vld [vmem:[%s8359_s1 + $0x14f8] sm:$0xff] }
 0x178   : > { %1912 = vmatpush.msra.mxu0 %v3595_v1  ;;  %1932 = vmatpush.msra.mxu1 %v3739_v19  ;;  %v1525_v31 = vmax.f32 %v5607_v21, %v6391_v26  ;;  %v3805_v1 = vld [vmem:[%s8359_s1 + $0x1978] sm:$0xff]  ;;  %v3651_v19 = vld [vmem:[%s8359_s1 + $0x14a8] sm:$0xff]  ;;  %v3652_v22 = vld [vmem:[%s8359_s1 + $0x14b0] sm:$0xff] }
 0x179   : > { %1952 = vmatpush.msra.mxu2 %v3596_v23  ;;  %1972 = vmatpush.msra.mxu3 %v3740_v24  ;;  %v3796_v23 = vld [vmem:[%s8359_s1 + $0x1930] sm:$0xff]  ;;  %v3642_v24 = vld [vmem:[%s8359_s1 + $0x1460] sm:$0xff] }
 0x17a   : > { %1913 = vmatpush.msra.mxu0 %v3586_v27  ;;  %1933 = vmatpush.msra.mxu1 %v3730_v28  ;;  %v3786_v27 = vld [vmem:[%s8359_s1 + $0x18e0] sm:$0xff]  ;;  %v3643_v28 = vld [vmem:[%s8359_s1 + $0x1468] sm:$0xff] }
 0x17b   : > { %1953 = vmatpush.msra.mxu2 %v3587_v29  ;;  %1973 = vmatpush.msra.mxu3 %v3731_v30  ;;  %v3787_v29 = vld [vmem:[%s8359_s1 + $0x18e8] sm:$0xff]  ;;  %v3633_v30 = vld [vmem:[%s8359_s1 + $0x1418] sm:$0xff]  ;;  %v2951_v21 = vld [vmem:[%s8361_s3 + $0x200] sm:$0xff] }
 0x17c   : > { %1914 = vmatpush.msra.mxu0 %v3577_v34  ;;  %1934 = vmatpush.msra.mxu1 %v3721_v36  ;;  %v1339_v43 = vpop.f32.mrf.mxu2  ;;  %v1359_v44 = vpop.f32.mrf.mxu3  ;;  %v3777_v34 = vld [vmem:[%s8359_s1 + $0x1898] sm:$0xff]  ;;  %v3634_v36 = vld [vmem:[%s8359_s1 + $0x1420] sm:$0xff] }
 0x17d   : > { %1954 = vmatpush.msra.mxu2 %v3578_v37  ;;  %1974 = vmatpush.msra.mxu3 %v3722_v38  ;;  %v6431_v45 = vadd.f32 %v1359_v44, %v1339_v43  ;;  %v3778_v37 = vld [vmem:[%s8359_s1 + $0x18a0] sm:$0xff]  ;;  %v3624_v38 = vld [vmem:[%s8359_s1 + $0x13d0] sm:$0xff]  ;;  %v3759_v43 = vld [vmem:[%s8359_s1 + $0x1808] sm:$0xff] }
 0x17e   : > { %1915 = vmatpush.msra.mxu0 %v3568_v39  ;;  %1935 = vmatpush.msra.mxu1 %v3712_v40  ;;  %v3768_v39 = vld [vmem:[%s8359_s1 + $0x1850] sm:$0xff]  ;;  %v3625_v40 = vld [vmem:[%s8359_s1 + $0x13d8] sm:$0xff] }
 0x17f   : > { %1955 = vmatpush.msra.mxu2 %v3569_v41  ;;  %1975 = vmatpush.msra.mxu3 %v3713_v42  ;;  %v1526_v48 = vmax.f32 %v5763_v15, %v6431_v45  ;;  %v3769_v41 = vld [vmem:[%s8359_s1 + $0x1858] sm:$0xff]  ;;  %v3615_v42 = vld [vmem:[%s8359_s1 + $0x1388] sm:$0xff]  ;;  %v3616_v44 = vld [vmem:[%s8359_s1 + $0x1390] sm:$0xff] }
 0x180   : > { %1916 = vmatmul.f32.vlgmr.msra.gmra.mxu0 %v6232_v17  ;;  %1936 = vmatmul.f32.vlgmr.msra.gmra.mxu1 %v6236_v18  ;;  %v2988_v15 = vld [vmem:[%s8361_s3 + $0x328] sm:$0xff] }
 0x181   : > { %1956 = vmatmul.f32.vlgmr.msra.gmra.mxu2 %v6232_v17  ;;  %1976 = vmatmul.f32.vlgmr.msra.gmra.mxu3 %v6236_v18 }
 0x182   : > { %1980 = vmatpush.msrb.mxu0 %v3705_v46  ;;  %2000 = vmatpush.msrb.mxu1 %v3849_v47  ;;  %v3760_v46 = vld [vmem:[%s8359_s1 + $0x1810] sm:$0xff]  ;;  %v3606_v47 = vld [vmem:[%s8359_s1 + $0x1340] sm:$0xff] }
 0x183   : > { %2020 = vmatpush.msrb.mxu2 %v3706_v49  ;;  %2040 = vmatpush.msrb.mxu3 %v3850_v50  ;;  %v3750_v49 = vld [vmem:[%s8359_s1 + $0x17c0] sm:$0xff]  ;;  %v3607_v50 = vld [vmem:[%s8359_s1 + $0x1348] sm:$0xff] }
 0x184   : > { %1981 = vmatpush.msrb.mxu0 %v3696_v51  ;;  %2001 = vmatpush.msrb.mxu1 %v3840_v54  ;;  %v3751_v51 = vld [vmem:[%s8359_s1 + $0x17c8] sm:$0xff]  ;;  %v3597_v54 = vld [vmem:[%s8359_s1 + $0x12f8] sm:$0xff] }
 0x185   : > { %2021 = vmatpush.msrb.mxu2 %v3697_v55  ;;  %2041 = vmatpush.msrb.mxu3 %v3841_v57  ;;  %v3741_v55 = vld [vmem:[%s8359_s1 + $0x1778] sm:$0xff] }
 0x186   : > { %1982 = vmatpush.msrb.mxu0 %v3687_v59  ;;  %2002 = vmatpush.msrb.mxu1 %v3831_v60  ;;  %v3598_v60 = vld [vmem:[%s8359_s1 + $0x1300] sm:$0xff] }
 0x187   : > { %2022 = vmatpush.msrb.mxu2 %v3688_v63  ;;  %2042 = vmatpush.msrb.mxu3 %v3832_v61  ;;  %v3742_v63 = vld [vmem:[%s8359_s1 + $0x1780] sm:$0xff] }
 0x188   : > { %1983 = vmatpush.msrb.mxu0 %v3678_v2  ;;  %2003 = vmatpush.msrb.mxu1 %v3822_v3  ;;  %v3588_v2 = vld [vmem:[%s8359_s1 + $0x12b0] sm:$0xff] }
 0x189   : > { %2023 = vmatpush.msrb.mxu2 %v3679_v4  ;;  %2043 = vmatpush.msrb.mxu3 %v3823_v6  ;;  %v3732_v3 = vld [vmem:[%s8359_s1 + $0x1730] sm:$0xff]  ;;  %v3589_v4 = vld [vmem:[%s8359_s1 + $0x12b8] sm:$0xff] }
 0x18a   : > { %1984 = vmatpush.msrb.mxu0 %v3669_v7  ;;  %2004 = vmatpush.msrb.mxu1 %v3813_v8  ;;  %v3733_v6 = vld [vmem:[%s8359_s1 + $0x1738] sm:$0xff]  ;;  %v3579_v8 = vld [vmem:[%s8359_s1 + $0x1268] sm:$0xff] }
 0x18b   : > { %2024 = vmatpush.msrb.mxu2 %v3670_v9  ;;  %2044 = vmatpush.msrb.mxu3 %v3814_v10  ;;  %v3723_v9 = vld [vmem:[%s8359_s1 + $0x16e8] sm:$0xff]  ;;  %v3580_v10 = vld [vmem:[%s8359_s1 + $0x1270] sm:$0xff] }
 0x18c   : > { %1985 = vmatpush.msrb.mxu0 %v3660_v11  ;;  %2005 = vmatpush.msrb.mxu1 %v3804_v12  ;;  %v3724_v11 = vld [vmem:[%s8359_s1 + $0x16f0] sm:$0xff]  ;;  %v3570_v12 = vld [vmem:[%s8359_s1 + $0x1220] sm:$0xff] }
 0x18d   : > { %2025 = vmatpush.msrb.mxu2 %v3661_v0  ;;  %2045 = vmatpush.msrb.mxu3 %v3805_v1  ;;  %v3714_v0 = vld [vmem:[%s8359_s1 + $0x16a0] sm:$0xff]  ;;  %v3571_v1 = vld [vmem:[%s8359_s1 + $0x1228] sm:$0xff] }
 0x18e   : > { %1986 = vmatpush.msrb.mxu0 %v3651_v19  ;;  %2006 = vmatpush.msrb.mxu1 %v3795_v20  ;;  %v3715_v19 = vld [vmem:[%s8359_s1 + $0x16a8] sm:$0xff] }
 0x18f   : > { %2026 = vmatpush.msrb.mxu2 %v3652_v22  ;;  %2046 = vmatpush.msrb.mxu3 %v3796_v23 }
 0x190   : > { %1987 = vmatpush.msrb.mxu0 %v3642_v24  ;;  %2007 = vmatpush.msrb.mxu1 %v3786_v27  ;;  %v3707_v24 = vld [vmem:[%s8359_s1 + $0x1668] sm:$0xff] }
 0x191   : > { %2027 = vmatpush.msrb.mxu2 %v3643_v28  ;;  %2047 = vmatpush.msrb.mxu3 %v3787_v29  ;;  %v3851_v27 = vld [vmem:[%s8359_s1 + $0x1ae8] sm:$0xff]  ;;  %v3708_v29 = vld [vmem:[%s8359_s1 + $0x1670] sm:$0xff] }
 0x192   : > { %1988 = vmatpush.msrb.mxu0 %v3633_v30  ;;  %2008 = vmatpush.msrb.mxu1 %v3777_v34  ;;  %v3852_v30 = vld [vmem:[%s8359_s1 + $0x1af0] sm:$0xff]  ;;  %v3698_v34 = vld [vmem:[%s8359_s1 + $0x1620] sm:$0xff] }
 0x193   : > { %2028 = vmatpush.msrb.mxu2 %v3634_v36  ;;  %2048 = vmatpush.msrb.mxu3 %v3778_v37  ;;  %v3842_v36 = vld [vmem:[%s8359_s1 + $0x1aa0] sm:$0xff]  ;;  %v3699_v37 = vld [vmem:[%s8359_s1 + $0x1628] sm:$0xff] }
 0x194   : > { %1989 = vmatpush.msrb.mxu0 %v3624_v38  ;;  %2009 = vmatpush.msrb.mxu1 %v3768_v39  ;;  %v3843_v38 = vld [vmem:[%s8359_s1 + $0x1aa8] sm:$0xff]  ;;  %v3689_v39 = vld [vmem:[%s8359_s1 + $0x15d8] sm:$0xff] }
 0x195   : > { %2029 = vmatpush.msrb.mxu2 %v3625_v40  ;;  %2049 = vmatpush.msrb.mxu3 %v3769_v41  ;;  %v3833_v40 = vld [vmem:[%s8359_s1 + $0x1a58] sm:$0xff]  ;;  %v3690_v41 = vld [vmem:[%s8359_s1 + $0x15e0] sm:$0xff] }
 0x196   : > { %1990 = vmatpush.msrb.mxu0 %v3615_v42  ;;  %2010 = vmatpush.msrb.mxu1 %v3759_v43  ;;  %v3834_v42 = vld [vmem:[%s8359_s1 + $0x1a60] sm:$0xff]  ;;  %v3680_v43 = vld [vmem:[%s8359_s1 + $0x1590] sm:$0xff] }
 0x197   : > { %2030 = vmatpush.msrb.mxu2 %v3616_v44  ;;  %2050 = vmatpush.msrb.mxu3 %v3760_v46  ;;  %v1379_v57 = vpop.f32.mrf.mxu0  ;;  %v1399_v59 = vpop.f32.mrf.mxu1  ;;  %v3824_v44 = vld [vmem:[%s8359_s1 + $0x1a10] sm:$0xff]  ;;  %v3681_v46 = vld [vmem:[%s8359_s1 + $0x1598] sm:$0xff] }
 0x198   : > { %1991 = vmatpush.msrb.mxu0 %v3606_v47  ;;  %2011 = vmatpush.msrb.mxu1 %v3750_v49  ;;  %v6595_v61 = vadd.f32 %v1399_v59, %v1379_v57  ;;  %v3825_v47 = vld [vmem:[%s8359_s1 + $0x1a18] sm:$0xff]  ;;  %v3671_v49 = vld [vmem:[%s8359_s1 + $0x1548] sm:$0xff]  ;;  %v3806_v57 = vld [vmem:[%s8359_s1 + $0x1980] sm:$0xff] }
 0x199   : > { %2031 = vmatpush.msrb.mxu2 %v3607_v50  ;;  %2051 = vmatpush.msrb.mxu3 %v3751_v51  ;;  %v3815_v50 = vld [vmem:[%s8359_s1 + $0x19c8] sm:$0xff]  ;;  %v3672_v51 = vld [vmem:[%s8359_s1 + $0x1550] sm:$0xff] }
 0x19a   : > { %1992 = vmatpush.msrb.mxu0 %v3597_v54  ;;  %2012 = vmatpush.msrb.mxu1 %v3741_v55  ;;  %v1527_v7 = vmax.f32 %v5807_v33, %v6595_v61  ;;  %v3816_v54 = vld [vmem:[%s8359_s1 + $0x19d0] sm:$0xff]  ;;  %v3662_v55 = vld [vmem:[%s8359_s1 + $0x1500] sm:$0xff]  ;;  %v3663_v59 = vld [vmem:[%s8359_s1 + $0x1508] sm:$0xff] }
 0x19b   : > { %2032 = vmatpush.msrb.mxu2 %v3598_v60  ;;  %2052 = vmatpush.msrb.mxu3 %v3742_v63  ;;  %v3807_v60 = vld [vmem:[%s8359_s1 + $0x1988] sm:$0xff]  ;;  %v3653_v63 = vld [vmem:[%s8359_s1 + $0x14b8] sm:$0xff] }
 0x19c   : > { %1993 = vmatpush.msrb.mxu0 %v3588_v2  ;;  %2013 = vmatpush.msrb.mxu1 %v3732_v3  ;;  %v3797_v2 = vld [vmem:[%s8359_s1 + $0x1938] sm:$0xff]  ;;  %v3654_v3 = vld [vmem:[%s8359_s1 + $0x14c0] sm:$0xff] }
 0x19d   : > { %2033 = vmatpush.msrb.mxu2 %v3589_v4  ;;  %2053 = vmatpush.msrb.mxu3 %v3733_v6  ;;  %v3798_v4 = vld [vmem:[%s8359_s1 + $0x1940] sm:$0xff]  ;;  %v3644_v6 = vld [vmem:[%s8359_s1 + $0x1470] sm:$0xff]  ;;  %v3985_v33 = vld [vmem:[%s8359_s1 + $0x1f18] sm:$0xff] }
 0x19e   : > { %1994 = vmatpush.msrb.mxu0 %v3579_v8  ;;  %2014 = vmatpush.msrb.mxu1 %v3723_v9  ;;  %v1419_v20 = vpop.f32.mrf.mxu2  ;;  %v1439_v22 = vpop.f32.mrf.mxu3  ;;  %v3788_v8 = vld [vmem:[%s8359_s1 + $0x18f0] sm:$0xff]  ;;  %v3645_v9 = vld [vmem:[%s8359_s1 + $0x1478] sm:$0xff] }
 0x19f   : > { %2034 = vmatpush.msrb.mxu2 %v3580_v10  ;;  %2054 = vmatpush.msrb.mxu3 %v3724_v11  ;;  %v6635_v23 = vadd.f32 %v1439_v22, %v1419_v20  ;;  %v3789_v10 = vld [vmem:[%s8359_s1 + $0x18f8] sm:$0xff]  ;;  %v3635_v11 = vld [vmem:[%s8359_s1 + $0x1428] sm:$0xff]  ;;  %v3770_v20 = vld [vmem:[%s8359_s1 + $0x1860] sm:$0xff] }
 0x1a0   : > { %1995 = vmatpush.msrb.mxu0 %v3570_v12  ;;  %2015 = vmatpush.msrb.mxu1 %v3714_v0  ;;  %v3779_v12 = vld [vmem:[%s8359_s1 + $0x18a8] sm:$0xff]  ;;  %v3636_v0 = vld [vmem:[%s8359_s1 + $0x1430] sm:$0xff]  ;;  %v4129_v61 = vld [vmem:[%s8359_s1 + $0x2398] sm:$0xff] }
 0x1a1   : > { %2035 = vmatpush.msrb.mxu2 %v3571_v1  ;;  %2055 = vmatpush.msrb.mxu3 %v3715_v19  ;;  %v1528_v28 = vmax.f32 %v5971_v35, %v6635_v23  ;;  %v3780_v1 = vld [vmem:[%s8359_s1 + $0x18b0] sm:$0xff]  ;;  %v3626_v19 = vld [vmem:[%s8359_s1 + $0x13e0] sm:$0xff]  ;;  %v3627_v22 = vld [vmem:[%s8359_s1 + $0x13e8] sm:$0xff] }
 0x1a2   : > { %1996 = vmatmul.f32.vlgmr.msrb.gmra.mxu0 %v6232_v17  ;;  %2016 = vmatmul.f32.vlgmr.msrb.gmra.mxu1 %v6236_v18  ;;  %v4013_v35 = vld [vmem:[%s8359_s1 + $0x1ff8] sm:$0xff]  ;;  %v3859_v23 = vld [vmem:[%s8359_s1 + $0x1b28] sm:$0xff] }
 0x1a3   : > { %2036 = vmatmul.f32.vlgmr.msrb.gmra.mxu2 %v6232_v17  ;;  %2056 = vmatmul.f32.vlgmr.msrb.gmra.mxu3 %v6236_v18 }
 0x1a4   : > { %2060 = vmatpush.msra.mxu0 %v3707_v24  ;;  %2080 = vmatpush.msra.mxu1 %v3851_v27  ;;  %v3771_v24 = vld [vmem:[%s8359_s1 + $0x1868] sm:$0xff]  ;;  %v3617_v27 = vld [vmem:[%s8359_s1 + $0x1398] sm:$0xff] }
 0x1a5   : > { %2100 = vmatpush.msra.mxu2 %v3708_v29  ;;  %2120 = vmatpush.msra.mxu3 %v3852_v30  ;;  %v3761_v29 = vld [vmem:[%s8359_s1 + $0x1818] sm:$0xff]  ;;  %v3618_v30 = vld [vmem:[%s8359_s1 + $0x13a0] sm:$0xff] }
 0x1a6   : > { %2061 = vmatpush.msra.mxu0 %v3698_v34  ;;  %2081 = vmatpush.msra.mxu1 %v3842_v36  ;;  %v3762_v34 = vld [vmem:[%s8359_s1 + $0x1820] sm:$0xff]  ;;  %v3608_v36 = vld [vmem:[%s8359_s1 + $0x1350] sm:$0xff] }
 0x1a7   : > { %2101 = vmatpush.msra.mxu2 %v3699_v37  ;;  %2121 = vmatpush.msra.mxu3 %v3843_v38  ;;  %v3752_v37 = vld [vmem:[%s8359_s1 + $0x17d0] sm:$0xff]  ;;  %v3609_v38 = vld [vmem:[%s8359_s1 + $0x1358] sm:$0xff] }
 0x1a8   : > { %2062 = vmatpush.msra.mxu0 %v3689_v39  ;;  %2082 = vmatpush.msra.mxu1 %v3833_v40  ;;  %v3753_v39 = vld [vmem:[%s8359_s1 + $0x17d8] sm:$0xff]  ;;  %v3599_v40 = vld [vmem:[%s8359_s1 + $0x1308] sm:$0xff] }
 0x1a9   : > { %2102 = vmatpush.msra.mxu2 %v3690_v41  ;;  %2122 = vmatpush.msra.mxu3 %v3834_v42  ;;  %v3743_v41 = vld [vmem:[%s8359_s1 + $0x1788] sm:$0xff] }
 0x1aa   : > { %2063 = vmatpush.msra.mxu0 %v3680_v43  ;;  %2083 = vmatpush.msra.mxu1 %v3824_v44  ;;  %v3600_v44 = vld [vmem:[%s8359_s1 + $0x1310] sm:$0xff] }
 0x1ab   : > { %2103 = vmatpush.msra.mxu2 %v3681_v46  ;;  %2123 = vmatpush.msra.mxu3 %v3825_v47  ;;  %v3744_v46 = vld [vmem:[%s8359_s1 + $0x1790] sm:$0xff] }
 0x1ac   : > { %2064 = vmatpush.msra.mxu0 %v3671_v49  ;;  %2084 = vmatpush.msra.mxu1 %v3815_v50  ;;  %v3590_v49 = vld [vmem:[%s8359_s1 + $0x12c0] sm:$0xff] }
 0x1ad   : > { %2104 = vmatpush.msra.mxu2 %v3672_v51  ;;  %2124 = vmatpush.msra.mxu3 %v3816_v54  ;;  %v3734_v50 = vld [vmem:[%s8359_s1 + $0x1740] sm:$0xff]  ;;  %v3591_v51 = vld [vmem:[%s8359_s1 + $0x12c8] sm:$0xff] }
 0x1ae   : > { %2065 = vmatpush.msra.mxu0 %v3662_v55  ;;  %2085 = vmatpush.msra.mxu1 %v3806_v57  ;;  %v3735_v54 = vld [vmem:[%s8359_s1 + $0x1748] sm:$0xff]  ;;  %v3581_v57 = vld [vmem:[%s8359_s1 + $0x1278] sm:$0xff] }
 0x1af   : > { %2105 = vmatpush.msra.mxu2 %v3663_v59  ;;  %2125 = vmatpush.msra.mxu3 %v3807_v60  ;;  %v3725_v59 = vld [vmem:[%s8359_s1 + $0x16f8] sm:$0xff]  ;;  %v3582_v60 = vld [vmem:[%s8359_s1 + $0x1280] sm:$0xff] }
 0x1b0   : > { %2066 = vmatpush.msra.mxu0 %v3653_v63  ;;  %2086 = vmatpush.msra.mxu1 %v3797_v2  ;;  %v3726_v63 = vld [vmem:[%s8359_s1 + $0x1700] sm:$0xff]  ;;  %v3572_v2 = vld [vmem:[%s8359_s1 + $0x1230] sm:$0xff] }
 0x1b1   : > { %2106 = vmatpush.msra.mxu2 %v3654_v3  ;;  %2126 = vmatpush.msra.mxu3 %v3798_v4  ;;  %v3716_v3 = vld [vmem:[%s8359_s1 + $0x16b0] sm:$0xff]  ;;  %v3573_v4 = vld [vmem:[%s8359_s1 + $0x1238] sm:$0xff] }
 0x1b2   : > { %2067 = vmatpush.msra.mxu0 %v3644_v6  ;;  %2087 = vmatpush.msra.mxu1 %v3788_v8  ;;  %v3717_v6 = vld [vmem:[%s8359_s1 + $0x16b8] sm:$0xff] }
 0x1b3   : > { %2107 = vmatpush.msra.mxu2 %v3645_v9  ;;  %2127 = vmatpush.msra.mxu3 %v3789_v10 }
 0x1b4   : > { %2068 = vmatpush.msra.mxu0 %v3635_v11  ;;  %2088 = vmatpush.msra.mxu1 %v3779_v12  ;;  %v3709_v11 = vld [vmem:[%s8359_s1 + $0x1678] sm:$0xff] }
 0x1b5   : > { %2108 = vmatpush.msra.mxu2 %v3636_v0  ;;  %2128 = vmatpush.msra.mxu3 %v3780_v1  ;;  %v3853_v12 = vld [vmem:[%s8359_s1 + $0x1af8] sm:$0xff] }
 0x1b6   : > { %2069 = vmatpush.msra.mxu0 %v3626_v19  ;;  %2089 = vmatpush.msra.mxu1 %v3770_v20  ;;  %v3989_v1 = vld [vmem:[%s8359_s1 + $0x1f38] sm:$0xff]  ;;  %v3700_v20 = vld [vmem:[%s8359_s1 + $0x1630] sm:$0xff] }
 0x1b7   : > { %2109 = vmatpush.msra.mxu2 %v3627_v22  ;;  %2129 = vmatpush.msra.mxu3 %v3771_v24  ;;  %v4133_v19 = vld [vmem:[%s8359_s1 + $0x23b8] sm:$0xff]  ;;  %v3844_v22 = vld [vmem:[%s8359_s1 + $0x1ab0] sm:$0xff] }
 0x1b8   : > { %2070 = vmatpush.msra.mxu0 %v3617_v27  ;;  %2090 = vmatpush.msra.mxu1 %v3761_v29  ;;  %v3980_v24 = vld [vmem:[%s8359_s1 + $0x1ef0] sm:$0xff]  ;;  %v3835_v27 = vld [vmem:[%s8359_s1 + $0x1a68] sm:$0xff] }
 0x1b9   : > { %2110 = vmatpush.msra.mxu2 %v3618_v30  ;;  %2130 = vmatpush.msra.mxu3 %v3762_v34  ;;  %v1459_v42 = vpop.f32.mrf.mxu0  ;;  %v1479_v43 = vpop.f32.mrf.mxu1  ;;  %v3971_v29 = vld [vmem:[%s8359_s1 + $0x1ea8] sm:$0xff]  ;;  %v3682_v34 = vld [vmem:[%s8359_s1 + $0x15a0] sm:$0xff] }
 0x1ba   : > { %2071 = vmatpush.msra.mxu0 %v3608_v36  ;;  %2091 = vmatpush.msra.mxu1 %v3752_v37  ;;  %v6799_v47 = vadd.f32 %v1479_v43, %v1459_v42  ;;  %v4115_v30 = vld [vmem:[%s8359_s1 + $0x2328] sm:$0xff]  ;;  %v3826_v36 = vld [vmem:[%s8359_s1 + $0x1a20] sm:$0xff]  ;;  %v4097_v42 = vld [vmem:[%s8359_s1 + $0x2298] sm:$0xff] }
 0x1bb   : > { %2111 = vmatpush.msra.mxu2 %v3609_v38  ;;  %2131 = vmatpush.msra.mxu3 %v3753_v39  ;;  %v3962_v37 = vld [vmem:[%s8359_s1 + $0x1e60] sm:$0xff]  ;;  %v3673_v39 = vld [vmem:[%s8359_s1 + $0x1558] sm:$0xff]  ;;  %v3664_v43 = vld [vmem:[%s8359_s1 + $0x1510] sm:$0xff] }
 0x1bc   : > { %2072 = vmatpush.msra.mxu0 %v3599_v40  ;;  %2092 = vmatpush.msra.mxu1 %v3743_v41  ;;  %v1529_v55 = vmax.f32 %v5951_v25, %v6799_v47  ;;  %v4106_v38 = vld [vmem:[%s8359_s1 + $0x22e0] sm:$0xff]  ;;  %v3817_v40 = vld [vmem:[%s8359_s1 + $0x19d8] sm:$0xff]  ;;  %v3987_v25 = vld [vmem:[%s8359_s1 + $0x1f28] sm:$0xff] }
 0x1bd   : > { %2112 = vmatpush.msra.mxu2 %v3600_v44  ;;  %2132 = vmatpush.msra.mxu3 %v3744_v46  ;;  %v3953_v41 = vld [vmem:[%s8359_s1 + $0x1e18] sm:$0xff]  ;;  %v3808_v44 = vld [vmem:[%s8359_s1 + $0x1990] sm:$0xff]  ;;  %v4131_v47 = vld [vmem:[%s8359_s1 + $0x23a8] sm:$0xff] }
 0x1be   : > { %2073 = vmatpush.msra.mxu0 %v3590_v49  ;;  %2093 = vmatpush.msra.mxu1 %v3734_v50  ;;  %v3944_v46 = vld [vmem:[%s8359_s1 + $0x1dd0] sm:$0xff]  ;;  %v3655_v50 = vld [vmem:[%s8359_s1 + $0x14c8] sm:$0xff] }
 0x1bf   : > { %2113 = vmatpush.msra.mxu2 %v3591_v51  ;;  %2133 = vmatpush.msra.mxu3 %v3735_v54  ;;  %v4088_v49 = vld [vmem:[%s8359_s1 + $0x2250] sm:$0xff]  ;;  %v3799_v51 = vld [vmem:[%s8359_s1 + $0x1948] sm:$0xff] }
 0x1c0   : > { %2074 = vmatpush.msra.mxu0 %v3581_v57  ;;  %2094 = vmatpush.msra.mxu1 %v3725_v59  ;;  %v1499_v8 = vpop.f32.mrf.mxu2  ;;  %v1519_v9 = vpop.f32.mrf.mxu3  ;;  %v3935_v54 = vld [vmem:[%s8359_s1 + $0x1d88] sm:$0xff]  ;;  %v3646_v59 = vld [vmem:[%s8359_s1 + $0x1480] sm:$0xff] }
 0x1c1   : > { %2114 = vmatpush.msra.mxu2 %v3582_v60  ;;  %2134 = vmatpush.msra.mxu3 %v3726_v63  ;;  %v6839_v10 = vadd.f32 %v1519_v9, %v1499_v8  ;;  %v4079_v57 = vld [vmem:[%s8359_s1 + $0x2208] sm:$0xff]  ;;  %v3790_v60 = vld [vmem:[%s8359_s1 + $0x1900] sm:$0xff]  ;;  %v4061_v8 = vld [vmem:[%s8359_s1 + $0x2178] sm:$0xff] }
 0x1c2   : > { %2075 = vmatpush.msra.mxu0 %v3572_v2  ;;  %2095 = vmatpush.msra.mxu1 %v3716_v3  ;;  %v3926_v63 = vld [vmem:[%s8359_s1 + $0x1d40] sm:$0xff]  ;;  %v3637_v3 = vld [vmem:[%s8359_s1 + $0x1438] sm:$0xff]  ;;  %v3628_v9 = vld [vmem:[%s8359_s1 + $0x13f0] sm:$0xff] }
 0x1c3   : > { %2115 = vmatpush.msra.mxu2 %v3573_v4  ;;  %2135 = vmatpush.msra.mxu3 %v3717_v6  ;;  %v1530_v0 = vmax.f32 %v6125_v32, %v6839_v10  ;;  %v4070_v2 = vld [vmem:[%s8359_s1 + $0x21c0] sm:$0xff]  ;;  %v3781_v4 = vld [vmem:[%s8359_s1 + $0x18b8] sm:$0xff]  ;;  %v4015_v32 = vld [vmem:[%s8359_s1 + $0x2008] sm:$0xff] }
 0x1c4   : > { %2076 = vmatmul.f32.vlgmr.msra.gmra.mxu0 %v6232_v17  ;;  %2096 = vmatmul.f32.vlgmr.msra.gmra.mxu1 %v6236_v18  ;;  %v3917_v6 = vld [vmem:[%s8359_s1 + $0x1cf8] sm:$0xff] }
 0x1c5   : > { %2116 = vmatmul.f32.vlgmr.msra.gmra.mxu2 %v6232_v17  ;;  %2136 = vmatmul.f32.vlgmr.msra.gmra.mxu3 %v6236_v18  ;;  %v4124_v17 = vld [vmem:[%s8359_s1 + $0x2370] sm:$0xff]  ;;  %v3691_v18 = vld [vmem:[%s8359_s1 + $0x15e8] sm:$0xff]  ;;  %v3861_v10 = vld [vmem:[%s8359_s1 + $0x1b38] sm:$0xff] }
 0x1c6   : > { %2140 = vmatpush.msrb.mxu0 %v3709_v11  ;;  %2160 = vmatpush.msrb.mxu1 %v3853_v12  ;;  %v3772_v11 = vld [vmem:[%s8359_s1 + $0x1870] sm:$0xff] }
 0x1c7   : > { %2478 = vmatpush.msrb.mxu2 %v3989_v1  ;;  %2498 = vmatpush.msrb.mxu3 %v4133_v19  ;;  %v3908_v12 = vld [vmem:[%s8359_s1 + $0x1cb0] sm:$0xff]  ;;  %v3619_v19 = vld [vmem:[%s8359_s1 + $0x13a8] sm:$0xff] }
 0x1c8   : > { %2141 = vmatpush.msrb.mxu0 %v3700_v20  ;;  %2161 = vmatpush.msrb.mxu1 %v3844_v22  ;;  %v4052_v1 = vld [vmem:[%s8359_s1 + $0x2130] sm:$0xff]  ;;  %v3763_v20 = vld [vmem:[%s8359_s1 + $0x1828] sm:$0xff] }
 0x1c9   : > { %2479 = vmatpush.msrb.mxu2 %v3980_v24  ;;  %2499 = vmatpush.msrb.mxu3 %v4124_v17  ;;  %v3899_v22 = vld [vmem:[%s8359_s1 + $0x1c68] sm:$0xff]  ;;  %v3610_v17 = vld [vmem:[%s8359_s1 + $0x1360] sm:$0xff] }
 0x1ca   : > { %2142 = vmatpush.msrb.mxu0 %v3691_v18  ;;  %2162 = vmatpush.msrb.mxu1 %v3835_v27  ;;  %v4043_v24 = vld [vmem:[%s8359_s1 + $0x20e8] sm:$0xff]  ;;  %v3754_v18 = vld [vmem:[%s8359_s1 + $0x17e0] sm:$0xff] }
 0x1cb   : > { %2480 = vmatpush.msrb.mxu2 %v3971_v29  ;;  %2500 = vmatpush.msrb.mxu3 %v4115_v30  ;;  %v3890_v27 = vld [vmem:[%s8359_s1 + $0x1c20] sm:$0xff]  ;;  %v3601_v30 = vld [vmem:[%s8359_s1 + $0x1318] sm:$0xff] }
 0x1cc   : > { %2143 = vmatpush.msrb.mxu0 %v3682_v34  ;;  %2163 = vmatpush.msrb.mxu1 %v3826_v36  ;;  %v4034_v29 = vld [vmem:[%s8359_s1 + $0x20a0] sm:$0xff]  ;;  %v3745_v34 = vld [vmem:[%s8359_s1 + $0x1798] sm:$0xff] }
 0x1cd   : > { %2481 = vmatpush.msrb.mxu2 %v3962_v37  ;;  %2501 = vmatpush.msrb.mxu3 %v4106_v38  ;;  %v3881_v36 = vld [vmem:[%s8359_s1 + $0x1bd8] sm:$0xff]  ;;  %v3592_v38 = vld [vmem:[%s8359_s1 + $0x12d0] sm:$0xff] }
 0x1ce   : > { %2144 = vmatpush.msrb.mxu0 %v3673_v39  ;;  %2164 = vmatpush.msrb.mxu1 %v3817_v40  ;;  %v4025_v37 = vld [vmem:[%s8359_s1 + $0x2058] sm:$0xff]  ;;  %v3736_v39 = vld [vmem:[%s8359_s1 + $0x1750] sm:$0xff] }
 0x1cf   : > { %2482 = vmatpush.msrb.mxu2 %v3953_v41  ;;  %2502 = vmatpush.msrb.mxu3 %v4097_v42  ;;  %v3872_v40 = vld [vmem:[%s8359_s1 + $0x1b90] sm:$0xff]  ;;  %v3583_v42 = vld [vmem:[%s8359_s1 + $0x1288] sm:$0xff] }
 0x1d0   : > { %2145 = vmatpush.msrb.mxu0 %v3664_v43  ;;  %2165 = vmatpush.msrb.mxu1 %v3808_v44  ;;  %v4016_v41 = vld [vmem:[%s8359_s1 + $0x2010] sm:$0xff]  ;;  %v3727_v43 = vld [vmem:[%s8359_s1 + $0x1708] sm:$0xff] }
 0x1d1   : > { %2483 = vmatpush.msrb.mxu2 %v3944_v46  ;;  %2503 = vmatpush.msrb.mxu3 %v4088_v49  ;;  %v3863_v44 = vld [vmem:[%s8359_s1 + $0x1b48] sm:$0xff]  ;;  %v3574_v49 = vld [vmem:[%s8359_s1 + $0x1240] sm:$0xff] }
 0x1d2   : > { %2146 = vmatpush.msrb.mxu0 %v3655_v50  ;;  %2166 = vmatpush.msrb.mxu1 %v3799_v51  ;;  %v4007_v46 = vld [vmem:[%s8359_s1 + $0x1fc8] sm:$0xff]  ;;  %v3718_v50 = vld [vmem:[%s8359_s1 + $0x16c0] sm:$0xff] }
 0x1d3   : > { %2484 = vmatpush.msrb.mxu2 %v3935_v54  ;;  %2504 = vmatpush.msrb.mxu3 %v4079_v57  ;;  %v3854_v51 = vld [vmem:[%s8359_s1 + $0x1b00] sm:$0xff] }
 0x1d4   : > { %2147 = vmatpush.msrb.mxu0 %v3646_v59  ;;  %2167 = vmatpush.msrb.mxu1 %v3790_v60  ;;  %v3998_v54 = vld [vmem:[%s8359_s1 + $0x1f80] sm:$0xff] }
 0x1d5   : > { %2485 = vmatpush.msrb.mxu2 %v3926_v63  ;;  %2505 = vmatpush.msrb.mxu3 %v4070_v2  ;;  %v3990_v57 = vld [vmem:[%s8359_s1 + $0x1f40] sm:$0xff]  ;;  %v7050_v63 = vld [vmem:[%s4591_s13 + $0x8] sm:$0xff] }
 0x1d6   : > { %2148 = vmatpush.msrb.mxu0 %v3637_v3  ;;  %2168 = vmatpush.msrb.mxu1 %v3781_v4  ;;  %v4134_v59 = vld [vmem:[%s8359_s1 + $0x23c0] sm:$0xff]  ;;  %v3991_v2 = vld [vmem:[%s8359_s1 + $0x1f48] sm:$0xff]  ;;  %v3981_v4 = vld [vmem:[%s8359_s1 + $0x1ef8] sm:$0xff] }
 0x1d7   : > { %2486 = vmatpush.msrb.mxu2 %v3917_v6  ;;  %2506 = vmatpush.msrb.mxu3 %v4061_v8  ;;  %v7046_v60 = vld [vmem:[%s4591_s13] sm:$0xff]  ;;  %v4135_v3 = vld [vmem:[%s8359_s1 + $0x23c8] sm:$0xff]  ;;  %v4125_v6 = vld [vmem:[%s8359_s1 + $0x2378] sm:$0xff] }
 0x1d8   : > { %2149 = vmatpush.msrb.mxu0 %v3628_v9  ;;  %2169 = vmatpush.msrb.mxu1 %v3772_v11  ;;  %v3982_v8 = vld [vmem:[%s8359_s1 + $0x1f00] sm:$0xff]  ;;  %v3972_v11 = vld [vmem:[%s8359_s1 + $0x1eb0] sm:$0xff] }
 0x1d9   : > { %2487 = vmatpush.msrb.mxu2 %v3908_v12  ;;  %2507 = vmatpush.msrb.mxu3 %v4052_v1  ;;  %v4126_v9 = vld [vmem:[%s8359_s1 + $0x2380] sm:$0xff]  ;;  %v4116_v12 = vld [vmem:[%s8359_s1 + $0x2330] sm:$0xff]  ;;  %v3973_v1 = vld [vmem:[%s8359_s1 + $0x1eb8] sm:$0xff] }
 0x1da   : > { %2150 = vmatpush.msrb.mxu0 %v3619_v19  ;;  %2170 = vmatpush.msrb.mxu1 %v3763_v20  ;;  %v4117_v19 = vld [vmem:[%s8359_s1 + $0x2338] sm:$0xff]  ;;  %v3963_v20 = vld [vmem:[%s8359_s1 + $0x1e68] sm:$0xff] }
 0x1db   : > { %2488 = vmatpush.msrb.mxu2 %v3899_v22  ;;  %2508 = vmatpush.msrb.mxu3 %v4043_v24  ;;  %v4107_v22 = vld [vmem:[%s8359_s1 + $0x22e8] sm:$0xff]  ;;  %v3964_v24 = vld [vmem:[%s8359_s1 + $0x1e70] sm:$0xff] }
 0x1dc   : > { %2151 = vmatpush.msrb.mxu0 %v3610_v17  ;;  %2171 = vmatpush.msrb.mxu1 %v3754_v18  ;;  %v4108_v17 = vld [vmem:[%s8359_s1 + $0x22f0] sm:$0xff]  ;;  %v3954_v18 = vld [vmem:[%s8359_s1 + $0x1e20] sm:$0xff] }
 0x1dd   : > { %2489 = vmatpush.msrb.mxu2 %v3890_v27  ;;  %2509 = vmatpush.msrb.mxu3 %v4034_v29  ;;  %v4098_v27 = vld [vmem:[%s8359_s1 + $0x22a0] sm:$0xff]  ;;  %v3955_v29 = vld [vmem:[%s8359_s1 + $0x1e28] sm:$0xff] }
 0x1de   : > { %2152 = vmatpush.msrb.mxu0 %v3601_v30  ;;  %2172 = vmatpush.msrb.mxu1 %v3745_v34  ;;  %v4099_v30 = vld [vmem:[%s8359_s1 + $0x22a8] sm:$0xff]  ;;  %v3945_v34 = vld [vmem:[%s8359_s1 + $0x1dd8] sm:$0xff] }
 0x1df   : > { %2490 = vmatpush.msrb.mxu2 %v3881_v36  ;;  %2510 = vmatpush.msrb.mxu3 %v4025_v37  ;;  %v4089_v36 = vld [vmem:[%s8359_s1 + $0x2258] sm:$0xff]  ;;  %v3946_v37 = vld [vmem:[%s8359_s1 + $0x1de0] sm:$0xff] }
 0x1e0   : > { %2153 = vmatpush.msrb.mxu0 %v3592_v38  ;;  %2173 = vmatpush.msrb.mxu1 %v3736_v39  ;;  %v4090_v38 = vld [vmem:[%s8359_s1 + $0x2260] sm:$0xff]  ;;  %v3936_v39 = vld [vmem:[%s8359_s1 + $0x1d90] sm:$0xff] }
 0x1e1   : > { %2491 = vmatpush.msrb.mxu2 %v3872_v40  ;;  %2511 = vmatpush.msrb.mxu3 %v4016_v41  ;;  %v4080_v40 = vld [vmem:[%s8359_s1 + $0x2210] sm:$0xff]  ;;  %v3937_v41 = vld [vmem:[%s8359_s1 + $0x1d98] sm:$0xff] }
 0x1e2   : > { %2154 = vmatpush.msrb.mxu0 %v3583_v42  ;;  %2174 = vmatpush.msrb.mxu1 %v3727_v43  ;;  %v4081_v42 = vld [vmem:[%s8359_s1 + $0x2218] sm:$0xff]  ;;  %v3927_v43 = vld [vmem:[%s8359_s1 + $0x1d48] sm:$0xff] }
 0x1e3   : > { %2492 = vmatpush.msrb.mxu2 %v3863_v44  ;;  %2512 = vmatpush.msrb.mxu3 %v4007_v46  ;;  %v4071_v44 = vld [vmem:[%s8359_s1 + $0x21c8] sm:$0xff]  ;;  %v3928_v46 = vld [vmem:[%s8359_s1 + $0x1d50] sm:$0xff] }
 0x1e4   : > { %2155 = vmatpush.msrb.mxu0 %v3574_v49  ;;  %2175 = vmatpush.msrb.mxu1 %v3718_v50  ;;  %v4072_v49 = vld [vmem:[%s8359_s1 + $0x21d0] sm:$0xff]  ;;  %v3918_v50 = vld [vmem:[%s8359_s1 + $0x1d00] sm:$0xff] }
 0x1e5   : > { %2493 = vmatpush.msrb.mxu2 %v3854_v51  ;;  %2513 = vmatpush.msrb.mxu3 %v3998_v54  ;;  %v4062_v51 = vld [vmem:[%s8359_s1 + $0x2180] sm:$0xff]  ;;  %v3919_v54 = vld [vmem:[%s8359_s1 + $0x1d08] sm:$0xff] }
 0x1e6   : > { %2156 = vmatmul.f32.vlgmr.msrb.gmra.mxu0 %v7046_v60  ;;  %2176 = vmatmul.f32.vlgmr.msrb.gmra.mxu1 %v7050_v63 }
 0x1e7   : > { %2494 = vmatmul.f32.vlgmr.msrb.gmra.mxu2 %v7046_v60  ;;  %2514 = vmatmul.f32.vlgmr.msrb.gmra.mxu3 %v7050_v63 }
 0x1e8   : > { %2518 = vmatpush.msra.mxu0 %v3990_v57  ;;  %2538 = vmatpush.msra.mxu1 %v4134_v59  ;;  %v4063_v57 = vld [vmem:[%s8359_s1 + $0x2188] sm:$0xff]  ;;  %v3909_v59 = vld [vmem:[%s8359_s1 + $0x1cb8] sm:$0xff] }
 0x1e9   : > { %2558 = vmatpush.msra.mxu2 %v3991_v2  ;;  %2578 = vmatpush.msra.mxu3 %v4135_v3  ;;  %v4053_v2 = vld [vmem:[%s8359_s1 + $0x2138] sm:$0xff]  ;;  %v3910_v3 = vld [vmem:[%s8359_s1 + $0x1cc0] sm:$0xff] }
 0x1ea   : > { %2519 = vmatpush.msra.mxu0 %v3981_v4  ;;  %2539 = vmatpush.msra.mxu1 %v4125_v6  ;;  %v4054_v4 = vld [vmem:[%s8359_s1 + $0x2140] sm:$0xff]  ;;  %v3900_v6 = vld [vmem:[%s8359_s1 + $0x1c70] sm:$0xff] }
 0x1eb   : > { %2559 = vmatpush.msra.mxu2 %v3982_v8  ;;  %2579 = vmatpush.msra.mxu3 %v4126_v9  ;;  %v4044_v8 = vld [vmem:[%s8359_s1 + $0x20f0] sm:$0xff]  ;;  %v3901_v9 = vld [vmem:[%s8359_s1 + $0x1c78] sm:$0xff] }
 0x1ec   : > { %2520 = vmatpush.msra.mxu0 %v3972_v11  ;;  %2540 = vmatpush.msra.mxu1 %v4116_v12  ;;  %v4045_v11 = vld [vmem:[%s8359_s1 + $0x20f8] sm:$0xff]  ;;  %v3891_v12 = vld [vmem:[%s8359_s1 + $0x1c28] sm:$0xff] }
 0x1ed   : > { %2560 = vmatpush.msra.mxu2 %v3973_v1  ;;  %2580 = vmatpush.msra.mxu3 %v4117_v19  ;;  %v4035_v1 = vld [vmem:[%s8359_s1 + $0x20a8] sm:$0xff]  ;;  %v3892_v19 = vld [vmem:[%s8359_s1 + $0x1c30] sm:$0xff] }
 0x1ee   : > { %2521 = vmatpush.msra.mxu0 %v3963_v20  ;;  %2541 = vmatpush.msra.mxu1 %v4107_v22  ;;  %v4036_v20 = vld [vmem:[%s8359_s1 + $0x20b0] sm:$0xff]  ;;  %v3882_v22 = vld [vmem:[%s8359_s1 + $0x1be0] sm:$0xff] }
 0x1ef   : > { %2561 = vmatpush.msra.mxu2 %v3964_v24  ;;  %2581 = vmatpush.msra.mxu3 %v4108_v17  ;;  %v4026_v24 = vld [vmem:[%s8359_s1 + $0x2060] sm:$0xff]  ;;  %v3883_v17 = vld [vmem:[%s8359_s1 + $0x1be8] sm:$0xff] }
 0x1f0   : > { %2522 = vmatpush.msra.mxu0 %v3954_v18  ;;  %2542 = vmatpush.msra.mxu1 %v4098_v27  ;;  %v4027_v18 = vld [vmem:[%s8359_s1 + $0x2068] sm:$0xff]  ;;  %v3873_v27 = vld [vmem:[%s8359_s1 + $0x1b98] sm:$0xff] }
 0x1f1   : > { %2562 = vmatpush.msra.mxu2 %v3955_v29  ;;  %2582 = vmatpush.msra.mxu3 %v4099_v30  ;;  %v4017_v29 = vld [vmem:[%s8359_s1 + $0x2018] sm:$0xff]  ;;  %v3874_v30 = vld [vmem:[%s8359_s1 + $0x1ba0] sm:$0xff] }
 0x1f2   : > { %2523 = vmatpush.msra.mxu0 %v3945_v34  ;;  %2543 = vmatpush.msra.mxu1 %v4089_v36  ;;  %v4018_v34 = vld [vmem:[%s8359_s1 + $0x2020] sm:$0xff]  ;;  %v3864_v36 = vld [vmem:[%s8359_s1 + $0x1b50] sm:$0xff] }
 0x1f3   : > { %2563 = vmatpush.msra.mxu2 %v3946_v37  ;;  %2583 = vmatpush.msra.mxu3 %v4090_v38  ;;  %v4008_v37 = vld [vmem:[%s8359_s1 + $0x1fd0] sm:$0xff]  ;;  %v3865_v38 = vld [vmem:[%s8359_s1 + $0x1b58] sm:$0xff] }
 0x1f4   : > { %2524 = vmatpush.msra.mxu0 %v3936_v39  ;;  %2544 = vmatpush.msra.mxu1 %v4080_v40  ;;  %v4009_v39 = vld [vmem:[%s8359_s1 + $0x1fd8] sm:$0xff]  ;;  %v3855_v40 = vld [vmem:[%s8359_s1 + $0x1b08] sm:$0xff] }
 0x1f5   : > { %2564 = vmatpush.msra.mxu2 %v3937_v41  ;;  %2584 = vmatpush.msra.mxu3 %v4081_v42  ;;  %v3999_v41 = vld [vmem:[%s8359_s1 + $0x1f88] sm:$0xff]  ;;  %v3856_v42 = vld [vmem:[%s8359_s1 + $0x1b10] sm:$0xff] }
 0x1f6   : > { %2525 = vmatpush.msra.mxu0 %v3927_v43  ;;  %2545 = vmatpush.msra.mxu1 %v4071_v44  ;;  %v4000_v43 = vld [vmem:[%s8359_s1 + $0x1f90] sm:$0xff] }
 0x1f7   : > { %2565 = vmatpush.msra.mxu2 %v3928_v46  ;;  %2585 = vmatpush.msra.mxu3 %v4072_v49  ;;  %v3992_v44 = vld [vmem:[%s8359_s1 + $0x1f50] sm:$0xff]  ;;  %v3993_v49 = vld [vmem:[%s8359_s1 + $0x1f58] sm:$0xff] }
 0x1f8   : > { %2526 = vmatpush.msra.mxu0 %v3918_v50  ;;  %2546 = vmatpush.msra.mxu1 %v4062_v51  ;;  %v4136_v46 = vld [vmem:[%s8359_s1 + $0x23d0] sm:$0xff]  ;;  %v4137_v50 = vld [vmem:[%s8359_s1 + $0x23d8] sm:$0xff]  ;;  %v3983_v51 = vld [vmem:[%s8359_s1 + $0x1f08] sm:$0xff] }
 0x1f9   : > { %2566 = vmatpush.msra.mxu2 %v3919_v54  ;;  %2586 = vmatpush.msra.mxu3 %v4063_v57  ;;  %v4127_v54 = vld [vmem:[%s8359_s1 + $0x2388] sm:$0xff]  ;;  %v3984_v57 = vld [vmem:[%s8359_s1 + $0x1f10] sm:$0xff] }
 0x1fa   : > { %2527 = vmatpush.msra.mxu0 %v3909_v59  ;;  %2547 = vmatpush.msra.mxu1 %v4053_v2  ;;  %v4128_v59 = vld [vmem:[%s8359_s1 + $0x2390] sm:$0xff]  ;;  %v3974_v2 = vld [vmem:[%s8359_s1 + $0x1ec0] sm:$0xff] }
 0x1fb   : > { %2567 = vmatpush.msra.mxu2 %v3910_v3  ;;  %2587 = vmatpush.msra.mxu3 %v4054_v4  ;;  %v4118_v3 = vld [vmem:[%s8359_s1 + $0x2340] sm:$0xff]  ;;  %v3975_v4 = vld [vmem:[%s8359_s1 + $0x1ec8] sm:$0xff] }
 0x1fc   : > { %2528 = vmatpush.msra.mxu0 %v3900_v6  ;;  %2548 = vmatpush.msra.mxu1 %v4044_v8  ;;  %v4119_v6 = vld [vmem:[%s8359_s1 + $0x2348] sm:$0xff]  ;;  %v3965_v8 = vld [vmem:[%s8359_s1 + $0x1e78] sm:$0xff] }
 0x1fd   : > { %2568 = vmatpush.msra.mxu2 %v3901_v9  ;;  %2588 = vmatpush.msra.mxu3 %v4045_v11  ;;  %v4109_v9 = vld [vmem:[%s8359_s1 + $0x22f8] sm:$0xff]  ;;  %v3966_v11 = vld [vmem:[%s8359_s1 + $0x1e80] sm:$0xff] }
 0x1fe   : > { %2529 = vmatpush.msra.mxu0 %v3891_v12  ;;  %2549 = vmatpush.msra.mxu1 %v4035_v1  ;;  %v4110_v12 = vld [vmem:[%s8359_s1 + $0x2300] sm:$0xff]  ;;  %v3956_v1 = vld [vmem:[%s8359_s1 + $0x1e30] sm:$0xff] }
 0x1ff   : > { %2569 = vmatpush.msra.mxu2 %v3892_v19  ;;  %2589 = vmatpush.msra.mxu3 %v4036_v20  ;;  %v4100_v19 = vld [vmem:[%s8359_s1 + $0x22b0] sm:$0xff]  ;;  %v3957_v20 = vld [vmem:[%s8359_s1 + $0x1e38] sm:$0xff] }
 0x200   : > { %2530 = vmatpush.msra.mxu0 %v3882_v22  ;;  %2550 = vmatpush.msra.mxu1 %v4026_v24  ;;  %v4101_v22 = vld [vmem:[%s8359_s1 + $0x22b8] sm:$0xff]  ;;  %v3947_v24 = vld [vmem:[%s8359_s1 + $0x1de8] sm:$0xff] }
 0x201   : > { %2570 = vmatpush.msra.mxu2 %v3883_v17  ;;  %2590 = vmatpush.msra.mxu3 %v4027_v18  ;;  %v4091_v17 = vld [vmem:[%s8359_s1 + $0x2268] sm:$0xff]  ;;  %v3948_v18 = vld [vmem:[%s8359_s1 + $0x1df0] sm:$0xff] }
 0x202   : > { %2531 = vmatpush.msra.mxu0 %v3873_v27  ;;  %2551 = vmatpush.msra.mxu1 %v4017_v29  ;;  %v4092_v27 = vld [vmem:[%s8359_s1 + $0x2270] sm:$0xff]  ;;  %v3938_v29 = vld [vmem:[%s8359_s1 + $0x1da0] sm:$0xff] }
 0x203   : > { %2571 = vmatpush.msra.mxu2 %v3874_v30  ;;  %2591 = vmatpush.msra.mxu3 %v4018_v34  ;;  %v4082_v30 = vld [vmem:[%s8359_s1 + $0x2220] sm:$0xff]  ;;  %v3939_v34 = vld [vmem:[%s8359_s1 + $0x1da8] sm:$0xff] }
 0x204   : > { %2532 = vmatpush.msra.mxu0 %v3864_v36  ;;  %2552 = vmatpush.msra.mxu1 %v4008_v37  ;;  %v4083_v36 = vld [vmem:[%s8359_s1 + $0x2228] sm:$0xff]  ;;  %v3929_v37 = vld [vmem:[%s8359_s1 + $0x1d58] sm:$0xff] }
 0x205   : > { %2572 = vmatpush.msra.mxu2 %v3865_v38  ;;  %2592 = vmatpush.msra.mxu3 %v4009_v39  ;;  %v4073_v38 = vld [vmem:[%s8359_s1 + $0x21d8] sm:$0xff]  ;;  %v7335_v39 = vpop.f32.mrf.mxu2 }
 0x206   : > { %2533 = vmatpush.msra.mxu0 %v3855_v40  ;;  %2553 = vmatpush.msra.mxu1 %v3999_v41  ;;  %v7337_v40 = vpop.f32.mrf.mxu3  ;;  %v3930_v41 = vld [vmem:[%s8359_s1 + $0x1d60] sm:$0xff] }
 0x207   : > { %2573 = vmatpush.msra.mxu2 %v3856_v42  ;;  %2593 = vmatpush.msra.mxu3 %v4000_v43  ;;  %v4074_v42 = vld [vmem:[%s8359_s1 + $0x21e0] sm:$0xff]  ;;  %v3920_v43 = vld [vmem:[%s8359_s1 + $0x1d10] sm:$0xff] }
 0x208   : > { %2534 = vmatmul.f32.vlgmr.msra.gmra.mxu0 %v7046_v60  ;;  %2554 = vmatmul.f32.vlgmr.msra.gmra.mxu1 %v7050_v63 }
 0x209   : > { %2574 = vmatmul.f32.vlgmr.msra.gmra.mxu2 %v7046_v60  ;;  %2594 = vmatmul.f32.vlgmr.msra.gmra.mxu3 %v7050_v63 }
 0x20a   : > { %2598 = vmatpush.msrb.mxu0 %v3992_v44  ;;  %2618 = vmatpush.msrb.mxu1 %v4136_v46  ;;  %v4064_v44 = vld [vmem:[%s8359_s1 + $0x2190] sm:$0xff]  ;;  %v3921_v46 = vld [vmem:[%s8359_s1 + $0x1d18] sm:$0xff] }
 0x20b   : > { %2638 = vmatpush.msrb.mxu2 %v3993_v49  ;;  %2658 = vmatpush.msrb.mxu3 %v4137_v50  ;;  %v4065_v49 = vld [vmem:[%s8359_s1 + $0x2198] sm:$0xff]  ;;  %v3911_v50 = vld [vmem:[%s8359_s1 + $0x1cc8] sm:$0xff] }
 0x20c   : > { %2599 = vmatpush.msrb.mxu0 %v3983_v51  ;;  %2619 = vmatpush.msrb.mxu1 %v4127_v54  ;;  %v4055_v51 = vld [vmem:[%s8359_s1 + $0x2148] sm:$0xff]  ;;  %v3912_v54 = vld [vmem:[%s8359_s1 + $0x1cd0] sm:$0xff] }
 0x20d   : > { %2639 = vmatpush.msrb.mxu2 %v3984_v57  ;;  %2659 = vmatpush.msrb.mxu3 %v4128_v59  ;;  %v4056_v57 = vld [vmem:[%s8359_s1 + $0x2150] sm:$0xff]  ;;  %v3902_v59 = vld [vmem:[%s8359_s1 + $0x1c80] sm:$0xff] }
 0x20e   : > { %2600 = vmatpush.msrb.mxu0 %v3974_v2  ;;  %2620 = vmatpush.msrb.mxu1 %v4118_v3  ;;  %v4046_v2 = vld [vmem:[%s8359_s1 + $0x2100] sm:$0xff]  ;;  %v3903_v3 = vld [vmem:[%s8359_s1 + $0x1c88] sm:$0xff] }
 0x20f   : > { %2640 = vmatpush.msrb.mxu2 %v3975_v4  ;;  %2660 = vmatpush.msrb.mxu3 %v4119_v6  ;;  %v4047_v4 = vld [vmem:[%s8359_s1 + $0x2108] sm:$0xff]  ;;  %v3893_v6 = vld [vmem:[%s8359_s1 + $0x1c38] sm:$0xff] }
 0x210   : > { %2601 = vmatpush.msrb.mxu0 %v3965_v8  ;;  %2621 = vmatpush.msrb.mxu1 %v4109_v9  ;;  %v4037_v8 = vld [vmem:[%s8359_s1 + $0x20b8] sm:$0xff]  ;;  %v7387_v9 = vpop.f32.mrf.mxu2 }
 0x211   : > { %2641 = vmatpush.msrb.mxu2 %v3966_v11  ;;  %2661 = vmatpush.msrb.mxu3 %v4110_v12  ;;  %v7389_v11 = vpop.f32.mrf.mxu3  ;;  %v3894_v12 = vld [vmem:[%s8359_s1 + $0x1c40] sm:$0xff] }
 0x212   : > { %2602 = vmatpush.msrb.mxu0 %v3956_v1  ;;  %2622 = vmatpush.msrb.mxu1 %v4100_v19  ;;  %v4038_v1 = vld [vmem:[%s8359_s1 + $0x20c0] sm:$0xff]  ;;  %v3884_v19 = vld [vmem:[%s8359_s1 + $0x1bf0] sm:$0xff] }
 0x213   : > { %2642 = vmatpush.msrb.mxu2 %v3957_v20  ;;  %2662 = vmatpush.msrb.mxu3 %v4101_v22  ;;  %v4028_v20 = vld [vmem:[%s8359_s1 + $0x2070] sm:$0xff]  ;;  %v3885_v22 = vld [vmem:[%s8359_s1 + $0x1bf8] sm:$0xff] }
 0x214   : > { %2603 = vmatpush.msrb.mxu0 %v3947_v24  ;;  %2623 = vmatpush.msrb.mxu1 %v4091_v17  ;;  %v4029_v24 = vld [vmem:[%s8359_s1 + $0x2078] sm:$0xff]  ;;  %v3875_v17 = vld [vmem:[%s8359_s1 + $0x1ba8] sm:$0xff] }
 0x215   : > { %2643 = vmatpush.msrb.mxu2 %v3948_v18  ;;  %2663 = vmatpush.msrb.mxu3 %v4092_v27  ;;  %v4019_v18 = vld [vmem:[%s8359_s1 + $0x2028] sm:$0xff]  ;;  %v3876_v27 = vld [vmem:[%s8359_s1 + $0x1bb0] sm:$0xff] }
 0x216   : > { %2604 = vmatpush.msrb.mxu0 %v3938_v29  ;;  %2624 = vmatpush.msrb.mxu1 %v4082_v30  ;;  %v4020_v29 = vld [vmem:[%s8359_s1 + $0x2030] sm:$0xff]  ;;  %v3866_v30 = vld [vmem:[%s8359_s1 + $0x1b60] sm:$0xff] }
 0x217   : > { %2644 = vmatpush.msrb.mxu2 %v3939_v34  ;;  %2664 = vmatpush.msrb.mxu3 %v4083_v36  ;;  %v4010_v34 = vld [vmem:[%s8359_s1 + $0x1fe0] sm:$0xff]  ;;  %v3867_v36 = vld [vmem:[%s8359_s1 + $0x1b68] sm:$0xff] }
 0x218   : > { %2605 = vmatpush.msrb.mxu0 %v3929_v37  ;;  %2625 = vmatpush.msrb.mxu1 %v4073_v38  ;;  %v4011_v37 = vld [vmem:[%s8359_s1 + $0x1fe8] sm:$0xff]  ;;  %v3857_v38 = vld [vmem:[%s8359_s1 + $0x1b18] sm:$0xff] }
 0x219   : > { %2645 = vmatpush.msrb.mxu2 %v3930_v41  ;;  %2665 = vmatpush.msrb.mxu3 %v4074_v42  ;;  %v4001_v41 = vld [vmem:[%s8359_s1 + $0x1f98] sm:$0xff]  ;;  %v3858_v42 = vld [vmem:[%s8359_s1 + $0x1b20] sm:$0xff] }
 0x21a   : > { %2606 = vmatpush.msrb.mxu0 %v3920_v43  ;;  %2626 = vmatpush.msrb.mxu1 %v4064_v44  ;;  %v4002_v43 = vld [vmem:[%s8359_s1 + $0x1fa0] sm:$0xff] }
 0x21b   : > { %2646 = vmatpush.msrb.mxu2 %v3921_v46  ;;  %2666 = vmatpush.msrb.mxu3 %v4065_v49 }
 0x21c   : > { %2607 = vmatpush.msrb.mxu0 %v3911_v50  ;;  %2627 = vmatpush.msrb.mxu1 %v4055_v51  ;;  %v7445_v50 = vpop.f32.mrf.mxu0  ;;  %v7447_v51 = vpop.f32.mrf.mxu1 }
 0x21d   : > { %2647 = vmatpush.msrb.mxu2 %v3912_v54  ;;  %2667 = vmatpush.msrb.mxu3 %v4056_v57  ;;  %v3994_v54 = vld [vmem:[%s8359_s1 + $0x1f60] sm:$0xff] }
 0x21e   : > { %2608 = vmatpush.msrb.mxu0 %v3902_v59  ;;  %2628 = vmatpush.msrb.mxu1 %v4046_v2  ;;  %v4138_v57 = vld [vmem:[%s8359_s1 + $0x23e0] sm:$0xff]  ;;  %v3995_v2 = vld [vmem:[%s8359_s1 + $0x1f68] sm:$0xff] }
 0x21f   : > { %2648 = vmatpush.msrb.mxu2 %v3903_v3  ;;  %2668 = vmatpush.msrb.mxu3 %v4047_v4  ;;  %v4139_v3 = vld [vmem:[%s8359_s1 + $0x23e8] sm:$0xff]  ;;  %v4130_v4 = vld [vmem:[%s8359_s1 + $0x23a0] sm:$0xff] }
 0x220   : > { %2609 = vmatpush.msrb.mxu0 %v3893_v6  ;;  %2629 = vmatpush.msrb.mxu1 %v4037_v8  ;;  %v3976_v6 = vld [vmem:[%s8359_s1 + $0x1ed0] sm:$0xff] }
 0x221   : > { %2649 = vmatpush.msrb.mxu2 %v3894_v12  ;;  %2669 = vmatpush.msrb.mxu3 %v4038_v1  ;;  %v4120_v8 = vld [vmem:[%s8359_s1 + $0x2350] sm:$0xff]  ;;  %v3977_v12 = vld [vmem:[%s8359_s1 + $0x1ed8] sm:$0xff] }
 0x222   : > { %2610 = vmatpush.msrb.mxu0 %v3884_v19  ;;  %2630 = vmatpush.msrb.mxu1 %v4028_v20  ;;  %v4121_v1 = vld [vmem:[%s8359_s1 + $0x2358] sm:$0xff]  ;;  %v3967_v19 = vld [vmem:[%s8359_s1 + $0x1e88] sm:$0xff] }
 0x223   : > { %2650 = vmatpush.msrb.mxu2 %v3885_v22  ;;  %2670 = vmatpush.msrb.mxu3 %v4029_v24  ;;  %v4111_v20 = vld [vmem:[%s8359_s1 + $0x2308] sm:$0xff]  ;;  %v3968_v22 = vld [vmem:[%s8359_s1 + $0x1e90] sm:$0xff] }
 0x224   : > { %2611 = vmatpush.msrb.mxu0 %v3875_v17  ;;  %2631 = vmatpush.msrb.mxu1 %v4019_v18  ;;  %v4112_v24 = vld [vmem:[%s8359_s1 + $0x2310] sm:$0xff]  ;;  %v7506_v17 = vpop.f32.mrf.mxu0  ;;  %v7508_v18 = vpop.f32.mrf.mxu1 }
 0x225   : > { %2651 = vmatpush.msrb.mxu2 %v3876_v27  ;;  %2671 = vmatpush.msrb.mxu3 %v4020_v29  ;;  %v3958_v27 = vld [vmem:[%s8359_s1 + $0x1e40] sm:$0xff] }
 0x226   : > { %2612 = vmatpush.msrb.mxu0 %v3866_v30  ;;  %2632 = vmatpush.msrb.mxu1 %v4010_v34  ;;  %v2037_v44 = vpop.f32.mrf.mxu2  ;;  %v2057_v46 = vpop.f32.mrf.mxu3  ;;  %v4102_v29 = vld [vmem:[%s8359_s1 + $0x22c0] sm:$0xff]  ;;  %v3959_v30 = vld [vmem:[%s8359_s1 + $0x1e48] sm:$0xff] }
 0x227   : > { %2652 = vmatpush.msrb.mxu2 %v3867_v36  ;;  %2672 = vmatpush.msrb.mxu3 %v4011_v37  ;;  %v2058_v49 = vadd.f32 %v2057_v46, %v2037_v44  ;;  %v4103_v34 = vld [vmem:[%s8359_s1 + $0x22c8] sm:$0xff]  ;;  %v3949_v36 = vld [vmem:[%s8359_s1 + $0x1df8] sm:$0xff] }
 0x228   : > { %2613 = vmatpush.msrb.mxu0 %v3857_v38  ;;  %2633 = vmatpush.msrb.mxu1 %v4001_v41  ;;  %v4093_v37 = vld [vmem:[%s8359_s1 + $0x2278] sm:$0xff]  ;;  %v3950_v38 = vld [vmem:[%s8359_s1 + $0x1e00] sm:$0xff] }
 0x229   : > { %2653 = vmatpush.msrb.mxu2 %v3858_v42  ;;  %2673 = vmatpush.msrb.mxu3 %v4002_v43  ;;  %v7458_v59 = vmax.f32 %v1527_v7, %v2058_v49  ;;  %v3986_v7 = vld [vmem:[%s8359_s1 + $0x1f20] sm:$0xff]  ;;  %v3940_v42 = vld [vmem:[%s8359_s1 + $0x1db0] sm:$0xff]  ;;  %v3941_v44 = vld [vmem:[%s8359_s1 + $0x1db8] sm:$0xff] }
 0x22a   : > { %2614 = vmatmul.f32.vlgmr.msrb.gmra.mxu0 %v7046_v60  ;;  %2634 = vmatmul.f32.vlgmr.msrb.gmra.mxu1 %v7050_v63  ;;  %v4094_v41 = vld [vmem:[%s8359_s1 + $0x2280] sm:$0xff]  ;;  %v4084_v43 = vld [vmem:[%s8359_s1 + $0x2230] sm:$0xff]  ;;  %v4085_v46 = vld [vmem:[%s8359_s1 + $0x2238] sm:$0xff] }
 0x22b   : > { %2654 = vmatmul.f32.vlgmr.msrb.gmra.mxu2 %v7046_v60  ;;  %2674 = vmatmul.f32.vlgmr.msrb.gmra.mxu3 %v7050_v63  ;;  %v3931_v49 = vld [vmem:[%s8359_s1 + $0x1d68] sm:$0xff] }
 0x22c   : > { %2678 = vmatpush.msra.mxu0 %v3994_v54  ;;  %2698 = vmatpush.msra.mxu1 %v4138_v57  ;;  %v4075_v54 = vld [vmem:[%s8359_s1 + $0x21e8] sm:$0xff]  ;;  %v3932_v57 = vld [vmem:[%s8359_s1 + $0x1d70] sm:$0xff] }
 0x22d   : > { %2718 = vmatpush.msra.mxu2 %v3995_v2  ;;  %2738 = vmatpush.msra.mxu3 %v4139_v3  ;;  %v4076_v2 = vld [vmem:[%s8359_s1 + $0x21f0] sm:$0xff]  ;;  %v7558_v3 = vpop.f32.mrf.mxu0 }
 0x22e   : > { %2679 = vmatpush.msra.mxu0 %v3985_v33  ;;  %2699 = vmatpush.msra.mxu1 %v4129_v61  ;;  %v7560_v33 = vpop.f32.mrf.mxu1  ;;  %v3922_v61 = vld [vmem:[%s8359_s1 + $0x1d20] sm:$0xff] }
 0x22f   : > { %2719 = vmatpush.msra.mxu2 %v3986_v7  ;;  %2739 = vmatpush.msra.mxu3 %v4130_v4  ;;  %v4066_v7 = vld [vmem:[%s8359_s1 + $0x21a0] sm:$0xff]  ;;  %v3923_v4 = vld [vmem:[%s8359_s1 + $0x1d28] sm:$0xff] }
 0x230   : > { %2680 = vmatpush.msra.mxu0 %v3976_v6  ;;  %2700 = vmatpush.msra.mxu1 %v4120_v8  ;;  %v4067_v6 = vld [vmem:[%s8359_s1 + $0x21a8] sm:$0xff]  ;;  %v3913_v8 = vld [vmem:[%s8359_s1 + $0x1cd8] sm:$0xff] }
 0x231   : > { %2720 = vmatpush.msra.mxu2 %v3977_v12  ;;  %2740 = vmatpush.msra.mxu3 %v4121_v1  ;;  %v4057_v12 = vld [vmem:[%s8359_s1 + $0x2158] sm:$0xff]  ;;  %v3914_v1 = vld [vmem:[%s8359_s1 + $0x1ce0] sm:$0xff] }
 0x232   : > { %2681 = vmatpush.msra.mxu0 %v3967_v19  ;;  %2701 = vmatpush.msra.mxu1 %v4111_v20  ;;  %v4058_v19 = vld [vmem:[%s8359_s1 + $0x2160] sm:$0xff]  ;;  %v3904_v20 = vld [vmem:[%s8359_s1 + $0x1c90] sm:$0xff] }
 0x233   : > { %2721 = vmatpush.msra.mxu2 %v3968_v22  ;;  %2741 = vmatpush.msra.mxu3 %v4112_v24  ;;  %v4048_v22 = vld [vmem:[%s8359_s1 + $0x2110] sm:$0xff]  ;;  %v3905_v24 = vld [vmem:[%s8359_s1 + $0x1c98] sm:$0xff] }
 0x234   : > { %2682 = vmatpush.msra.mxu0 %v3958_v27  ;;  %2702 = vmatpush.msra.mxu1 %v4102_v29  ;;  %v4049_v27 = vld [vmem:[%s8359_s1 + $0x2118] sm:$0xff]  ;;  %v3895_v29 = vld [vmem:[%s8359_s1 + $0x1c48] sm:$0xff] }
 0x235   : > { %2722 = vmatpush.msra.mxu2 %v3959_v30  ;;  %2742 = vmatpush.msra.mxu3 %v4103_v34  ;;  %v4039_v30 = vld [vmem:[%s8359_s1 + $0x20c8] sm:$0xff]  ;;  %v3896_v34 = vld [vmem:[%s8359_s1 + $0x1c50] sm:$0xff] }
 0x236   : > { %2683 = vmatpush.msra.mxu0 %v3949_v36  ;;  %2703 = vmatpush.msra.mxu1 %v4093_v37  ;;  %v4040_v36 = vld [vmem:[%s8359_s1 + $0x20d0] sm:$0xff]  ;;  %v3886_v37 = vld [vmem:[%s8359_s1 + $0x1c00] sm:$0xff] }
 0x237   : > { %2723 = vmatpush.msra.mxu2 %v3950_v38  ;;  %2743 = vmatpush.msra.mxu3 %v4094_v41  ;;  %v4030_v38 = vld [vmem:[%s8359_s1 + $0x2080] sm:$0xff] }
 0x238   : > { %2684 = vmatpush.msra.mxu0 %v3940_v42  ;;  %2704 = vmatpush.msra.mxu1 %v4084_v43  ;;  %v3887_v43 = vld [vmem:[%s8359_s1 + $0x1c08] sm:$0xff] }
 0x239   : > { %2724 = vmatpush.msra.mxu2 %v3941_v44  ;;  %2744 = vmatpush.msra.mxu3 %v4085_v46  ;;  %v4031_v44 = vld [vmem:[%s8359_s1 + $0x2088] sm:$0xff] }
 0x23a   : > { %2685 = vmatpush.msra.mxu0 %v3931_v49  ;;  %2705 = vmatpush.msra.mxu1 %v4075_v54  ;;  %v3877_v49 = vld [vmem:[%s8359_s1 + $0x1bb8] sm:$0xff] }
 0x23b   : > { %2725 = vmatpush.msra.mxu2 %v3932_v57  ;;  %2745 = vmatpush.msra.mxu3 %v4076_v2  ;;  %v4021_v54 = vld [vmem:[%s8359_s1 + $0x2038] sm:$0xff]  ;;  %v3878_v57 = vld [vmem:[%s8359_s1 + $0x1bc0] sm:$0xff] }
 0x23c   : > { %2686 = vmatpush.msra.mxu0 %v3922_v61  ;;  %2706 = vmatpush.msra.mxu1 %v4066_v7  ;;  %v4022_v2 = vld [vmem:[%s8359_s1 + $0x2040] sm:$0xff]  ;;  %v3868_v7 = vld [vmem:[%s8359_s1 + $0x1b70] sm:$0xff] }
 0x23d   : > { %2726 = vmatpush.msra.mxu2 %v3923_v4  ;;  %2746 = vmatpush.msra.mxu3 %v4067_v6  ;;  %v4012_v4 = vld [vmem:[%s8359_s1 + $0x1ff0] sm:$0xff]  ;;  %v3869_v6 = vld [vmem:[%s8359_s1 + $0x1b78] sm:$0xff] }
 0x23e   : > { %2687 = vmatpush.msra.mxu0 %v3913_v8  ;;  %2707 = vmatpush.msra.mxu1 %v4057_v12  ;;  %v3860_v8 = vld [vmem:[%s8359_s1 + $0x1b30] sm:$0xff] }
 0x23f   : > { %2727 = vmatpush.msra.mxu2 %v3914_v1  ;;  %2747 = vmatpush.msra.mxu3 %v4058_v19  ;;  %v4004_v12 = vld [vmem:[%s8359_s1 + $0x1fb0] sm:$0xff] }
 0x240   : > { %2688 = vmatpush.msra.mxu0 %v3904_v20  ;;  %2708 = vmatpush.msra.mxu1 %v4048_v22  ;;  %v3996_v22 = vld [vmem:[%s8359_s1 + $0x1f70] sm:$0xff] }
 0x241   : > { %2728 = vmatpush.msra.mxu2 %v3905_v24  ;;  %2748 = vmatpush.msra.mxu3 %v4049_v27  ;;  %v2077_v41 = vpop.f32.mrf.mxu0  ;;  %v2097_v42 = vpop.f32.mrf.mxu1  ;;  %v4140_v24 = vld [vmem:[%s8359_s1 + $0x23f0] sm:$0xff] }
 0x242   : > { %2689 = vmatpush.msra.mxu0 %v3895_v29  ;;  %2709 = vmatpush.msra.mxu1 %v4039_v30  ;;  %v2098_v46 = vadd.f32 %v2097_v42, %v2077_v41  ;;  %v3997_v29 = vld [vmem:[%s8359_s1 + $0x1f78] sm:$0xff]  ;;  %v3970_v42 = vld [vmem:[%s8359_s1 + $0x1ea0] sm:$0xff] }
 0x243   : > { %2729 = vmatpush.msra.mxu2 %v3896_v34  ;;  %2749 = vmatpush.msra.mxu3 %v4040_v36  ;;  %v4141_v30 = vld [vmem:[%s8359_s1 + $0x23f8] sm:$0xff]  ;;  %v4122_v34 = vld [vmem:[%s8359_s1 + $0x2360] sm:$0xff]  ;;  %v3979_v36 = vld [vmem:[%s8359_s1 + $0x1ee8] sm:$0xff] }
 0x244   : > { %2690 = vmatpush.msra.mxu0 %v3886_v37  ;;  %2710 = vmatpush.msra.mxu1 %v4030_v38  ;;  %v7637_v61 = vmax.f32 %v1528_v28, %v2098_v46  ;;  %v4003_v28 = vld [vmem:[%s8359_s1 + $0x1fa8] sm:$0xff]  ;;  %v3969_v38 = vld [vmem:[%s8359_s1 + $0x1e98] sm:$0xff]  ;;  %v4104_v46 = vld [vmem:[%s8359_s1 + $0x22d0] sm:$0xff] }
 0x245   : > { %2730 = vmatpush.msra.mxu2 %v3887_v43  ;;  %2750 = vmatpush.msra.mxu3 %v4031_v44  ;;  %v4123_v37 = vld [vmem:[%s8359_s1 + $0x2368] sm:$0xff]  ;;  %v4113_v41 = vld [vmem:[%s8359_s1 + $0x2318] sm:$0xff]  ;;  %v4114_v43 = vld [vmem:[%s8359_s1 + $0x2320] sm:$0xff] }
 0x246   : > { %2691 = vmatpush.msra.mxu0 %v3877_v49  ;;  %2711 = vmatpush.msra.mxu1 %v4021_v54  ;;  %v3960_v44 = vld [vmem:[%s8359_s1 + $0x1e50] sm:$0xff]  ;;  %v3961_v49 = vld [vmem:[%s8359_s1 + $0x1e58] sm:$0xff] }
 0x247   : > { %2731 = vmatpush.msra.mxu2 %v3878_v57  ;;  %2751 = vmatpush.msra.mxu3 %v4022_v2  ;;  %v4105_v54 = vld [vmem:[%s8359_s1 + $0x22d8] sm:$0xff]  ;;  %v3951_v57 = vld [vmem:[%s8359_s1 + $0x1e08] sm:$0xff] }
 0x248   : > { %2692 = vmatpush.msra.mxu0 %v3868_v7  ;;  %2712 = vmatpush.msra.mxu1 %v4012_v4  ;;  %v2117_v1 = vpop.f32.mrf.mxu2  ;;  %v2137_v19 = vpop.f32.mrf.mxu3  ;;  %v4095_v2 = vld [vmem:[%s8359_s1 + $0x2288] sm:$0xff]  ;;  %v3952_v7 = vld [vmem:[%s8359_s1 + $0x1e10] sm:$0xff] }
 0x249   : > { %2732 = vmatpush.msra.mxu2 %v3869_v6  ;;  %2752 = vmatpush.msra.mxu3 %v4013_v35  ;;  %v2138_v20 = vadd.f32 %v2137_v19, %v2117_v1  ;;  %v4096_v4 = vld [vmem:[%s8359_s1 + $0x2290] sm:$0xff]  ;;  %v3942_v6 = vld [vmem:[%s8359_s1 + $0x1dc0] sm:$0xff] }
 0x24a   : > { %2693 = vmatpush.msra.mxu0 %v3859_v23  ;;  %2713 = vmatpush.msra.mxu1 %v4003_v28  ;;  %v4086_v35 = vld [vmem:[%s8359_s1 + $0x2240] sm:$0xff]  ;;  %v3943_v23 = vld [vmem:[%s8359_s1 + $0x1dc8] sm:$0xff] }
 0x24b   : > { %2733 = vmatpush.msra.mxu2 %v3860_v8  ;;  %2753 = vmatpush.msra.mxu3 %v4004_v12  ;;  %v7672_v27 = vmax.f32 %v1529_v55, %v2138_v20  ;;  %v3988_v55 = vld [vmem:[%s8359_s1 + $0x1f30] sm:$0xff]  ;;  %v4087_v28 = vld [vmem:[%s8359_s1 + $0x2248] sm:$0xff]  ;;  %v3933_v8 = vld [vmem:[%s8359_s1 + $0x1d78] sm:$0xff] }
 0x24c   : > { %2694 = vmatmul.f32.vlgmr.msra.gmra.mxu0 %v7046_v60  ;;  %2714 = vmatmul.f32.vlgmr.msra.gmra.mxu1 %v7050_v63  ;;  %v4077_v12 = vld [vmem:[%s8359_s1 + $0x21f8] sm:$0xff]  ;;  %v3934_v1 = vld [vmem:[%s8359_s1 + $0x1d80] sm:$0xff]  ;;  %v3924_v20 = vld [vmem:[%s8359_s1 + $0x1d30] sm:$0xff] }
 0x24d   : > { %2734 = vmatmul.f32.vlgmr.msra.gmra.mxu2 %v7046_v60  ;;  %2754 = vmatmul.f32.vlgmr.msra.gmra.mxu3 %v7050_v63  ;;  %v4132_v60 = vld [vmem:[%s8359_s1 + $0x23b0] sm:$0xff]  ;;  %v3978_v63 = vld [vmem:[%s8359_s1 + $0x1ee0] sm:$0xff] }
 0x24e   : > { %2758 = vmatpush.msrb.mxu0 %v3996_v22  ;;  %2778 = vmatpush.msrb.mxu1 %v4140_v24  ;;  %v4078_v19 = vld [vmem:[%s8359_s1 + $0x2200] sm:$0xff]  ;;  %v4068_v22 = vld [vmem:[%s8359_s1 + $0x21b0] sm:$0xff]  ;;  %v3925_v24 = vld [vmem:[%s8359_s1 + $0x1d38] sm:$0xff] }
 0x24f   : > { %2798 = vmatpush.msrb.mxu2 %v3997_v29  ;;  %2818 = vmatpush.msrb.mxu3 %v4141_v30  ;;  %v4069_v29 = vld [vmem:[%s8359_s1 + $0x21b8] sm:$0xff]  ;;  %v3915_v30 = vld [vmem:[%s8359_s1 + $0x1ce8] sm:$0xff] }
 0x250   : > { %2759 = vmatpush.msrb.mxu0 %v3987_v25  ;;  %2779 = vmatpush.msrb.mxu1 %v4131_v47  ;;  %v4059_v25 = vld [vmem:[%s8359_s1 + $0x2168] sm:$0xff]  ;;  %v3916_v47 = vld [vmem:[%s8359_s1 + $0x1cf0] sm:$0xff] }
 0x251   : > { %2799 = vmatpush.msrb.mxu2 %v3988_v55  ;;  %2819 = vmatpush.msrb.mxu3 %v4132_v60  ;;  %v4060_v55 = vld [vmem:[%s8359_s1 + $0x2170] sm:$0xff]  ;;  %v3906_v60 = vld [vmem:[%s8359_s1 + $0x1ca0] sm:$0xff] }
 0x252   : > { %2760 = vmatpush.msrb.mxu0 %v3978_v63  ;;  %2780 = vmatpush.msrb.mxu1 %v4122_v34  ;;  %v4050_v63 = vld [vmem:[%s8359_s1 + $0x2120] sm:$0xff]  ;;  %v3907_v34 = vld [vmem:[%s8359_s1 + $0x1ca8] sm:$0xff] }
 0x253   : > { %2800 = vmatpush.msrb.mxu2 %v3979_v36  ;;  %2820 = vmatpush.msrb.mxu3 %v4123_v37  ;;  %v4051_v36 = vld [vmem:[%s8359_s1 + $0x2128] sm:$0xff]  ;;  %v3897_v37 = vld [vmem:[%s8359_s1 + $0x1c58] sm:$0xff] }
 0x254   : > { %2761 = vmatpush.msrb.mxu0 %v3969_v38  ;;  %2781 = vmatpush.msrb.mxu1 %v4113_v41  ;;  %v4041_v38 = vld [vmem:[%s8359_s1 + $0x20d8] sm:$0xff]  ;;  %v3898_v41 = vld [vmem:[%s8359_s1 + $0x1c60] sm:$0xff] }
 0x255   : > { %2801 = vmatpush.msrb.mxu2 %v3970_v42  ;;  %2821 = vmatpush.msrb.mxu3 %v4114_v43  ;;  %v4042_v42 = vld [vmem:[%s8359_s1 + $0x20e0] sm:$0xff]  ;;  %v3888_v43 = vld [vmem:[%s8359_s1 + $0x1c10] sm:$0xff] }
 0x256   : > { %2762 = vmatpush.msrb.mxu0 %v3960_v44  ;;  %2782 = vmatpush.msrb.mxu1 %v4104_v46  ;;  %v4032_v44 = vld [vmem:[%s8359_s1 + $0x2090] sm:$0xff] }
 0x257   : > { %2802 = vmatpush.msrb.mxu2 %v3961_v49  ;;  %2822 = vmatpush.msrb.mxu3 %v4105_v54  ;;  %v3889_v54 = vld [vmem:[%s8359_s1 + $0x1c18] sm:$0xff] }
 0x258   : > { %2763 = vmatpush.msrb.mxu0 %v3951_v57  ;;  %2783 = vmatpush.msrb.mxu1 %v4095_v2  ;;  %v4033_v57 = vld [vmem:[%s8359_s1 + $0x2098] sm:$0xff] }
 0x259   : > { %2803 = vmatpush.msrb.mxu2 %v3952_v7  ;;  %2823 = vmatpush.msrb.mxu3 %v4096_v4  ;;  %v3879_v7 = vld [vmem:[%s8359_s1 + $0x1bc8] sm:$0xff] }
 0x25a   : > { %2764 = vmatpush.msrb.mxu0 %v3942_v6  ;;  %2784 = vmatpush.msrb.mxu1 %v4086_v35  ;;  %v4023_v4 = vld [vmem:[%s8359_s1 + $0x2048] sm:$0xff]  ;;  %v3880_v6 = vld [vmem:[%s8359_s1 + $0x1bd0] sm:$0xff] }
 0x25b   : > { %2804 = vmatpush.msrb.mxu2 %v3943_v23  ;;  %2824 = vmatpush.msrb.mxu3 %v4087_v28  ;;  %v4024_v35 = vld [vmem:[%s8359_s1 + $0x2050] sm:$0xff]  ;;  %v3870_v28 = vld [vmem:[%s8359_s1 + $0x1b80] sm:$0xff] }
 0x25c   : > { %2765 = vmatpush.msrb.mxu0 %v3933_v8  ;;  %2785 = vmatpush.msrb.mxu1 %v4077_v12  ;;  %v4014_v8 = vld [vmem:[%s8359_s1 + $0x2000] sm:$0xff]  ;;  %v3871_v12 = vld [vmem:[%s8359_s1 + $0x1b88] sm:$0xff] }
 0x25d   : > { %2805 = vmatpush.msrb.mxu2 %v3934_v1  ;;  %2825 = vmatpush.msrb.mxu3 %v4078_v19  ;;  %v3862_v1 = vld [vmem:[%s8359_s1 + $0x1b40] sm:$0xff] }
 0x25e   : > { %2766 = vmatpush.msrb.mxu0 %v3924_v20  ;;  %2786 = vmatpush.msrb.mxu1 %v4068_v22  ;;  %v4006_v19 = vld [vmem:[%s8359_s1 + $0x1fc0] sm:$0xff]  ;;  %v2902_v20 = vld [vmem:[%s8361_s3 + $0x78] sm:$0xff] }
 0x25f   : > { %2806 = vmatpush.msrb.mxu2 %v3925_v24  ;;  %2826 = vmatpush.msrb.mxu3 %v4069_v29  ;;  %v2918_v22 = vld [vmem:[%s8361_s3 + $0xf8] sm:$0xff]  ;;  %v4161_v24 = vld [vmem:[%s4591_s13] sm:$0xff]  ;;  %v4162_v29 = vld [vmem:[%s4591_s13 + $0x8] sm:$0xff] }
 0x260   : > { %2767 = vmatpush.msrb.mxu0 %v3915_v30  ;;  %2787 = vmatpush.msrb.mxu1 %v4059_v25  ;;  %v2934_v30 = vld [vmem:[%s8361_s3 + $0x178] sm:$0xff]  ;;  %v2901_v25 = vld [vmem:[%s8361_s3 + $0x70] sm:$0xff] }
 0x261   : > { %2807 = vmatpush.msrb.mxu2 %v3916_v47  ;;  %2827 = vmatpush.msrb.mxu3 %v4060_v55  ;;  %v2917_v47 = vld [vmem:[%s8361_s3 + $0xf0] sm:$0xff] }
 0x262   : > { %2768 = vmatpush.msrb.mxu0 %v3906_v60  ;;  %2788 = vmatpush.msrb.mxu1 %v4050_v63  ;;  %v2933_v55 = vld [vmem:[%s8361_s3 + $0x170] sm:$0xff]  ;;  %v2900_v60 = vld [vmem:[%s8361_s3 + $0x68] sm:$0xff] }
 0x263   : > { %2808 = vmatpush.msrb.mxu2 %v3907_v34  ;;  %2828 = vmatpush.msrb.mxu3 %v4051_v36  ;;  %v2157_v46 = vpop.f32.mrf.mxu0  ;;  %v2177_v49 = vpop.f32.mrf.mxu1  ;;  %v2916_v63 = vld [vmem:[%s8361_s3 + $0xe8] sm:$0xff]  ;;  %v2899_v36 = vld [vmem:[%s8361_s3 + $0x60] sm:$0xff] }
 0x264   : > { %2769 = vmatpush.msrb.mxu0 %v3897_v37  ;;  %2789 = vmatpush.msrb.mxu1 %v4041_v38  ;;  %v2178_v2 = vadd.f32 %v2177_v49, %v2157_v46  ;;  %v2932_v34 = vld [vmem:[%s8361_s3 + $0x168] sm:$0xff]  ;;  %v2915_v37 = vld [vmem:[%s8361_s3 + $0xe0] sm:$0xff]  ;;  %v2930_v46 = vld [vmem:[%s8361_s3 + $0x158] sm:$0xff] }
 0x265   : > { %2809 = vmatpush.msrb.mxu2 %v3898_v41  ;;  %2829 = vmatpush.msrb.mxu3 %v4042_v42  ;;  %v2931_v38 = vld [vmem:[%s8361_s3 + $0x160] sm:$0xff]  ;;  %v2950_v41 = vld [vmem:[%s8361_s3 + $0x1f8] sm:$0xff]  ;;  %v2948_v49 = vld [vmem:[%s8361_s3 + $0x1e8] sm:$0xff] }
 0x266   : > { %2770 = vmatpush.msrb.mxu0 %v3888_v43  ;;  %2790 = vmatpush.msrb.mxu1 %v4032_v44  ;;  %v7843_v23 = vmax.f32 %v1530_v0, %v2178_v2  ;;  %v4005_v0 = vld [vmem:[%s8359_s1 + $0x1fb8] sm:$0xff]  ;;  %v2949_v44 = vld [vmem:[%s8361_s3 + $0x1f0] sm:$0xff] }
 0x267   : > { %2810 = vmatpush.msrb.mxu2 %v3889_v54  ;;  %2830 = vmatpush.msrb.mxu3 %v4033_v57  ;;  %v2898_v42 = vld [vmem:[%s8361_s3 + $0x58] sm:$0xff]  ;;  %v2897_v54 = vld [vmem:[%s8361_s3 + $0x50] sm:$0xff] }
 0x268   : > { %2771 = vmatpush.msrb.mxu0 %v3879_v7  ;;  %2791 = vmatpush.msrb.mxu1 %v4023_v4  ;;  %v2914_v43 = vld [vmem:[%s8361_s3 + $0xd8] sm:$0xff]  ;;  %v2913_v57 = vld [vmem:[%s8361_s3 + $0xd0] sm:$0xff]  ;;  %v2947_v7 = vld [vmem:[%s8361_s3 + $0x1e0] sm:$0xff] }
 0x269   : > { %2811 = vmatpush.msrb.mxu2 %v3880_v6  ;;  %2831 = vmatpush.msrb.mxu3 %v4024_v35  ;;  %v2929_v2 = vld [vmem:[%s8361_s3 + $0x150] sm:$0xff]  ;;  %v2896_v4 = vld [vmem:[%s8361_s3 + $0x48] sm:$0xff] }
 0x26a   : > { %2772 = vmatpush.msrb.mxu0 %v3870_v28  ;;  %2792 = vmatpush.msrb.mxu1 %v4014_v8  ;;  %v2912_v6 = vld [vmem:[%s8361_s3 + $0xc8] sm:$0xff]  ;;  %v2946_v28 = vld [vmem:[%s8361_s3 + $0x1d8] sm:$0xff]  ;;  %v2895_v8 = vld [vmem:[%s8361_s3 + $0x40] sm:$0xff] }
 0x26b   : > { %2812 = vmatpush.msrb.mxu2 %v3871_v12  ;;  %2832 = vmatpush.msrb.mxu3 %v4015_v32  ;;  %v2928_v35 = vld [vmem:[%s8361_s3 + $0x148] sm:$0xff]  ;;  %v2911_v12 = vld [vmem:[%s8361_s3 + $0xc0] sm:$0xff] }
 0x26c   : > { %2773 = vmatpush.msrb.mxu0 %v3861_v10  ;;  %2793 = vmatpush.msrb.mxu1 %v4005_v0  ;;  %v2927_v32 = vld [vmem:[%s8361_s3 + $0x140] sm:$0xff]  ;;  %v2945_v10 = vld [vmem:[%s8361_s3 + $0x1d0] sm:$0xff]  ;;  %v2894_v0 = vld [vmem:[%s8361_s3 + $0x38] sm:$0xff] }
 0x26d   : > { %2813 = vmatpush.msrb.mxu2 %v3862_v1  ;;  %2833 = vmatpush.msrb.mxu3 %v4006_v19  ;;  %v2910_v1 = vld [vmem:[%s8361_s3 + $0xb8] sm:$0xff]  ;;  %v2495_v19 = vpop.f32.mrf.mxu2 }
 0x26e   : > { %2774 = vmatmul.f32.vlgmr.msrb.gmra.mxu0 %v4161_v24  ;;  %2794 = vmatmul.f32.vlgmr.msrb.gmra.mxu1 %v4162_v29 }
 0x26f   : > { %2814 = vmatmul.f32.vlgmr.msrb.gmra.mxu2 %v4161_v24  ;;  %2834 = vmatmul.f32.vlgmr.msrb.gmra.mxu3 %v4162_v29  ;;  %v2944_v24 = vld [vmem:[%s8361_s3 + $0x1c8] sm:$0xff]  ;;  %v1858_v29 = vadd.f32 %v7447_v51, %v7445_v50  ;;  %v2943_v50 = vld [vmem:[%s8361_s3 + $0x1c0] sm:$0xff] }
 0x270   : > { %3035 = vmatpush.msra.mxu0 %v2902_v20  ;;  %3055 = vmatpush.msra.mxu1 %v2918_v22  ;;  %v2515_v20 = vpop.f32.mrf.mxu3  ;;  %v2926_v22 = vld [vmem:[%s8361_s3 + $0x138] sm:$0xff] }
 0x271   : > { %3075 = vmatpush.msra.mxu2 %v2934_v30  ;;  %3095 = vmatpush.msra.mxu3 %v2950_v41  ;;  %v2893_v30 = vld [vmem:[%s8361_s3 + $0x30] sm:$0xff]  ;;  %v2516_v51 = vadd.f32 %v2515_v20, %v2495_v19  ;;  %v2923_v41 = vld [vmem:[%s8361_s3 + $0x120] sm:$0xff] }
 0x272   : > { %3036 = vmatpush.msra.mxu0 %v2901_v25  ;;  %3056 = vmatpush.msra.mxu1 %v2917_v47  ;;  %v2909_v25 = vld [vmem:[%s8361_s3 + $0xb0] sm:$0xff] }
 0x273   : > { %3076 = vmatpush.msra.mxu2 %v2933_v55  ;;  %3096 = vmatpush.msra.mxu3 %v2949_v44  ;;  %v2925_v47 = vld [vmem:[%s8361_s3 + $0x130] sm:$0xff]  ;;  %v2892_v55 = vld [vmem:[%s8361_s3 + $0x28] sm:$0xff] }
 0x274   : > { %3037 = vmatpush.msra.mxu0 %v2900_v60  ;;  %3057 = vmatpush.msra.mxu1 %v2916_v63  ;;  %v2908_v60 = vld [vmem:[%s8361_s3 + $0xa8] sm:$0xff]  ;;  %v1898_v63 = vadd.f32 %v7337_v40, %v7335_v39  ;;  %v2891_v39 = vld [vmem:[%s8361_s3 + $0x20] sm:$0xff] }
 0x275   : > { %3077 = vmatpush.msra.mxu2 %v2932_v34  ;;  %3097 = vmatpush.msra.mxu3 %v2948_v49  ;;  %v7998_v34 = vld [vmem:[%s8360_s2] sm:$0xff] }
 0x276   : > { %3038 = vmatpush.msra.mxu0 %v2899_v36  ;;  %3058 = vmatpush.msra.mxu1 %v2915_v37  ;;  %v2924_v36 = vld [vmem:[%s8361_s3 + $0x128] sm:$0xff]  ;;  %v2942_v37 = vld [vmem:[%s8361_s3 + $0x1b8] sm:$0xff]  ;;  %v2907_v40 = vld [vmem:[%s8361_s3 + $0xa0] sm:$0xff]  ;;  %v2181_v49 = vmax.f32 %v1523_v62, %v1898_v63 }
 0x277   : > { %3078 = vmatpush.msra.mxu2 %v2931_v38  ;;  %3098 = vmatpush.msra.mxu3 %v2947_v7  ;;  %v2180_v38 = vmax.f32 %v1522_v53, %v1858_v29  ;;  %v2851_v53 = vperm.slane %v7998_v34, 0  ;;  %v2940_v7 = vld [vmem:[%s8361_s3 + $0x1a8] sm:$0xff]  ;;  %v2921_v62 = vld [vmem:[%s8361_s3 + $0x110] sm:$0xff]  ;;  %v2919_v29 = vld [vmem:[%s8361_s3 + $0x100] sm:$0xff] }
 0x278   : > { %3039 = vmatpush.msra.mxu0 %v2898_v42  ;;  %3059 = vmatpush.msra.mxu1 %v2914_v43  ;;  %v2890_v42 = vld [vmem:[%s8361_s3 + $0x18] sm:$0xff]  ;;  %v2936_v63 = vld [vmem:[%s8361_s3 + $0x188] sm:$0xff] }
 0x279   : > { %3079 = vmatpush.msra.mxu2 %v2930_v46  ;;  %3099 = vmatpush.msra.mxu3 %v2946_v28  ;;  %v2838_v52 = vmax.f32 %v2180_v38, %v2516_v51  ;;  %v2906_v46 = vld [vmem:[%s8361_s3 + $0x98] sm:$0xff]  ;;  %v2888_v28 = vld [vmem:[%s8361_s3 + $0x8] sm:$0xff]  ;;  %v2937_v51 = vld [vmem:[%s8361_s3 + $0x190] sm:$0xff] }
 0x27a   : > { %3040 = vmatpush.msra.mxu0 %v2897_v54  ;;  %3060 = vmatpush.msra.mxu1 %v2913_v57  ;;  %v2852_v57 = vperm.slane %v7998_v34, 1  ;;  %v2935_v38 = vld [vmem:[%s8361_s3 + $0x180] sm:$0xff] }
 0x27b   : > { %3080 = vmatpush.msra.mxu2 %v2929_v2  ;;  %3100 = vmatpush.msra.mxu3 %v2945_v10  ;;  %v2922_v2 = vld [vmem:[%s8361_s3 + $0x118] sm:$0xff] }
 0x27c   : > { %3041 = vmatpush.msra.mxu0 %v2896_v4  ;;  %3061 = vmatpush.msra.mxu1 %v2912_v6  ;;  %v2889_v4 = vld [vmem:[%s8361_s3 + $0x10] sm:$0xff]  ;;  %v1938_v6 = vadd.f32 %v7508_v18, %v7506_v17  ;;  %v2887_v17 = vld [vmem:[%s8361_s3] sm:$0xff] }
 0x27d   : > { %3081 = vmatpush.msra.mxu2 %v2928_v35  ;;  %3101 = vmatpush.msra.mxu3 %v2944_v24  ;;  %v2869_v35 = vadd.f32 %v2851_v53, %v2838_v52  ;;  %v2903_v18 = vld [vmem:[%s8361_s3 + $0x80] sm:$0xff]  ;;  %v2853_v24 = vperm.slane %v7998_v34, 2  ;;  %v2997_v52 = vld [vmem:[%s8361_s3 + $0x370] sm:$0xff]  ;;  %v2960_v53 = vld [vmem:[%s8361_s3 + $0x248] sm:$0xff] }
 0x27e   : > { %3042 = vmatpush.msra.mxu0 %v2895_v8  ;;  %3062 = vmatpush.msra.mxu1 %v2911_v12  ;;  %v2904_v8 = vld [vmem:[%s8361_s3 + $0x88] sm:$0xff]  ;;  %v2182_v19 = vmax.f32 %v1524_v16, %v1938_v6  ;;  %v2965_v16 = vld [vmem:[%s8361_s3 + $0x270] sm:$0xff] }
 0x27f   : > { %3082 = vmatpush.msra.mxu2 %v2927_v32  ;;  %3102 = vmatpush.msra.mxu3 %v2943_v50  ;;  %v2920_v32 = vld [vmem:[%s8361_s3 + $0x108] sm:$0xff]  ;;  %v2878_v20 = vmax.f32 %v2869_v35, 0.0  ;;  %v2955_v35 = vld [vmem:[%s8361_s3 + $0x220] sm:$0xff] }
 0x280   : > { %3043 = vmatpush.msra.mxu0 %v2894_v0  ;;  %3063 = vmatpush.msra.mxu1 %v2910_v1  ;;  %v2964_v50 = vld [vmem:[%s8361_s3 + $0x268] sm:$0xff] }
 0x281   : > { %3083 = vmatpush.msra.mxu2 %v2926_v22  ;;  %3103 = vmatpush.msra.mxu3 %v2942_v37  ;;  %v2982_v37 = vld [vmem:[%s8361_s3 + $0x2f8] sm:$0xff]  ;;  %v2992_v6 = vld [vmem:[%s8361_s3 + $0x348] sm:$0xff] }
 0x282   : > { %3044 = vmatpush.msra.mxu0 %v2893_v30  ;;  %3064 = vmatpush.msra.mxu1 %v2909_v25  ;;  %v2966_v30 = vld [vmem:[%s8361_s3 + $0x278] sm:$0xff] }
 0x283   : > { %3084 = vmatpush.msra.mxu2 %v2925_v47  ;;  %3104 = vmatpush.msra.mxu3 %v2941_v56  ;;  %v2938_v25 = vld [vmem:[%s8361_s3 + $0x198] sm:$0xff] }
 0x284   : > { %3045 = vmatpush.msra.mxu0 %v2892_v55  ;;  %3065 = vmatpush.msra.mxu1 %v2908_v60  ;;  %v2963_v60 = vld [vmem:[%s8361_s3 + $0x260] sm:$0xff]  ;;  %v2998_v56 = vld [vmem:[%s8361_s3 + $0x378] sm:$0xff] }
 0x285   : > { %v2535_v43 = vpop.f32.mrf.mxu0  ;;  %v2555_v44 = vpop.f32.mrf.mxu1  ;;  %3085 = vmatpush.msra.mxu2 %v2924_v36  ;;  %3105 = vmatpush.msra.mxu3 %v2940_v7  ;;  %v2962_v36 = vld [vmem:[%s8361_s3 + $0x258] sm:$0xff]  ;;  %v2957_v7 = vld [vmem:[%s8361_s3 + $0x230] sm:$0xff] }
 0x286   : > { %3046 = vmatpush.msra.mxu0 %v2891_v39  ;;  %v2556_v54 = vadd.f32 %v2555_v44, %v2535_v43  ;;  %3066 = vmatpush.msra.mxu1 %v2907_v40  ;;  %v2981_v39 = vld [vmem:[%s8361_s3 + $0x2f0] sm:$0xff]  ;;  %v2996_v43 = vld [vmem:[%s8361_s3 + $0x368] sm:$0xff]  ;;  %v2959_v44 = vld [vmem:[%s8361_s3 + $0x240] sm:$0xff] }
 0x287   : > { %3086 = vmatpush.msra.mxu2 %v2923_v41  ;;  %3106 = vmatpush.msra.mxu3 %v2939_v5  ;;  %v2961_v40 = vld [vmem:[%s8361_s3 + $0x250] sm:$0xff]  ;;  %v2980_v41 = vld [vmem:[%s8361_s3 + $0x2e8] sm:$0xff] }
 0x288   : > { %3047 = vmatpush.msra.mxu0 %v2890_v42  ;;  %v2839_v58 = vmax.f32 %v2181_v49, %v2556_v54  ;;  %3067 = vmatpush.msra.mxu1 %v2906_v46  ;;  %v2979_v42 = vld [vmem:[%s8361_s3 + $0x2e0] sm:$0xff]  ;;  %v2978_v46 = vld [vmem:[%s8361_s3 + $0x2d8] sm:$0xff] }
 0x289   : > { %3087 = vmatpush.msra.mxu2 %v2922_v2  ;;  %3107 = vmatpush.msra.mxu3 %v2938_v25  ;;  %v2995_v49 = vld [vmem:[%s8361_s3 + $0x360] sm:$0xff]  ;;  %v2958_v54 = vld [vmem:[%s8361_s3 + $0x238] sm:$0xff] }
 0x28a   : > { %3048 = vmatpush.msra.mxu0 %v2889_v4  ;;  %v2870_v12 = vadd.f32 %v2852_v57, %v2839_v58  ;;  %3068 = vmatpush.msra.mxu1 %v2905_v13  ;;  %v2977_v57 = vld [vmem:[%s8361_s3 + $0x2d0] sm:$0xff]  ;;  %v2994_v2 = vld [vmem:[%s8361_s3 + $0x358] sm:$0xff]  ;;  %v2976_v4 = vld [vmem:[%s8361_s3 + $0x2c8] sm:$0xff] }
 0x28b   : > { %3088 = vmatpush.msra.mxu2 %v2921_v62  ;;  %3108 = vmatpush.msra.mxu3 %v2937_v51  ;;  %v2993_v13 = vld [vmem:[%s8361_s3 + $0x350] sm:$0xff]  ;;  %v2956_v58 = vld [vmem:[%s8361_s3 + $0x228] sm:$0xff]  ;;  %v2975_v62 = vld [vmem:[%s8361_s3 + $0x2c0] sm:$0xff] }
 0x28c   : > { %3049 = vmatpush.msra.mxu0 %v2888_v28  ;;  %v2879_v10 = vmax.f32 %v2870_v12, 0.0  ;;  %v2575_v0 = vpop.f32.mrf.mxu2  ;;  %v2595_v1 = vpop.f32.mrf.mxu3  ;;  %3069 = vmatpush.msra.mxu1 %v2904_v8  ;;  %v2974_v28 = vld [vmem:[%s8361_s3 + $0x2b8] sm:$0xff]  ;;  %v1978_v8 = vadd.f32 %v7389_v11, %v7387_v9  ;;  %v2991_v12 = vld [vmem:[%s8361_s3 + $0x340] sm:$0xff]  ;;  %v2953_v9 = vld [vmem:[%s8361_s3 + $0x210] sm:$0xff] }
 0x28d   : > { %v2596_v22 = vadd.f32 %v2595_v1, %v2575_v0  ;;  %3089 = vmatpush.msra.mxu2 %v2920_v32  ;;  %3109 = vmatpush.msra.mxu3 %v2936_v63  ;;  %v2954_v32 = vld [vmem:[%s8361_s3 + $0x218] sm:$0xff]  ;;  %v2972_v11 = vld [vmem:[%s8361_s3 + $0x2a8] sm:$0xff]  ;;  %v2967_v63 = vld [vmem:[%s8361_s3 + $0x280] sm:$0xff] }
 0x28e   : > { %3050 = vmatpush.msra.mxu0 %v2887_v17  ;;  %3070 = vmatpush.msra.mxu1 %v2903_v18  ;;  %v2973_v17 = vld [vmem:[%s8361_s3 + $0x2b0] sm:$0xff]  ;;  %v2183_v0 = vmax.f32 %v1525_v31, %v1978_v8  ;;  %v2971_v31 = vld [vmem:[%s8361_s3 + $0x2a0] sm:$0xff]  ;;  %v2970_v25 = vld [vmem:[%s8361_s3 + $0x298] sm:$0xff] }
 0x28f   : > { %3051 = vmatmul.f32.vlgmr.msra.gmra.mxu0 %v2878_v20  ;;  %v2840_v14 = vmax.f32 %v2182_v19, %v2596_v22  ;;  %3071 = vmatmul.f32.vlgmr.msra.gmra.mxu1 %v2879_v10  ;;  %v2854_v19 = vperm.slane %v7998_v34, 3  ;;  %v2952_v20 = vld [vmem:[%s8361_s3 + $0x208] sm:$0xff] }
 0x290   : > { %3090 = vmatpush.msra.mxu2 %v2919_v29  ;;  %3115 = vmatpush.msrb.mxu0 %v2966_v30  ;;  %v2990_v29 = vld [vmem:[%s8361_s3 + $0x338] sm:$0xff]  ;;  %v2968_v51 = vld [vmem:[%s8361_s3 + $0x288] sm:$0xff] }
 0x291   : > { %v2871_v47 = vadd.f32 %v2853_v24, %v2840_v14  ;;  %3135 = vmatpush.msrb.mxu1 %v2982_v37  ;;  %3110 = vmatpush.msra.mxu3 %v2935_v38  ;;  %v2018_v24 = vadd.f32 %v7560_v33, %v7558_v3  ;;  %v3014_v37 = vld [vmem:[%s8361_s3 + $0x3f8] sm:$0xff]  ;;  %v2985_v38 = vld [vmem:[%s8361_s3 + $0x310] sm:$0xff] }
 0x292   : > { %3116 = vmatpush.msrb.mxu0 %v2965_v16  ;;  %3155 = vmatpush.msrb.mxu2 %v2998_v56  ;;  %v2855_v16 = vperm.slane %v7998_v34, 4  ;;  %v3030_v56 = vld [vmem:[%s8361_s3 + $0x478] sm:$0xff] }
 0x293   : > { %v2880_v55 = vmax.f32 %v2871_v47, 0.0  ;;  %3136 = vmatpush.msrb.mxu1 %v2981_v39  ;;  %v2184_v3 = vmax.f32 %v1526_v48, %v2018_v24  ;;  %v2989_v47 = vld [vmem:[%s8361_s3 + $0x330] sm:$0xff]  ;;  %3175 = vmatpush.msrb.mxu3 %v3014_v37  ;;  %v2857_v24 = vperm.slane %v7998_v34, 6 }
 0x294   : > { %3117 = vmatpush.msrb.mxu0 %v2964_v50  ;;  %3156 = vmatpush.msrb.mxu2 %v2997_v52  ;;  %v2969_v50 = vld [vmem:[%s8361_s3 + $0x290] sm:$0xff]  ;;  %v2983_v52 = vld [vmem:[%s8361_s3 + $0x300] sm:$0xff] }
 0x295   : > { %3091 = vmatmul.f32.vlgmr.msra.gmra.mxu2 %v2880_v55  ;;  %3137 = vmatpush.msrb.mxu1 %v2980_v41  ;;  %v2987_v55 = vld [vmem:[%s8361_s3 + $0x320] sm:$0xff]  ;;  %v3013_v39 = vld [vmem:[%s8361_s3 + $0x3f0] sm:$0xff]  ;;  %v3012_v41 = vld [vmem:[%s8361_s3 + $0x3e8] sm:$0xff] }
 0x296   : > { %3118 = vmatpush.msrb.mxu0 %v2963_v60  ;;  %3157 = vmatpush.msrb.mxu2 %v2996_v43  ;;  %v3028_v43 = vld [vmem:[%s8361_s3 + $0x468] sm:$0xff] }
 0x297   : > { %3138 = vmatpush.msrb.mxu1 %v2979_v42  ;;  %3176 = vmatpush.msrb.mxu3 %v3013_v39  ;;  %v3011_v42 = vld [vmem:[%s8361_s3 + $0x3e0] sm:$0xff] }
 0x298   : > { %3119 = vmatpush.msrb.mxu0 %v2962_v36  ;;  %3158 = vmatpush.msrb.mxu2 %v2995_v49  ;;  %v2986_v36 = vld [vmem:[%s8361_s3 + $0x318] sm:$0xff]  ;;  %v3009_v49 = vld [vmem:[%s8361_s3 + $0x3d0] sm:$0xff] }
 0x299   : > { %3139 = vmatpush.msrb.mxu1 %v2978_v46  ;;  %3177 = vmatpush.msrb.mxu3 %v3012_v41  ;;  %v3027_v46 = vld [vmem:[%s8361_s3 + $0x460] sm:$0xff] }
 0x29a   : > { %3120 = vmatpush.msrb.mxu0 %v2961_v40  ;;  %3159 = vmatpush.msrb.mxu2 %v2994_v2  ;;  %v2984_v40 = vld [vmem:[%s8361_s3 + $0x308] sm:$0xff]  ;;  %v3025_v2 = vld [vmem:[%s8361_s3 + $0x450] sm:$0xff] }
 0x29b   : > { %3140 = vmatpush.msrb.mxu1 %v2977_v57  ;;  %3178 = vmatpush.msrb.mxu3 %v3011_v42  ;;  %v3008_v57 = vld [vmem:[%s8361_s3 + $0x3c8] sm:$0xff] }
 0x29c   : > { %3121 = vmatpush.msrb.mxu0 %v2960_v53  ;;  %3160 = vmatpush.msrb.mxu2 %v2993_v13  ;;  %v3029_v53 = vld [vmem:[%s8361_s3 + $0x470] sm:$0xff]  ;;  %v3006_v13 = vld [vmem:[%s8361_s3 + $0x3b8] sm:$0xff] }
 0x29d   : > { %3141 = vmatpush.msrb.mxu1 %v2976_v4  ;;  %v3024_v4 = vld [vmem:[%s8361_s3 + $0x448] sm:$0xff] }
 0x29e   : > { %3122 = vmatpush.msrb.mxu0 %v2959_v44  ;;  %3161 = vmatpush.msrb.mxu2 %v2992_v6  ;;  %v3010_v44 = vld [vmem:[%s8361_s3 + $0x3d8] sm:$0xff] }
 0x29f   : > { %3142 = vmatpush.msrb.mxu1 %v2975_v62  ;;  %3179 = vmatpush.msrb.mxu3 %v3010_v44  ;;  %v3005_v62 = vld [vmem:[%s8361_s3 + $0x3b0] sm:$0xff] }
 0x2a0   : > { %3123 = vmatpush.msrb.mxu0 %v2958_v54  ;;  %3162 = vmatpush.msrb.mxu2 %v2991_v12  ;;  %v3026_v54 = vld [vmem:[%s8361_s3 + $0x458] sm:$0xff]  ;;  %v2856_v12 = vperm.slane %v7998_v34, 5 }
 0x2a1   : > { %3143 = vmatpush.msrb.mxu1 %v2974_v28  ;;  %3180 = vmatpush.msrb.mxu3 %v3009_v49  ;;  %v3004_v28 = vld [vmem:[%s8361_s3 + $0x3a8] sm:$0xff] }
 0x2a2   : > { %3124 = vmatpush.msrb.mxu0 %v2957_v7  ;;  %3163 = vmatpush.msrb.mxu2 %v2990_v29  ;;  %v3007_v7 = vld [vmem:[%s8361_s3 + $0x3c0] sm:$0xff] }
 0x2a3   : > { %3144 = vmatpush.msrb.mxu1 %v2973_v17  ;;  %3181 = vmatpush.msrb.mxu3 %v3008_v57  ;;  %v3003_v17 = vld [vmem:[%s8361_s3 + $0x3a0] sm:$0xff] }
 0x2a4   : > { %3125 = vmatpush.msrb.mxu0 %v2956_v58  ;;  %3164 = vmatpush.msrb.mxu2 %v2989_v47  ;;  %v3023_v58 = vld [vmem:[%s8361_s3 + $0x440] sm:$0xff] }
 0x2a5   : > { %3145 = vmatpush.msrb.mxu1 %v2972_v11  ;;  %3182 = vmatpush.msrb.mxu3 %v3007_v7  ;;  %v2999_v29 = vld [vmem:[%s8361_s3 + $0x380] sm:$0xff] }
 0x2a6   : > { %3126 = vmatpush.msrb.mxu0 %v2955_v35  ;;  %3165 = vmatpush.msrb.mxu2 %v2988_v15 }
 0x2a7   : > { %v2615_v18 = vpop.f32.mrf.mxu0  ;;  %v2635_v10 = vpop.f32.mrf.mxu1  ;;  %3146 = vmatpush.msrb.mxu1 %v2971_v31  ;;  %3183 = vmatpush.msrb.mxu3 %v3006_v13 }
 0x2a8   : > { %v2636_v1 = vadd.f32 %v2635_v10, %v2615_v18  ;;  %3127 = vmatpush.msrb.mxu0 %v2954_v32  ;;  %3166 = vmatpush.msrb.mxu2 %v2987_v55  ;;  %v3022_v18 = vld [vmem:[%s8361_s3 + $0x438] sm:$0xff] }
 0x2a9   : > { %3147 = vmatpush.msrb.mxu1 %v2970_v25  ;;  %3184 = vmatpush.msrb.mxu3 %v3005_v62 }
 0x2aa   : > { %v2841_v22 = vmax.f32 %v2183_v0, %v2636_v1  ;;  %3128 = vmatpush.msrb.mxu0 %v2953_v9  ;;  %3167 = vmatpush.msrb.mxu2 %v2986_v36  ;;  %v3002_v9 = vld [vmem:[%s8361_s3 + $0x398] sm:$0xff] }
 0x2ab   : > { %3148 = vmatpush.msrb.mxu1 %v2969_v50  ;;  %3185 = vmatpush.msrb.mxu3 %v3004_v28  ;;  %v2858_v50 = vperm.slane %v7998_v34, 7  ;;  %v4154_v34 = vld [vmem:[%s8362_s4] ss:$0 sm:$0xff] }
 0x2ac   : > { %v2872_v26 = vadd.f32 %v2854_v19, %v2841_v22  ;;  %3129 = vmatpush.msrb.mxu0 %v2952_v20  ;;  %3168 = vmatpush.msrb.mxu2 %v2985_v38  ;;  %v3001_v19 = vld [vmem:[%s8361_s3 + $0x390] sm:$0xff]  ;;  %v3020_v20 = vld [vmem:[%s8361_s3 + $0x428] sm:$0xff] }
 0x2ad   : > { %3149 = vmatpush.msrb.mxu1 %v2968_v51  ;;  %3186 = vmatpush.msrb.mxu3 %v3003_v17 }
 0x2ae   : > { %v2881_v30 = vmax.f32 %v2872_v26, 0.0  ;;  %v2655_v5 = vpop.f32.mrf.mxu2  ;;  %v2675_v14 = vpop.f32.mrf.mxu3  ;;  %3130 = vmatpush.msrb.mxu0 %v2951_v21  ;;  %3169 = vmatpush.msrb.mxu2 %v2984_v40  ;;  %v3000_v21 = vld [vmem:[%s8361_s3 + $0x388] sm:$0xff]  ;;  %v3019_v26 = vld [vmem:[%s8361_s3 + $0x420] sm:$0xff] }
 0x2af   : > { %v2676_v33 = vadd.f32 %v2675_v14, %v2655_v5  ;;  %3150 = vmatpush.msrb.mxu1 %v2967_v63  ;;  %3187 = vmatpush.msrb.mxu3 %v3002_v9  ;;  %v3017_v14 = vld [vmem:[%s8361_s3 + $0x410] sm:$0xff]  ;;  %v4153_v63 = vld [vmem:[%s8360_s2 + $0x8] ss:$0 sm:$0xff] }
 0x2b0   : > { %3111 = vmatmul.f32.vlgmr.msra.gmra.mxu3 %v2881_v30  ;;  %3195 = vmatpush.msra.mxu0 %v3030_v56  ;;  %v3018_v30 = vld [vmem:[%s8361_s3 + $0x418] sm:$0xff] }
 0x2b1   : > { %v2842_v45 = vmax.f32 %v2184_v3, %v2676_v33  ;;  %3170 = vmatpush.msrb.mxu2 %v2983_v52  ;;  %3188 = vmatpush.msrb.mxu3 %v3001_v19  ;;  %v3015_v33 = vld [vmem:[%s8361_s3 + $0x400] sm:$0xff] }
 0x2b2   : > { %3196 = vmatpush.msra.mxu0 %v3029_v53 }
 0x2b3   : > { %v2873_v48 = vadd.f32 %v2855_v16, %v2842_v45  ;;  %3189 = vmatpush.msrb.mxu3 %v3000_v21 }
 0x2b4   : > { %3197 = vmatpush.msra.mxu0 %v3028_v43 }
 0x2b5   : > { %v2882_v60 = vmax.f32 %v2873_v48, 0.0  ;;  %3190 = vmatpush.msrb.mxu3 %v2999_v29 }
 0x2b6   : > { %3198 = vmatpush.msra.mxu0 %v3027_v46 }
 0x2b7   : > { %3131 = vmatmul.f32.vlgmr.msrb.gmra.mxu0 %v2882_v60 }
 0x2b8   : > { %3199 = vmatpush.msra.mxu0 %v3026_v54 }
 0x2ba   : > { %3200 = vmatpush.msra.mxu0 %v3025_v2 }
 0x2bc   : > { %3201 = vmatpush.msra.mxu0 %v3024_v4 }
 0x2be   : > { %3202 = vmatpush.msra.mxu0 %v3023_v58 }
 0x2c0   : > { %3203 = vmatpush.msra.mxu0 %v3022_v18 }
 0x2c9   : > { %v2695_v6 = vpop.f32.mrf.mxu0  ;;  %v2715_v35 = vpop.f32.mrf.mxu1 }
 0x2ca   : > { %v2716_v8 = vadd.f32 %v2715_v35, %v2695_v6 }
 0x2cc   : > { %v2843_v32 = vmax.f32 %v7458_v59, %v2716_v8  ;;  %v3021_v59 = vld [vmem:[%s8361_s3 + $0x430] sm:$0xff] }
 0x2cd   : > { %3204 = vmatpush.msra.mxu0 %v3021_v59 }
 0x2ce   : > { %v2874_v10 = vadd.f32 %v2856_v12, %v2843_v32 }
 0x2cf   : > { %3205 = vmatpush.msra.mxu0 %v3020_v20 }
 0x2d0   : > { %v2883_v11 = vmax.f32 %v2874_v10, 0.0  ;;  %v2735_v0 = vpop.f32.mrf.mxu2  ;;  %v2755_v1 = vpop.f32.mrf.mxu3 }
 0x2d1   : > { %v2756_v22 = vadd.f32 %v2755_v1, %v2735_v0  ;;  %3206 = vmatpush.msra.mxu0 %v3019_v26 }
 0x2d2   : > { %3151 = vmatmul.f32.vlgmr.msrb.gmra.mxu1 %v2883_v11 }
 0x2d3   : > { %v2844_v31 = vmax.f32 %v7637_v61, %v2756_v22  ;;  %3207 = vmatpush.msra.mxu0 %v3018_v30  ;;  %v3016_v61 = vld [vmem:[%s8361_s3 + $0x408] sm:$0xff] }
 0x2d5   : > { %v2875_v5 = vadd.f32 %v2857_v24, %v2844_v31  ;;  %3208 = vmatpush.msra.mxu0 %v3017_v14 }
 0x2d7   : > { %v2884_v3 = vmax.f32 %v2875_v5, 0.0  ;;  %3209 = vmatpush.msra.mxu0 %v3016_v61 }
 0x2d9   : > { %3171 = vmatmul.f32.vlgmr.msrb.gmra.mxu2 %v2884_v3  ;;  %3210 = vmatpush.msra.mxu0 %v3015_v33 }
 0x2eb   : > { %v2775_v16 = vpop.f32.mrf.mxu0  ;;  %v2795_v25 = vpop.f32.mrf.mxu1 }
 0x2ec   : > { %v2796_v47 = vadd.f32 %v2795_v25, %v2775_v16 }
 0x2ee   : > { %v2845_v15 = vmax.f32 %v7672_v27, %v2796_v47 }
 0x2f0   : > { %v2876_v45 = vadd.f32 %v2858_v50, %v2845_v15 }
 0x2f2   : > { %v2885_v48 = vmax.f32 %v2876_v45, 0.0  ;;  %v2815_v51 = vpop.f32.mrf.mxu2  ;;  %v2835_v55 = vpop.f32.mrf.mxu3 }
 0x2f3   : > { %v2836_v60 = vadd.f32 %v2835_v55, %v2815_v51 }
 0x2f4   : > { %3191 = vmatmul.f32.vlgmr.msrb.gmra.mxu3 %v2885_v48 }
 0x2f5   : > { %v2846_v36 = vmax.f32 %v7843_v23, %v2836_v60 }
 0x2f7   : > { %v2877_v37 = vadd.f32 %v4153_v63, %v2846_v36 }
 0x2f9   : > { %v2886_v38 = vmax.f32 %v2877_v37, 0.0 }
 0x2fb   : > { %3211 = vmatmul.f32.vlgmr.msra.gmra.mxu0 %v2886_v38 }
 0x30c   : > { %v3052_v27 = vpop.f32.mrf.mxu0  ;;  %v3072_v39 = vpop.f32.mrf.mxu1 }
 0x30d   : > { %v3053_v40 = vadd.f32 %v4154_v34, %v3052_v27 }
 0x30f   : > { %v3073_v56 = vadd.f32 %v3072_v39, %v3053_v40 }
 0x318   : > { %v3092_v41 = vpop.f32.mrf.mxu2 }
 0x319   : > { %v3093_v53 = vadd.f32 %v3092_v41, %v3073_v56 }
 0x333   : > { %v3112_v52 = vpop.f32.mrf.mxu3 }
 0x334   : > { %v3113_v42 = vadd.f32 %v3112_v52, %v3093_v53  ;;  %v3132_v43 = vpop.f32.mrf.mxu0 }
 0x336   : > { %v3133_v46 = vadd.f32 %v3132_v43, %v3113_v42 }
 0x34f   : > { %v3152_v44 = vpop.f32.mrf.mxu1 }
 0x350   : > { %v3153_v49 = vadd.f32 %v3152_v44, %v3133_v46 }
 0x35c   : > { %v3172_v23 = vpop.f32.mrf.mxu2 }
 0x35d   : > { %v3173_v54 = vadd.f32 %v3172_v23, %v3153_v49 }
 0x377   : > { %v3192_v57 = vpop.f32.mrf.mxu3 }
 0x378   : > { %v3193_v2 = vadd.f32 %v3192_v57, %v3173_v54  ;;  %v3212_v7 = vpop.f32.mrf.mxu0 }
 0x37a   : > { %v3213_v4 = vadd.f32 %v3212_v7, %v3193_v2 }
 0x37c   : > { %v3215_v13 = vmax.f32 %v3213_v4, 0.0 }
 0x37e   : > { %3216 = vst [vmem:[%s222_s28] sm:$0xff] %v3215_v13 }
 0x37f PF: > { %s15_s18 = sadd.s32 1, %s4169_s18  }
 0x380   : > { %p12_p4 = scmp.ge.s32.totalorder %s15_s18, 4  }
 0x382   :  { %14 = sbr.rel (!%p12_p4) target bundleno = 1 (0x1), region = 73 }

</bundles_post_ra>
